<compile_context>
chip_gen: v5e
topology: v5e:2x2
jax: 0.10.0
libtpu: 0.0.40
codegen_flags: <defaults>
</compile_context>

<pallas_src>
import functools

import jax
import jax.numpy as jnp
from jax import lax
from jax.experimental import pallas as pl
from jax.experimental.pallas import tpu as pltpu


# -----------------------------------------------------------------------------
# Pallas kernel.
#   dk1 = J1
#   dk2 = J2 + (dt/2) * (J2 @ dk1)
#   dk3 = J3 + (dt/2) * (J3 @ dk2)
#   dk4 = J4 +  dt    * (J4 @ dk3)          (never materialized)
#   DM  = I + dt/6 * dk1 + dt/3 * dk2 + dt/3 * dk3 + dt/6 * dk4
# -----------------------------------------------------------------------------
def _jrk4_kernel(j1_ref, j2_ref, j3_hbm, j4_hbm, dm_ref,
                 j3_vmem, j4_vmem, sem, *, dt):
    f32 = jnp.float32
    bf16 = jnp.bfloat16

    # Start the J3 HBM->VMEM staging copy immediately; it is not needed until
    # after the first matmul, so the DMA hides under MXU work.
    cp3 = pltpu.make_async_copy(j3_hbm, j3_vmem, sem.at[0])
    cp3.start()

    c_half = 0.5 * dt
    sixth = dt / 6.0
    third = dt / 3.0

    # dk1 = J1 (bf16 input; used as MXU operand and as a dt/6-scaled DM term).
    dk1_b = j1_ref[...]

    # dk2 = J2 + (dt/2) * (J2 @ dk1) — bf16 MXU operands, f32 accumulation.
    prod2 = jnp.dot(j2_ref[...], dk1_b, preferred_element_type=f32)
    dk2 = j2_ref[...].astype(f32) + c_half * prod2

    # DM accumulation lives directly in the output ref; the identity is folded
    # in as a (row == col) mask add on this first write (no eye temporary, no
    # final full-matrix select pass).
    n = dm_ref.shape[0]
    row = lax.broadcasted_iota(jnp.int32, (n, n), 0)
    col = lax.broadcasted_iota(jnp.int32, (n, n), 1)
    dm_ref[...] = ((row == col).astype(f32)
                   + sixth * dk1_b.astype(f32)
                   + third * dk2)

    # Stagger the second staging copy: issue it only once cp3 has landed so
    # the two DMAs don't split HBM bandwidth; it hides under the dk3 matmul.
    cp3.wait()
    cp4 = pltpu.make_async_copy(j4_hbm, j4_vmem, sem.at[1])
    cp4.start()

    # dk3 = J3 + (dt/2) * (J3 @ dk2)
    prod3 = jnp.dot(j3_vmem[...], dk2.astype(bf16), preferred_element_type=f32)
    dk3 = j3_vmem[...].astype(f32) + c_half * prod3
    dm_ref[...] += third * dk3

    cp4.wait()
    # dk4 folded straight into DM (never materialized):
    #   DM += dt/6 * (J4 + dt * (J4 @ dk3))
    prod4 = jnp.dot(j4_vmem[...], dk3.astype(bf16), preferred_element_type=f32)
    dm_ref[...] += sixth * j4_vmem[...].astype(f32) + (sixth * dt) * prod4


def jrk4_dm_pallas(j1, j2, j3, j4, dt):
    n = j1.shape[0]
    # bf16 inputs: halves the HBM read traffic (mem-bound regime) and the
    # J3/J4 staging VMEM.  f32 math/accumulation stays inside the kernel.
    j1, j2, j3, j4 = (x.astype(jnp.bfloat16) for x in (j1, j2, j3, j4))

    # Pad to a lane/MXU-friendly size (multiple of 128); zero padding is exact
    # for this computation and the padded rows/cols are sliced off afterwards.
    n_pad = max(128, ((n + 127) // 128) * 128)
    if n_pad != n:
        pad = ((0, n_pad - n), (0, n_pad - n))
        j1, j2, j3, j4 = (jnp.pad(x, pad) for x in (j1, j2, j3, j4))

    kernel = functools.partial(_jrk4_kernel, dt=float(dt))
    vmem_spec = pl.BlockSpec(memory_space=pltpu.MemorySpace.VMEM)
    hbm_spec = pl.BlockSpec(memory_space=pl.ANY)

    # Traffic: 4 bf16 N^2 reads + 1 f32 N^2 write.
    cost = pl.CostEstimate(
        flops=3 * 2 * n_pad * n_pad * n_pad,
        transcendentals=0,
        bytes_accessed=4 * n_pad * n_pad * 2 + n_pad * n_pad * 4,
    )

    # VMEM footprint (rough): resident bf16 refs (J1,J2 + 2 staging) = 8*N^2 B,
    # f32 dm_ref = 4*N^2 B, peak f32/bf16 intermediates ~ 18*N^2 B  -> ~30*N^2.
    # Clamp to [16 MiB, 64 MiB] so small N keeps the default-ish limit and we
    # never ask for more than v7x's physical 64 MiB.
    vmem_limit = int(min(64 << 20, max(16 << 20, 30 * n_pad * n_pad + (2 << 20))))

    out = pl.pallas_call(
        kernel,
        out_shape=jax.ShapeDtypeStruct((n_pad, n_pad), jnp.float32),
        in_specs=[vmem_spec, vmem_spec, hbm_spec, hbm_spec],
        out_specs=vmem_spec,
        scratch_shapes=[
            pltpu.VMEM((n_pad, n_pad), jnp.bfloat16),   # J3 staging
            pltpu.VMEM((n_pad, n_pad), jnp.bfloat16),   # J4 staging
            pltpu.SemaphoreType.DMA((2,)),
        ],
        compiler_params=pltpu.CompilerParams(vmem_limit_bytes=vmem_limit),
        cost_estimate=cost,
    )(j1, j2, j3, j4)

    if n_pad != n:
        out = out[:n, :n]
    return out


# -----------------------------------------------------------------------------
# JRK4Method wrapper (glue in plain JAX: model evals + Jacobian extraction).
# -----------------------------------------------------------------------------
class JRK4Method:
    def __init__(self, model, dt):
        self.model = model
        self.dt = float(dt)

    def __call__(self, t, state):
        dt = self.dt
        f = self.model

        k1 = f(t, state)
        k2 = f(t + 0.5 * dt, state + 0.5 * dt * k1)
        k3 = f(t + 0.5 * dt, state + 0.5 * dt * k2)

        n = state.size

        def jac(tt, ss):
            # d f(tt, s) / d s  at s = ss, flattened to (N, N).
            return jax.jacrev(lambda s: f(tt, s))(ss).reshape(n, n)

        j1 = jac(t, state)
        j2 = jac(t + 0.5 * dt, state + 0.5 * k1 * dt)
        j3 = jac(t + 0.5 * dt, state + 0.5 * k2 * dt)
        j4 = jac(t + dt, state + k3 * dt)

        dm_flat = jrk4_dm_pallas(j1, j2, j3, j4, dt)
        return dm_flat.reshape(state.shape + state.shape)


# -----------------------------------------------------------------------------
# Synthetic dynamics model:  f(t, state) = tanh(state @ W + t * b)
# -----------------------------------------------------------------------------
def make_model(key, hidden):
    kw, kb = jax.random.split(key)
    W = 0.1 * jax.random.normal(kw, (hidden, hidden), dtype=jnp.float32)
    b = 0.1 * jax.random.normal(kb, (hidden,), dtype=jnp.float32)

    def model(t, state):
        return jnp.tanh(state @ W + t * b)

    return model


def _reference_dm(j1, j2, j3, j4, dt, n):
    eye = jnp.eye(n, dtype=jnp.float32)
    dot = lambda a, b: jnp.dot(a, b, preferred_element_type=jnp.float32)
    dk1 = j1
    dk2 = dot(j2, eye + dk1 * dt / 2)
    dk3 = dot(j3, eye + dk2 * dt / 2)
    dk4 = dot(j4, eye + dk3 * dt)
    return eye + (dt / 6.0) * (dk1 + 2 * dk2 + 2 * dk3 + dk4)


if __name__ == "__main__":
    key = jax.random.PRNGKey(0)
    k_model, k_state = jax.random.split(key)

    B, H = 8, 32          # state shape (B, H) -> N = 256
    dt = 0.01
    t = 0.0

    model = make_model(k_model, H)
    state = jax.random.normal(k_state, (B, H), dtype=jnp.float32)

    integrator = JRK4Method(model, dt)
    DM = integrator(t, state)
    DM = jax.block_until_ready(DM)

    assert DM.shape == (B, H, B, H), DM.shape

    # Cross-check the Pallas hot path against a pure-JAX f32 reference.
    # (Kernel uses bf16 Jacobian inputs / MXU operands; every quantized term
    # is scaled by dt in DM, so the error stays far below this tolerance.)
    n = B * H
    k1 = model(t, state)
    k2 = model(t + 0.5 * dt, state + 0.5 * dt * k1)
    k3 = model(t + 0.5 * dt, state + 0.5 * dt * k2)
    jac = lambda tt, ss: jax.jacrev(lambda s: model(tt, s))(ss).reshape(n, n)
    j1 = jac(t, state)
    j2 = jac(t + 0.5 * dt, state + 0.5 * k1 * dt)
    j3 = jac(t + 0.5 * dt, state + 0.5 * k2 * dt)
    j4 = jac(t + dt, state + k3 * dt)
    ref = _reference_dm(j1, j2, j3, j4, dt, n).reshape(B, H, B, H)
    assert jnp.allclose(DM, ref, atol=1e-4, rtol=1e-3), \
        float(jnp.max(jnp.abs(DM - ref)))

    print("KERNEL_OK")
</pallas_src>

<mosaic_0001>
module attributes {stable_mosaic.version = 11 : i64} {
  func.func @_jrk4_kernel(%arg0: memref<256x256xbf16, #tpu.memory_space<vmem>>, %arg1: memref<256x256xbf16, #tpu.memory_space<vmem>>, %arg2: memref<256x256xbf16, #tpu.memory_space<any>>, %arg3: memref<256x256xbf16, #tpu.memory_space<any>>, %arg4: memref<256x256xf32, #tpu.memory_space<vmem>>, %arg5: memref<256x256xbf16, #tpu.memory_space<vmem>>, %arg6: memref<256x256xbf16, #tpu.memory_space<vmem>>, %arg7: memref<2x!tpu.dma_semaphore, #tpu.memory_space<semaphore_mem>>) attributes {dimension_semantics = [], scalar_prefetch = 0 : i64, scratch_operands = 3 : i64, tpu.core_type = #tpu.core_type<tc>} {
    %c0_i32 = arith.constant 0 : i32
    %0 = tpu.memref_slice %arg7[%c0_i32] : memref<2x!tpu.dma_semaphore, #tpu.memory_space<semaphore_mem>> -> memref<1x!tpu.dma_semaphore, #tpu.memory_space<semaphore_mem>>
    %1 = tpu.memref_squeeze %0 : memref<1x!tpu.dma_semaphore, #tpu.memory_space<semaphore_mem>> -> memref<!tpu.dma_semaphore, #tpu.memory_space<semaphore_mem>>
    tpu.enqueue_dma source(%arg2 : memref<256x256xbf16, #tpu.memory_space<any>>) target(%arg5 : memref<256x256xbf16, #tpu.memory_space<vmem>>) target_semaphore(%1 : memref<!tpu.dma_semaphore, #tpu.memory_space<semaphore_mem>>)
    %c0 = arith.constant 0 : index
    %c0_0 = arith.constant 0 : index
    %2 = vector.load %arg0[%c0, %c0_0] : memref<256x256xbf16, #tpu.memory_space<vmem>>, vector<256x256xbf16>
    %c0_1 = arith.constant 0 : index
    %c0_2 = arith.constant 0 : index
    %3 = vector.load %arg1[%c0_1, %c0_2] : memref<256x256xbf16, #tpu.memory_space<vmem>>, vector<256x256xbf16>
    %cst = arith.constant dense<0.000000e+00> : vector<256x256xf32>
    %4 = tpu.matmul %3, %2, %cst {dimension_numbers = #tpu.dot_dimension_numbers<[1], [0], [0], [1], [0, 0, 1, 1], [], []>} : vector<256x256xbf16>, vector<256x256xbf16>, vector<256x256xf32> -> vector<256x256xf32>
    %c0_3 = arith.constant 0 : index
    %c0_4 = arith.constant 0 : index
    %5 = vector.load %arg1[%c0_3, %c0_4] : memref<256x256xbf16, #tpu.memory_space<vmem>>, vector<256x256xbf16>
    %6 = arith.extf %5 : vector<256x256xbf16> to vector<256x256xf32>
    %cst_5 = arith.constant 5.000000e-03 : f32
    %7 = vector.broadcast %cst_5 : f32 to vector<256x256xf32>
    %8 = arith.mulf %7, %4 : vector<256x256xf32>
    %9 = arith.addf %6, %8 : vector<256x256xf32>
    %10 = tpu.iota {dimensions = array<i32: 0>} : vector<256x256xi32>
    %11 = tpu.iota {dimensions = array<i32: 1>} : vector<256x256xi32>
    %12 = arith.cmpi eq, %10, %11 : vector<256x256xi32>
    %13 = arith.extui %12 : vector<256x256xi1> to vector<256x256xi32>
    %14 = arith.sitofp %13 : vector<256x256xi32> to vector<256x256xf32>
    %15 = arith.extf %2 : vector<256x256xbf16> to vector<256x256xf32>
    %cst_6 = arith.constant 0.00166666671 : f32
    %16 = vector.broadcast %cst_6 : f32 to vector<256x256xf32>
    %17 = arith.mulf %16, %15 : vector<256x256xf32>
    %18 = arith.addf %14, %17 : vector<256x256xf32>
    %cst_7 = arith.constant 0.00333333341 : f32
    %19 = vector.broadcast %cst_7 : f32 to vector<256x256xf32>
    %20 = arith.mulf %19, %9 : vector<256x256xf32>
    %21 = arith.addf %18, %20 : vector<256x256xf32>
    %c0_8 = arith.constant 0 : index
    %c0_9 = arith.constant 0 : index
    %22 = vector.load %arg4[%c0_8, %c0_9] : memref<256x256xf32, #tpu.memory_space<vmem>>, vector<256x256xf32>
    tpu.vector_store %arg4[%c0_8, %c0_9], %21 {strides = array<i32>} : memref<256x256xf32, #tpu.memory_space<vmem>>, vector<256x256xf32>,
    %c0_i32_10 = arith.constant 0 : i32
    %23 = tpu.memref_slice %arg7[%c0_i32_10] : memref<2x!tpu.dma_semaphore, #tpu.memory_space<semaphore_mem>> -> memref<1x!tpu.dma_semaphore, #tpu.memory_space<semaphore_mem>>
    %24 = tpu.memref_squeeze %23 : memref<1x!tpu.dma_semaphore, #tpu.memory_space<semaphore_mem>> -> memref<!tpu.dma_semaphore, #tpu.memory_space<semaphore_mem>>
    tpu.wait_dma2 semaphore(%24 : memref<!tpu.dma_semaphore, #tpu.memory_space<semaphore_mem>>) src(%arg2 : memref<256x256xbf16, #tpu.memory_space<any>>) dst(%arg5 : memref<256x256xbf16, #tpu.memory_space<vmem>>)
    %c1_i32 = arith.constant 1 : i32
    %25 = tpu.memref_slice %arg7[%c1_i32] : memref<2x!tpu.dma_semaphore, #tpu.memory_space<semaphore_mem>> -> memref<1x!tpu.dma_semaphore, #tpu.memory_space<semaphore_mem>>
    %26 = tpu.memref_squeeze %25 : memref<1x!tpu.dma_semaphore, #tpu.memory_space<semaphore_mem>> -> memref<!tpu.dma_semaphore, #tpu.memory_space<semaphore_mem>>
    tpu.enqueue_dma source(%arg3 : memref<256x256xbf16, #tpu.memory_space<any>>) target(%arg6 : memref<256x256xbf16, #tpu.memory_space<vmem>>) target_semaphore(%26 : memref<!tpu.dma_semaphore, #tpu.memory_space<semaphore_mem>>)
    %c0_11 = arith.constant 0 : index
    %c0_12 = arith.constant 0 : index
    %27 = vector.load %arg5[%c0_11, %c0_12] : memref<256x256xbf16, #tpu.memory_space<vmem>>, vector<256x256xbf16>
    %28 = arith.truncf %9 : vector<256x256xf32> to vector<256x256xbf16>
    %cst_13 = arith.constant dense<0.000000e+00> : vector<256x256xf32>
    %29 = tpu.matmul %27, %28, %cst_13 {dimension_numbers = #tpu.dot_dimension_numbers<[1], [0], [0], [1], [0, 0, 1, 1], [], []>} : vector<256x256xbf16>, vector<256x256xbf16>, vector<256x256xf32> -> vector<256x256xf32>
    %c0_14 = arith.constant 0 : index
    %c0_15 = arith.constant 0 : index
    %30 = vector.load %arg5[%c0_14, %c0_15] : memref<256x256xbf16, #tpu.memory_space<vmem>>, vector<256x256xbf16>
    %31 = arith.extf %30 : vector<256x256xbf16> to vector<256x256xf32>
    %cst_16 = arith.constant 5.000000e-03 : f32
    %32 = vector.broadcast %cst_16 : f32 to vector<256x256xf32>
    %33 = arith.mulf %32, %29 : vector<256x256xf32>
    %34 = arith.addf %31, %33 : vector<256x256xf32>
    %c0_17 = arith.constant 0 : index
    %c0_18 = arith.constant 0 : index
    %35 = vector.load %arg4[%c0_17, %c0_18] : memref<256x256xf32, #tpu.memory_space<vmem>>, vector<256x256xf32>
    %cst_19 = arith.constant 0.00333333341 : f32
    %36 = vector.broadcast %cst_19 : f32 to vector<256x256xf32>
    %37 = arith.mulf %36, %34 : vector<256x256xf32>
    %38 = arith.addf %35, %37 : vector<256x256xf32>
    %c0_20 = arith.constant 0 : index
    %c0_21 = arith.constant 0 : index
    %39 = vector.load %arg4[%c0_20, %c0_21] : memref<256x256xf32, #tpu.memory_space<vmem>>, vector<256x256xf32>
    tpu.vector_store %arg4[%c0_20, %c0_21], %38 {strides = array<i32>} : memref<256x256xf32, #tpu.memory_space<vmem>>, vector<256x256xf32>,
    %c1_i32_22 = arith.constant 1 : i32
    %40 = tpu.memref_slice %arg7[%c1_i32_22] : memref<2x!tpu.dma_semaphore, #tpu.memory_space<semaphore_mem>> -> memref<1x!tpu.dma_semaphore, #tpu.memory_space<semaphore_mem>>
    %41 = tpu.memref_squeeze %40 : memref<1x!tpu.dma_semaphore, #tpu.memory_space<semaphore_mem>> -> memref<!tpu.dma_semaphore, #tpu.memory_space<semaphore_mem>>
    tpu.wait_dma2 semaphore(%41 : memref<!tpu.dma_semaphore, #tpu.memory_space<semaphore_mem>>) src(%arg3 : memref<256x256xbf16, #tpu.memory_space<any>>) dst(%arg6 : memref<256x256xbf16, #tpu.memory_space<vmem>>)
    %c0_23 = arith.constant 0 : index
    %c0_24 = arith.constant 0 : index
    %42 = vector.load %arg6[%c0_23, %c0_24] : memref<256x256xbf16, #tpu.memory_space<vmem>>, vector<256x256xbf16>
    %43 = arith.truncf %34 : vector<256x256xf32> to vector<256x256xbf16>
    %cst_25 = arith.constant dense<0.000000e+00> : vector<256x256xf32>
    %44 = tpu.matmul %42, %43, %cst_25 {dimension_numbers = #tpu.dot_dimension_numbers<[1], [0], [0], [1], [0, 0, 1, 1], [], []>} : vector<256x256xbf16>, vector<256x256xbf16>, vector<256x256xf32> -> vector<256x256xf32>
    %c0_26 = arith.constant 0 : index
    %c0_27 = arith.constant 0 : index
    %45 = vector.load %arg4[%c0_26, %c0_27] : memref<256x256xf32, #tpu.memory_space<vmem>>, vector<256x256xf32>
    %c0_28 = arith.constant 0 : index
    %c0_29 = arith.constant 0 : index
    %46 = vector.load %arg6[%c0_28, %c0_29] : memref<256x256xbf16, #tpu.memory_space<vmem>>, vector<256x256xbf16>
    %47 = arith.extf %46 : vector<256x256xbf16> to vector<256x256xf32>
    %cst_30 = arith.constant 0.00166666671 : f32
    %48 = vector.broadcast %cst_30 : f32 to vector<256x256xf32>
    %49 = arith.mulf %48, %47 : vector<256x256xf32>
    %cst_31 = arith.constant 1.66666669E-5 : f32
    %50 = vector.broadcast %cst_31 : f32 to vector<256x256xf32>
    %51 = arith.mulf %50, %44 : vector<256x256xf32>
    %52 = arith.addf %49, %51 : vector<256x256xf32>
    %53 = arith.addf %45, %52 : vector<256x256xf32>
    %c0_32 = arith.constant 0 : index
    %c0_33 = arith.constant 0 : index
    %54 = vector.load %arg4[%c0_32, %c0_33] : memref<256x256xf32, #tpu.memory_space<vmem>>, vector<256x256xf32>
    tpu.vector_store %arg4[%c0_32, %c0_33], %53 {strides = array<i32>} : memref<256x256xf32, #tpu.memory_space<vmem>>, vector<256x256xf32>,
    return
  }
}

</mosaic_0001>

<bundles_post_ra>
// kernel: tpu_custom_call.1
= control target key start
LH: loop header
LB: loop body
LE: loop exit
PB: predicated region body
PF: predicated region fallthrough
CT: control target
= control target key end

     0   :  { %9 = vsyncpa [#allocation6], 0  ;;  %s5211_s0 = inlined_call_operand.hbm [shape: bf16[256,256], index: 0, kind: input, shape index: {}]   ;;  %s5212_s1 = inlined_call_operand.hbm [shape: bf16[256,256], index: 1, kind: input, shape index: {}]   ;;  %s5213_s2 = inlined_call_operand.hbm [shape: bf16[256,256], index: 2, kind: input, shape index: {}]   ;;  %s5214_s3 = inlined_call_operand.hbm [shape: bf16[256,256], index: 3, kind: input, shape index: {}]   ;;  %s5215_s4 = inlined_call_operand.hbm [shape: f32[256,256], index: 4, kind: output, shape index: {}]  }
   0x1   :  { %10 = vsyncpa [#allocation9], 0 }
   0x2   :  { %11 = vsyncpa [#allocation7], 0  ;;  %s16_s17 = sshll.u32 %s5211_s0, 4  ;;  %s4526_s18 = smov [#allocation5]   ;;  %s17_s17 = int_to_ptr.hbm [resolvable:$true] %s16_s17 }
   0x3   :  { %s18_s19 = sshll.u32 %s4526_s18, 4  ;;  %s29_s22 = sshll.u32 %s5212_s1, 4  ;;  %s19_s19 = int_to_ptr.vmem [resolvable:$true] %s18_s19  ;;  %s30_s22 = int_to_ptr.hbm [resolvable:$true] %s29_s22 }
   0x4   :  { %s4527_s23 = smov 128   ;;  %s4528_s24 = smov 8  }
   0x5   :  { %24 = dma.hbm_to_vmem [thread:$0]  %s17_s17, 4096, %s19_s19, [#allocation6], %s4527_s23, %s4527_s23, %s4528_s24  }
   0x6   :  { %s4529_s25 = smov [#allocation8]  }
   0x7   :  { %s31_s26 = sshll.u32 %s4529_s25, 4  ;;  %s32_s26 = int_to_ptr.vmem [resolvable:$true] %s31_s26 }
   0x8   :  { %37 = dma.hbm_to_vmem [thread:$0]  %s30_s22, 4096, %s32_s26, [#allocation9], %s4527_s23, %s4527_s23, %s4528_s24  }
   0x9   :  { %4516 = dma.done.wait [#allocation6], 4096  }
   0xa   :  { %4517 = vsyncadd [#allocation6], 4294963200 }
   0xb   :  { %4518 = dma.done.wait [#allocation9], 4096  }
   0xc   :  { %4519 = vsyncadd [#allocation9], 4294963200  ;;  %v3898_v0 = vld [vmem:[#allocation5 + $0x70] sm:$0xf]  ;;  %v4273_v1 = vld [vmem:[#allocation5 + $0x74] sm:$0xf0] }
   0xd   :  { %v3962_v2 = vld [vmem:[#allocation5 + $0xf0] sm:$0xf]  ;;  %v3899_v3 = vor.u32 %v4273_v1, %v3898_v0  ;;  %v4289_v4 = vld [vmem:[#allocation5 + $0xf4] sm:$0xf0]  ;;  %v4272_v5 = vld [vmem:[#allocation5 + $0x74] sm:$0xf] }
   0xe   :  { %v3900_v6 = vld [vmem:[#allocation5 + $0x78] sm:$0xf0]  ;;  %v3963_v7 = vor.u32 %v4289_v4, %v3962_v2  ;;  %v4288_v9 = vld [vmem:[#allocation5 + $0xf4] sm:$0xf]  ;;  %v3890_v11 = vld [vmem:[#allocation5 + $0x60] sm:$0xf] }
   0xf   :  { %v3903_v8 = vor.u32 %v4272_v5, %v3900_v6  ;;  %v3964_v10 = vld [vmem:[#allocation5 + $0xf8] sm:$0xf0]  ;;  %443 = vmatpush.bf16.msra.mxu0 %v3899_v3  ;;  %v4271_v13 = vld [vmem:[#allocation5 + $0x64] sm:$0xf0]  ;;  %v3954_v14 = vld [vmem:[#allocation5 + $0xe0] sm:$0xf] }
  0x10   :  { %v3967_v12 = vor.u32 %v4288_v9, %v3964_v10  ;;  %v4287_v15 = vld [vmem:[#allocation5 + $0xe4] sm:$0xf0]  ;;  %532 = vmatpush.bf16.msra.mxu1 %v3963_v7  ;;  %v3891_v16 = vor.u32 %v4271_v13, %v3890_v11  ;;  %v4270_v18 = vld [vmem:[#allocation5 + $0x64] sm:$0xf]  ;;  %v3892_v19 = vld [vmem:[#allocation5 + $0x68] sm:$0xf0] }
  0x11   :  { %621 = vmatpush.bf16.msra.mxu2 %v3903_v8  ;;  %v3955_v17 = vor.u32 %v4287_v15, %v3954_v14  ;;  %v4286_v20 = vld [vmem:[#allocation5 + $0xe4] sm:$0xf]  ;;  %v3895_v21 = vor.u32 %v4270_v18, %v3892_v19  ;;  %v3956_v22 = vld [vmem:[#allocation5 + $0xe8] sm:$0xf0]  ;;  %v3882_v23 = vld [vmem:[#allocation5 + $0x50] sm:$0xf] }
  0x12   :  { %710 = vmatpush.bf16.msra.mxu3 %v3967_v12  ;;  %v4269_v24 = vld [vmem:[#allocation5 + $0x54] sm:$0xf0]  ;;  %v3959_v25 = vor.u32 %v4286_v20, %v3956_v22  ;;  %v3946_v26 = vld [vmem:[#allocation5 + $0xd0] sm:$0xf]  ;;  %v4268_v28 = vld [vmem:[#allocation5 + $0x54] sm:$0xf] }
  0x13   :  { %v4285_v27 = vld [vmem:[#allocation5 + $0xd4] sm:$0xf0]  ;;  %444 = vmatpush.bf16.msra.mxu0 %v3891_v16  ;;  %v3883_v29 = vor.u32 %v4269_v24, %v3882_v23  ;;  %v3884_v30 = vld [vmem:[#allocation5 + $0x58] sm:$0xf0]  ;;  %v4284_v31 = vld [vmem:[#allocation5 + $0xd4] sm:$0xf] }
  0x14   :  { %v3948_v32 = vld [vmem:[#allocation5 + $0xd8] sm:$0xf0]  ;;  %533 = vmatpush.bf16.msra.mxu1 %v3955_v17  ;;  %v3947_v33 = vor.u32 %v4285_v27, %v3946_v26  ;;  %v3887_v34 = vor.u32 %v4268_v28, %v3884_v30  ;;  %v3874_v35 = vld [vmem:[#allocation5 + $0x40] sm:$0xf]  ;;  %v4267_v36 = vld [vmem:[#allocation5 + $0x44] sm:$0xf0] }
  0x15   :  { %622 = vmatpush.bf16.msra.mxu2 %v3895_v21  ;;  %v3938_v37 = vld [vmem:[#allocation5 + $0xc0] sm:$0xf]  ;;  %v3951_v38 = vor.u32 %v4284_v31, %v3948_v32  ;;  %v4283_v39 = vld [vmem:[#allocation5 + $0xc4] sm:$0xf0]  ;;  %v4266_v40 = vld [vmem:[#allocation5 + $0x44] sm:$0xf]  ;;  %v3875_v44 = vor.u32 %v4267_v36, %v3874_v35 }
  0x16   :  { %711 = vmatpush.bf16.msra.mxu3 %v3959_v25  ;;  %v3876_v41 = vld [vmem:[#allocation5 + $0x48] sm:$0xf0]  ;;  %v4282_v42 = vld [vmem:[#allocation5 + $0xc4] sm:$0xf]  ;;  %v3939_v45 = vor.u32 %v4283_v39, %v3938_v37  ;;  %v3866_v47 = vld [vmem:[#allocation5 + $0x30] sm:$0xf] }
  0x17   :  { %v3940_v43 = vld [vmem:[#allocation5 + $0xc8] sm:$0xf0]  ;;  %445 = vmatpush.bf16.msra.mxu0 %v3883_v29  ;;  %v3879_v46 = vor.u32 %v4266_v40, %v3876_v41  ;;  %v4265_v48 = vld [vmem:[#allocation5 + $0x34] sm:$0xf0]  ;;  %v3930_v49 = vld [vmem:[#allocation5 + $0xb0] sm:$0xf] }
  0x18   :  { %534 = vmatpush.bf16.msra.mxu1 %v3947_v33  ;;  %v3943_v50 = vor.u32 %v4282_v42, %v3940_v43  ;;  %v4281_v51 = vld [vmem:[#allocation5 + $0xb4] sm:$0xf0]  ;;  %v4264_v52 = vld [vmem:[#allocation5 + $0x34] sm:$0xf]  ;;  %v3868_v53 = vld [vmem:[#allocation5 + $0x38] sm:$0xf0]  ;;  %v3867_v56 = vor.u32 %v4265_v48, %v3866_v47 }
  0x19   :  { %623 = vmatpush.bf16.msra.mxu2 %v3887_v34  ;;  %v4280_v54 = vld [vmem:[#allocation5 + $0xb4] sm:$0xf]  ;;  %v3932_v55 = vld [vmem:[#allocation5 + $0xb8] sm:$0xf0]  ;;  %v3931_v57 = vor.u32 %v4281_v51, %v3930_v49  ;;  %v3871_v58 = vor.u32 %v4264_v52, %v3868_v53  ;;  %v3858_v59 = vld [vmem:[#allocation5 + $0x20] sm:$0xf] }
  0x1a   :  { %712 = vmatpush.bf16.msra.mxu3 %v3951_v38  ;;  %v4263_v60 = vld [vmem:[#allocation5 + $0x24] sm:$0xf0]  ;;  %v3922_v61 = vld [vmem:[#allocation5 + $0xa0] sm:$0xf]  ;;  %v3935_v62 = vor.u32 %v4280_v54, %v3932_v55  ;;  %v4262_v0 = vld [vmem:[#allocation5 + $0x24] sm:$0xf] }
  0x1b   :  { %446 = vmatpush.bf16.msra.mxu0 %v3875_v44  ;;  %v4279_v63 = vld [vmem:[#allocation5 + $0xa4] sm:$0xf0]  ;;  %v3860_v1 = vld [vmem:[#allocation5 + $0x28] sm:$0xf0]  ;;  %v4278_v2 = vld [vmem:[#allocation5 + $0xa4] sm:$0xf]  ;;  %v3859_v4 = vor.u32 %v4263_v60, %v3858_v59 }
  0x1c   :  { %535 = vmatpush.bf16.msra.mxu1 %v3939_v45  ;;  %v3924_v3 = vld [vmem:[#allocation5 + $0xa8] sm:$0xf0]  ;;  %v3923_v5 = vor.u32 %v4279_v63, %v3922_v61  ;;  %v3863_v6 = vor.u32 %v4262_v0, %v3860_v1  ;;  %v3850_v7 = vld [vmem:[#allocation5 + $0x10] sm:$0xf]  ;;  %v4261_v8 = vld [vmem:[#allocation5 + $0x14] sm:$0xf0] }
  0x1d   :  { %624 = vmatpush.bf16.msra.mxu2 %v3879_v46  ;;  %v3914_v9 = vld [vmem:[#allocation5 + $0x90] sm:$0xf]  ;;  %v3927_v10 = vor.u32 %v4278_v2, %v3924_v3  ;;  %v4277_v11 = vld [vmem:[#allocation5 + $0x94] sm:$0xf0]  ;;  %v4260_v12 = vld [vmem:[#allocation5 + $0x14] sm:$0xf]  ;;  %v3851_v16 = vor.u32 %v4261_v8, %v3850_v7 }
  0x1e   :  { %713 = vmatpush.bf16.msra.mxu3 %v3943_v50  ;;  %v3852_v13 = vld [vmem:[#allocation5 + $0x18] sm:$0xf0]  ;;  %v4276_v14 = vld [vmem:[#allocation5 + $0x94] sm:$0xf]  ;;  %v3915_v17 = vor.u32 %v4277_v11, %v3914_v9  ;;  %v3842_v19 = vld [vmem:[#allocation5] sm:$0xf] }
  0x1f   :  { %447 = vmatpush.bf16.msra.mxu0 %v3867_v56  ;;  %v3916_v15 = vld [vmem:[#allocation5 + $0x98] sm:$0xf0]  ;;  %v3855_v18 = vor.u32 %v4260_v12, %v3852_v13  ;;  %v4259_v20 = vld [vmem:[#allocation5 + $0x4] sm:$0xf0]  ;;  %v3906_v21 = vld [vmem:[#allocation5 + $0x80] sm:$0xf] }
  0x20   :  { %536 = vmatpush.bf16.msra.mxu1 %v3931_v57  ;;  %v3919_v22 = vor.u32 %v4276_v14, %v3916_v15  ;;  %v4275_v23 = vld [vmem:[#allocation5 + $0x84] sm:$0xf0]  ;;  %v4258_v24 = vld [vmem:[#allocation5 + $0x4] sm:$0xf]  ;;  %v3844_v25 = vld [vmem:[#allocation5 + $0x8] sm:$0xf0]  ;;  %v3843_v28 = vor.u32 %v4259_v20, %v3842_v19 }
  0x21   :  { %625 = vmatpush.bf16.msra.mxu2 %v3871_v58  ;;  %v4274_v26 = vld [vmem:[#allocation5 + $0x84] sm:$0xf]  ;;  %v3908_v27 = vld [vmem:[#allocation5 + $0x88] sm:$0xf0]  ;;  %v3714_v29 = vld [vmem:[#allocation8] sm:$0xf]  ;;  %v3907_v31 = vor.u32 %v4275_v23, %v3906_v21  ;;  %v3847_v32 = vor.u32 %v4258_v24, %v3844_v25 }
  0x22   :  { %714 = vmatpush.bf16.msra.mxu3 %v3935_v62  ;;  %v4291_v30 = vld [vmem:[#allocation8 + $0x4] sm:$0xf0]  ;;  %v4290_v33 = vld [vmem:[#allocation8 + $0x4] sm:$0xf]  ;;  %v3716_v34 = vld [vmem:[#allocation8 + $0x8] sm:$0xf0]  ;;  %v3911_v35 = vor.u32 %v4274_v26, %v3908_v27 }
  0x23   :  { %448 = vmatpush.bf16.msra.mxu0 %v3859_v4  ;;  %v3715_v36 = vor.u32 %v4291_v30, %v3714_v29  ;;  %v3719_v37 = vor.u32 %v4290_v33, %v3716_v34  ;;  %v3722_v38 = vld [vmem:[#allocation8 + $0x10] sm:$0xf]  ;;  %v4293_v39 = vld [vmem:[#allocation8 + $0x14] sm:$0xf0]  ;;  %v4292_v40 = vld [vmem:[#allocation8 + $0x14] sm:$0xf] }
  0x24   :  { %537 = vmatpush.bf16.msra.mxu1 %v3923_v5  ;;  %v3724_v41 = vld [vmem:[#allocation8 + $0x18] sm:$0xf0]  ;;  %v3723_v42 = vor.u32 %v4293_v39, %v3722_v38  ;;  %v3730_v44 = vld [vmem:[#allocation8 + $0x20] sm:$0xf]  ;;  %v4295_v45 = vld [vmem:[#allocation8 + $0x24] sm:$0xf0] }
  0x25   :  { %626 = vmatpush.bf16.msra.mxu2 %v3863_v6  ;;  %v3727_v43 = vor.u32 %v4292_v40, %v3724_v41  ;;  %v4294_v46 = vld [vmem:[#allocation8 + $0x24] sm:$0xf]  ;;  %v3732_v47 = vld [vmem:[#allocation8 + $0x28] sm:$0xf0]  ;;  %v3731_v48 = vor.u32 %v4295_v45, %v3730_v44  ;;  %v3738_v50 = vld [vmem:[#allocation8 + $0x30] sm:$0xf] }
  0x26   :  { %715 = vmatpush.bf16.msra.mxu3 %v3927_v10  ;;  %v3735_v49 = vor.u32 %v4294_v46, %v3732_v47  ;;  %v4297_v51 = vld [vmem:[#allocation8 + $0x34] sm:$0xf0]  ;;  %v4296_v52 = vld [vmem:[#allocation8 + $0x34] sm:$0xf]  ;;  %v3740_v53 = vld [vmem:[#allocation8 + $0x38] sm:$0xf0] }
  0x27   :  { %449 = vmatpush.bf16.msra.mxu0 %v3851_v16  ;;  %v3739_v54 = vor.u32 %v4297_v51, %v3738_v50  ;;  %v3743_v55 = vor.u32 %v4296_v52, %v3740_v53  ;;  %v3746_v56 = vld [vmem:[#allocation8 + $0x40] sm:$0xf]  ;;  %v4299_v57 = vld [vmem:[#allocation8 + $0x44] sm:$0xf0]  ;;  %v4298_v58 = vld [vmem:[#allocation8 + $0x44] sm:$0xf]  ;;  %v991_v16 = vlaneseq }
  0x28   :  { %538 = vmatpush.bf16.msra.mxu1 %v3915_v17  ;;  %v3748_v59 = vld [vmem:[#allocation8 + $0x48] sm:$0xf0]  ;;  %v3747_v60 = vor.u32 %v4299_v57, %v3746_v56  ;;  %v3754_v62 = vld [vmem:[#allocation8 + $0x50] sm:$0xf]  ;;  %v4301_v63 = vld [vmem:[#allocation8 + $0x54] sm:$0xf0] }
  0x29   :  { %627 = vmatpush.bf16.msra.mxu2 %v3855_v18  ;;  %v3751_v61 = vor.u32 %v4298_v58, %v3748_v59  ;;  %v4300_v0 = vld [vmem:[#allocation8 + $0x54] sm:$0xf]  ;;  %v3756_v1 = vld [vmem:[#allocation8 + $0x58] sm:$0xf0]  ;;  %v3755_v2 = vor.u32 %v4301_v63, %v3754_v62  ;;  %v3762_v4 = vld [vmem:[#allocation8 + $0x60] sm:$0xf] }
  0x2a   :  { %716 = vmatpush.bf16.msra.mxu3 %v3919_v22  ;;  %v3759_v3 = vor.u32 %v4300_v0, %v3756_v1  ;;  %v4303_v5 = vld [vmem:[#allocation8 + $0x64] sm:$0xf0]  ;;  %v4302_v6 = vld [vmem:[#allocation8 + $0x64] sm:$0xf]  ;;  %v3764_v7 = vld [vmem:[#allocation8 + $0x68] sm:$0xf0] }
  0x2b   :  { %450 = vmatpush.bf16.msra.mxu0 %v3843_v28  ;;  %v3763_v8 = vor.u32 %v4303_v5, %v3762_v4  ;;  %v3767_v9 = vor.u32 %v4302_v6, %v3764_v7  ;;  %v3770_v10 = vld [vmem:[#allocation8 + $0x70] sm:$0xf]  ;;  %v4305_v11 = vld [vmem:[#allocation8 + $0x74] sm:$0xf0]  ;;  %v4304_v12 = vld [vmem:[#allocation8 + $0x74] sm:$0xf] }
  0x2c   :  { %539 = vmatpush.bf16.msra.mxu1 %v3907_v31  ;;  %v3772_v13 = vld [vmem:[#allocation8 + $0x78] sm:$0xf0]  ;;  %v3771_v14 = vor.u32 %v4305_v11, %v3770_v10  ;;  %v59_v17 = vld [vmem:[#allocation5] sm:$0xff]  ;;  %v4567_v18 = vshrl.u32 %v991_v16, 7  ;;  %v4569_v19 = vand.u32 127, %v991_v16  ;;  %v5239_v33 = vmov 0.0  }
  0x2d   :  { %628 = vmatpush.bf16.msra.mxu2 %v3847_v32  ;;  %v3775_v15 = vor.u32 %v4304_v12, %v3772_v13  ;;  %v3778_v20 = vld [vmem:[#allocation8 + $0x80] sm:$0xf]  ;;  %v4307_v21 = vld [vmem:[#allocation8 + $0x84] sm:$0xf0]  ;;  %v4306_v22 = vld [vmem:[#allocation8 + $0x84] sm:$0xf]  ;;  %v1219_v24 = vunpack.c.l.bf16 %v59_v17 }
  0x2e   :  { %717 = vmatpush.bf16.msra.mxu3 %v3911_v35  ;;  %451 = vmatmul.bf16.vlgmr.msra.gmra.mxu0 %v3715_v36  ;;  %v3780_v23 = vld [vmem:[#allocation8 + $0x88] sm:$0xf0]  ;;  %v91_v25 = vld [vmem:[#allocation8] sm:$0xff]  ;;  %v3779_v26 = vor.u32 %v4307_v21, %v3778_v20  ;;  %vm1027_vm0 = vcmp.eq.s32.totalorder %v4567_v18, %v4569_v19  ;;  %v4583_v56 = vld [vmem:[#allocation5 + $0x10] sm:$0xff]  ;;  %v994_v59 = vadd.s32 16, %v4567_v18  ;;  %s53_s27 = sshll.u32 %s5213_s2, 4  ;;  %s54_s27 = int_to_ptr.hbm [resolvable:$true] %s53_s27 }
  0x2f   :  { %540 = vmatmul.bf16.vlgmr.msra.gmra.mxu1 %v3719_v37  ;;  %v3783_v28 = vor.u32 %v4306_v22, %v3780_v23  ;;  %v799_v31 = vunpack.c.l.bf16 %v91_v25  ;;  %v1283_v32 = vmul.f32 0.0016666667, %v1219_v24  ;;  %v3968_v34 = vsel %vm1027_vm0, 1.0, %v5239_v33  ;;  %v4574_v35 = vld [vmem:[#allocation5 + $0x8] sm:$0xff]  ;;  %v3786_v57 = vld [vmem:[#allocation8 + $0x90] sm:$0xf] }
  0x30   :  { %629 = vmatmul.bf16.vlgmr.msra.gmra.mxu2 %v3715_v36  ;;  %v1221_v40 = vunpack.c.l.bf16 %v4574_v35  ;;  %v800_v47 = vunpack.c.h.bf16 %v91_v25  ;;  %v4308_v63 = vld [vmem:[#allocation8 + $0x94] sm:$0xf]  ;;  %v3788_v0 = vld [vmem:[#allocation8 + $0x98] sm:$0xf0]  ;;  %vm1031_vm2 = vcmp.eq.s32.totalorder %v994_v59, %v4569_v19  ;;  %v4310_v59 = vld [vmem:[#allocation8 + $0xa4] sm:$0xf] }
  0x31   :  { %718 = vmatmul.bf16.vlgmr.msra.gmra.mxu3 %v3719_v37  ;;  %v993_v37 = vadd.s32 8, %v4567_v18  ;;  %v1347_v39 = vadd.f32 %v3968_v34, %v1283_v32  ;;  %v93_v6 = vld [vmem:[#allocation8 + $0x10] sm:$0xff]  ;;  %v3791_v11 = vor.u32 %v4308_v63, %v3788_v0  ;;  %v3970_v24 = vsel %vm1031_vm2, 1.0, %v5239_v33  ;;  %v4596_v25 = vld [vmem:[#allocation5 + $0x18] sm:$0xff]  ;;  %s4531_s28 = smov [#allocation2]  }
  0x32   :  { %v1285_v53 = vmul.f32 0.0016666667, %v1221_v40  ;;  %v803_v21 = vunpack.c.l.bf16 %v93_v6  ;;  %v94_v32 = vld [vmem:[#allocation8 + $0x18] sm:$0xff]  ;;  %v1225_v34 = vunpack.c.l.bf16 %v4596_v25  ;;  %v804_v40 = vunpack.c.h.bf16 %v93_v6  ;;  %s55_s29 = sshll.u32 %s4531_s28, 4  ;;  %s56_s29 = int_to_ptr.vmem [resolvable:$true] %s55_s29 }
  0x33   :  { %vm1029_vm1 = vcmp.eq.s32.totalorder %v993_v37, %v4569_v19  ;;  %58 = dma.hbm_to_vmem [thread:$0]  %s54_s27, 4096, %s56_s29, [#allocation4] }
  0x3e   :  { %456 = vmatmul.bf16.gmra.mxu0 %v3723_v42 }
  0x3f   :  { %545 = vmatmul.bf16.gmra.mxu1 %v3727_v43 }
  0x40   :  { %634 = vmatmul.bf16.gmra.mxu2 %v3723_v42  ;;  %v92_v42 = vld [vmem:[#allocation8 + $0x8] sm:$0xff] }
  0x41   :  { %723 = vmatmul.bf16.gmra.mxu3 %v3727_v43  ;;  %v801_v52 = vunpack.c.l.bf16 %v92_v42 }
  0x4e   :  { %461 = vmatmul.bf16.gmra.mxu0 %v3731_v48 }
  0x4f   :  { %550 = vmatmul.bf16.gmra.mxu1 %v3735_v49 }
  0x50   :  { %639 = vmatmul.bf16.gmra.mxu2 %v3731_v48  ;;  %v1220_v48 = vunpack.c.h.bf16 %v59_v17 }
  0x51   :  { %728 = vmatmul.bf16.gmra.mxu3 %v3735_v49 }
  0x52   :  { %v1284_v62 = vmul.f32 0.0016666667, %v1220_v48 }
  0x5e   :  { %466 = vmatmul.bf16.gmra.mxu0 %v3739_v54 }
  0x5f   :  { %555 = vmatmul.bf16.gmra.mxu1 %v3743_v55 }
  0x60   :  { %644 = vmatmul.bf16.gmra.mxu2 %v3739_v54 }
  0x61   :  { %733 = vmatmul.bf16.gmra.mxu3 %v3743_v55  ;;  %v3969_v55 = vsel %vm1029_vm1, 1.0, %v5239_v33 }
  0x6e   :  { %471 = vmatmul.bf16.gmra.mxu0 %v3747_v60 }
  0x6f   :  { %560 = vmatmul.bf16.gmra.mxu1 %v3751_v61 }
  0x70   :  { %649 = vmatmul.bf16.gmra.mxu2 %v3747_v60  ;;  %v4309_v60 = vld [vmem:[#allocation8 + $0x94] sm:$0xf0] }
  0x71   :  { %738 = vmatmul.bf16.gmra.mxu3 %v3751_v61  ;;  %v3787_v7 = vor.u32 %v4309_v60, %v3786_v57  ;;  %v4311_v57 = vld [vmem:[#allocation8 + $0xa4] sm:$0xf0]  ;;  %v3796_v60 = vld [vmem:[#allocation8 + $0xa8] sm:$0xf0] }
  0x7e   :  { %476 = vmatmul.bf16.gmra.mxu0 %v3755_v2 }
  0x7f   :  { %565 = vmatmul.bf16.gmra.mxu1 %v3759_v3 }
  0x80   :  { %654 = vmatmul.bf16.gmra.mxu2 %v3755_v2  ;;  %v1349_v2 = vadd.f32 %v3969_v55, %v1285_v53  ;;  %v3794_v53 = vld [vmem:[#allocation8 + $0xa0] sm:$0xf]  ;;  %v996_v55 = vadd.s32 32, %v4567_v18 }
  0x81   :  { %743 = vmatmul.bf16.gmra.mxu3 %v3759_v3  ;;  %v1223_v3 = vunpack.c.l.bf16 %v4583_v56 }
  0x82   :  { %vm1035_vm4 = vcmp.eq.s32.totalorder %v996_v55, %v4569_v19 }
  0x83   :  { %v1287_v22 = vmul.f32 0.0016666667, %v1223_v3 }
  0x8e   :  { %481 = vmatmul.bf16.gmra.mxu0 %v3763_v8 }
  0x8f   :  { %570 = vmatmul.bf16.gmra.mxu1 %v3767_v9 }
  0x90   :  { %659 = vmatmul.bf16.gmra.mxu2 %v3763_v8 }
  0x91   :  { %748 = vmatmul.bf16.gmra.mxu3 %v3767_v9 }
  0x9e   :  { %486 = vmatmul.bf16.gmra.mxu0 %v3771_v14 }
  0x9f   :  { %575 = vmatmul.bf16.gmra.mxu1 %v3775_v15 }
  0xa0   :  { %664 = vmatmul.bf16.gmra.mxu2 %v3771_v14  ;;  %v802_v14 = vunpack.c.h.bf16 %v92_v42 }
  0xa1   :  { %753 = vmatmul.bf16.gmra.mxu3 %v3775_v15  ;;  %v1222_v15 = vunpack.c.h.bf16 %v4574_v35 }
  0xab   :  { %v452_v27 = vpop.f32.mrf.mxu0 }
  0xac   :  { %v541_v29 = vpop.f32.mrf.mxu1 }
  0xad   :  { %v542_v30 = vadd.f32 %v541_v29, %v452_v27  ;;  %v1286_v29 = vmul.f32 0.0016666667, %v1222_v15 }
  0xae   :  { %491 = vmatmul.bf16.gmra.mxu0 %v3779_v26 }
  0xaf   :  { %v863_v36 = vmul.f32 0.005, %v542_v30  ;;  %580 = vmatmul.bf16.gmra.mxu1 %v3783_v28 }
  0xb0   :  { %669 = vmatmul.bf16.gmra.mxu2 %v3779_v26  ;;  %v995_v26 = vadd.s32 24, %v4567_v18 }
  0xb1   :  { %758 = vmatmul.bf16.gmra.mxu3 %v3783_v28  ;;  %v4577_v38 = vadd.f32 %v863_v36, %v799_v31  ;;  %v1351_v31 = vadd.f32 %v3970_v24, %v1287_v22  ;;  %v3972_v22 = vsel %vm1035_vm4, 1.0, %v5239_v33  ;;  %v997_v24 = vadd.s32 40, %v4567_v18 }
  0xb2   :  { %vm1033_vm3 = vcmp.eq.s32.totalorder %v995_v26, %v4569_v19 }
  0xb3   :  { %5268 = vst [vmem:[#allocation22_spill] sm:$0xff] %v4577_v38  ;;  %v630_v41 = vpop.f32.mrf.mxu2  ;;  %v1411_v43 = vmul.f32 0.0033333334, %v4577_v38  ;;  %v454_v45 = vpop.f32.mrf.mxu0  ;;  %vm1037_vm5 = vcmp.eq.s32.totalorder %v997_v24, %v4569_v19 }
  0xb4   :  { %v719_v44 = vpop.f32.mrf.mxu3  ;;  %v543_v49 = vpop.f32.mrf.mxu1 }
  0xb5   :  { %v720_v46 = vadd.f32 %v719_v44, %v630_v41  ;;  %v1475_v50 = vadd.f32 %v1411_v43, %v1347_v39  ;;  %v544_v51 = vadd.f32 %v543_v49, %v454_v45  ;;  %v1224_v44 = vunpack.c.h.bf16 %v4583_v56 }
  0xb6   :  { %v3971_v49 = vsel %vm1033_vm3, 1.0, %v5239_v33 }
  0xb7   :  { %v864_v54 = vmul.f32 0.005, %v720_v46  ;;  %1539 = vst [vmem:[#allocation10] sm:$0xff] %v1475_v50  ;;  %v865_v58 = vmul.f32 0.005, %v544_v51  ;;  %v805_v46 = vunpack.c.l.bf16 %v94_v32 }
  0xb8   :  { %v1289_v50 = vmul.f32 0.0016666667, %v1225_v34  ;;  %v1288_v56 = vmul.f32 0.0016666667, %v1224_v44 }
  0xb9   :  { %v4586_v61 = vadd.f32 %v864_v54, %v800_v47  ;;  %v4588_v1 = vadd.f32 %v865_v58, %v801_v52  ;;  %v4609_v52 = vld [vmem:[#allocation5 + $0x20] sm:$0xff] }
  0xba   :  { %v1353_v63 = vadd.f32 %v3971_v49, %v1289_v50  ;;  %v1227_v0 = vunpack.c.l.bf16 %v4609_v52  ;;  %v1228_v44 = vunpack.c.h.bf16 %v4609_v52  ;;  %v3973_v49 = vsel %vm1037_vm5, 1.0, %v5239_v33 }
  0xbb   :  { %5269 = vst [vmem:[#allocation23_spill] sm:$0xff] %v4586_v61  ;;  %v1412_v4 = vmul.f32 0.0033333334, %v4586_v61  ;;  %v632_v5 = vpop.f32.mrf.mxu2  ;;  %v1413_v8 = vmul.f32 0.0033333334, %v4588_v1  ;;  %v457_v10 = vpop.f32.mrf.mxu0 }
  0xbc   :  { %5270 = vst [vmem:[#allocation24_spill] sm:$0xff] %v4588_v1  ;;  %v721_v9 = vpop.f32.mrf.mxu3  ;;  %v546_v16 = vpop.f32.mrf.mxu1  ;;  %v1292_v52 = vmul.f32 0.0016666667, %v1228_v44 }
  0xbd   :  { %v1476_v12 = vadd.f32 %v1412_v4, %v1284_v62  ;;  %v722_v13 = vadd.f32 %v721_v9, %v632_v5  ;;  %v1477_v17 = vadd.f32 %v1413_v8, %v1349_v2  ;;  %v547_v20 = vadd.f32 %v546_v16, %v457_v10  ;;  %v95_v4 = vld [vmem:[#allocation8 + $0x20] sm:$0xff] }
  0xbe   :  { %496 = vmatmul.bf16.gmra.mxu0 %v3787_v7  ;;  %v3795_v5 = vor.u32 %v4311_v57, %v3794_v53  ;;  %v3799_v9 = vor.u32 %v4310_v59, %v3796_v60  ;;  %v4635_v53 = vld [vmem:[#allocation5 + $0x30] sm:$0xff]  ;;  %v998_v57 = vadd.s32 48, %v4567_v18 }
  0xbf   :  { %1540 = vst [vmem:[#allocation10 + $0x8] sm:$0xff] %v1476_v12  ;;  %v866_v23 = vmul.f32 0.005, %v722_v13  ;;  %v867_v27 = vmul.f32 0.005, %v547_v20  ;;  %585 = vmatmul.bf16.gmra.mxu1 %v3791_v11  ;;  %v806_v12 = vunpack.c.h.bf16 %v94_v32  ;;  %v1226_v13 = vunpack.c.h.bf16 %v4596_v25  ;;  %v96_v32 = vld [vmem:[#allocation8 + $0x28] sm:$0xff] }
  0xc0   :  { %1541 = vst [vmem:[#allocation10 + $0x10] sm:$0xff] %v1477_v17  ;;  %674 = vmatmul.bf16.gmra.mxu2 %v3787_v7  ;;  %v807_v17 = vunpack.c.l.bf16 %v95_v4  ;;  %v1291_v20 = vmul.f32 0.0016666667, %v1227_v0  ;;  %v4312_v60 = vld [vmem:[#allocation8 + $0xb4] sm:$0xf]  ;;  %vm1039_vm6 = vcmp.eq.s32.totalorder %v998_v57, %v4569_v19 }
  0xc1   :  { %v4599_v28 = vadd.f32 %v866_v23, %v802_v14  ;;  %763 = vmatmul.bf16.gmra.mxu3 %v3791_v11  ;;  %v4601_v30 = vadd.f32 %v867_v27, %v803_v21  ;;  %v4622_v23 = vld [vmem:[#allocation5 + $0x28] sm:$0xff]  ;;  %v1290_v25 = vmul.f32 0.0016666667, %v1226_v13 }
  0xc2   :  { %v1229_v34 = vunpack.c.l.bf16 %v4622_v23 }
  0xc3   :  { %5271 = vst [vmem:[#allocation25_spill] sm:$0xff] %v4599_v28  ;;  %v1414_v35 = vmul.f32 0.0033333334, %v4599_v28  ;;  %v635_v36 = vpop.f32.mrf.mxu2  ;;  %v1415_v37 = vmul.f32 0.0033333334, %v4601_v30  ;;  %v459_v41 = vpop.f32.mrf.mxu0 }
  0xc4   :  { %5272 = vst [vmem:[#allocation26_spill] sm:$0xff] %v4601_v30  ;;  %v724_v39 = vpop.f32.mrf.mxu3  ;;  %v548_v45 = vpop.f32.mrf.mxu1  ;;  %v1293_v50 = vmul.f32 0.0016666667, %v1229_v34 }
  0xc5   :  { %v1478_v42 = vadd.f32 %v1414_v35, %v1286_v29  ;;  %v725_v43 = vadd.f32 %v724_v39, %v635_v36  ;;  %v1479_v47 = vadd.f32 %v1415_v37, %v1351_v31  ;;  %v549_v48 = vadd.f32 %v548_v45, %v459_v41 }
  0xc6   :  { %v1355_v31 = vadd.f32 %v3972_v22, %v1291_v20 }
  0xc7   :  { %1542 = vst [vmem:[#allocation10 + $0x18] sm:$0xff] %v1478_v42  ;;  %v868_v51 = vmul.f32 0.005, %v725_v43  ;;  %v869_v54 = vmul.f32 0.005, %v549_v48 }
  0xc8   :  { %1543 = vst [vmem:[#allocation10 + $0x20] sm:$0xff] %v1479_v47 }
  0xc9   :  { %v4612_v58 = vadd.f32 %v868_v51, %v804_v40  ;;  %v4614_v62 = vadd.f32 %v869_v54, %v805_v46  ;;  %v808_v40 = vunpack.c.h.bf16 %v95_v4  ;;  %v809_v46 = vunpack.c.l.bf16 %v96_v32  ;;  %v3802_v54 = vld [vmem:[#allocation8 + $0xb0] sm:$0xf] }
  0xcb   :  { %5273 = vst [vmem:[#allocation27_spill] sm:$0xff] %v4612_v58  ;;  %v1416_v2 = vmul.f32 0.0033333334, %v4612_v58  ;;  %v637_v3 = vpop.f32.mrf.mxu2  ;;  %v1417_v6 = vmul.f32 0.0033333334, %v4614_v62  ;;  %v462_v8 = vpop.f32.mrf.mxu0 }
  0xcc   :  { %5274 = vst [vmem:[#allocation28_spill] sm:$0xff] %v4614_v62  ;;  %v726_v7 = vpop.f32.mrf.mxu3  ;;  %v551_v14 = vpop.f32.mrf.mxu1 }
  0xcd   :  { %v1480_v10 = vadd.f32 %v1416_v2, %v1288_v56  ;;  %v727_v11 = vadd.f32 %v726_v7, %v637_v3  ;;  %v1481_v15 = vadd.f32 %v1417_v6, %v1353_v63  ;;  %v552_v16 = vadd.f32 %v551_v14, %v462_v8  ;;  %v4313_v56 = vld [vmem:[#allocation8 + $0xb4] sm:$0xf0]  ;;  %v3804_v63 = vld [vmem:[#allocation8 + $0xb8] sm:$0xf0]  ;;  %v97_v6 = vld [vmem:[#allocation8 + $0x30] sm:$0xff] }
  0xce   :  { %501 = vmatmul.bf16.gmra.mxu0 %v3795_v5  ;;  %v1357_v2 = vadd.f32 %v3973_v49, %v1293_v50  ;;  %v1231_v3 = vunpack.c.l.bf16 %v4635_v53  ;;  %v3803_v7 = vor.u32 %v4313_v56, %v3802_v54  ;;  %v810_v14 = vunpack.c.h.bf16 %v96_v32 }
  0xcf   :  { %1544 = vst [vmem:[#allocation10 + $0x28] sm:$0xff] %v1480_v10  ;;  %v870_v21 = vmul.f32 0.005, %v727_v11  ;;  %v871_v26 = vmul.f32 0.005, %v552_v16  ;;  %590 = vmatmul.bf16.gmra.mxu1 %v3799_v9  ;;  %v3807_v11 = vor.u32 %v4312_v60, %v3804_v63  ;;  %v812_v44 = vunpack.c.h.bf16 %v97_v6 }
  0xd0   :  { %1545 = vst [vmem:[#allocation10 + $0x30] sm:$0xff] %v1481_v15  ;;  %679 = vmatmul.bf16.gmra.mxu2 %v3795_v5  ;;  %v1230_v15 = vunpack.c.h.bf16 %v4622_v23  ;;  %v1295_v22 = vmul.f32 0.0016666667, %v1231_v3  ;;  %v3810_v60 = vld [vmem:[#allocation8 + $0xc0] sm:$0xf] }
  0xd1   :  { %v4625_v27 = vadd.f32 %v870_v21, %v806_v12  ;;  %768 = vmatmul.bf16.gmra.mxu3 %v3799_v9  ;;  %v4627_v29 = vadd.f32 %v871_v26, %v807_v17  ;;  %v811_v21 = vunpack.c.l.bf16 %v97_v6  ;;  %v3974_v26 = vsel %vm1039_vm6, 1.0, %v5239_v33  ;;  %v4315_v3 = vld [vmem:[#allocation8 + $0xc4] sm:$0xf0]  ;;  %v3812_v6 = vld [vmem:[#allocation8 + $0xc8] sm:$0xf0] }
  0xd2   :  { %v1294_v23 = vmul.f32 0.0016666667, %v1230_v15 }
  0xd3   :  { %5275 = vst [vmem:[#allocation29_spill] sm:$0xff] %v4625_v27  ;;  %v1418_v35 = vmul.f32 0.0033333334, %v4625_v27  ;;  %v640_v36 = vpop.f32.mrf.mxu2  ;;  %v1419_v37 = vmul.f32 0.0033333334, %v4627_v29  ;;  %v464_v41 = vpop.f32.mrf.mxu0 }
  0xd4   :  { %5276 = vst [vmem:[#allocation30_spill] sm:$0xff] %v4627_v29  ;;  %v729_v39 = vpop.f32.mrf.mxu3  ;;  %v553_v45 = vpop.f32.mrf.mxu1  ;;  %v1023_v29 = vadd.s32 248, %v4567_v18 }
  0xd5   :  { %v1482_v42 = vadd.f32 %v1418_v35, %v1290_v25  ;;  %v730_v43 = vadd.f32 %v729_v39, %v640_v36  ;;  %v1483_v47 = vadd.f32 %v1419_v37, %v1355_v31  ;;  %v554_v48 = vadd.f32 %v553_v45, %v464_v41  ;;  %v4648_v25 = vld [vmem:[#allocation5 + $0x38] sm:$0xff] }
  0xd6   :  { %v999_v31 = vadd.s32 56, %v4567_v18  ;;  %v1359_v36 = vadd.f32 %v3974_v26, %v1295_v22  ;;  %v98_v37 = vld [vmem:[#allocation8 + $0x38] sm:$0xff]  ;;  %v1233_v39 = vunpack.c.l.bf16 %v4648_v25 }
  0xd7   :  { %1546 = vst [vmem:[#allocation10 + $0x38] sm:$0xff] %v1482_v42  ;;  %v872_v51 = vmul.f32 0.005, %v730_v43  ;;  %v873_v55 = vmul.f32 0.005, %v554_v48  ;;  %v1232_v48 = vunpack.c.h.bf16 %v4635_v53  ;;  %v813_v50 = vunpack.c.l.bf16 %v98_v37 }
  0xd8   :  { %1547 = vst [vmem:[#allocation10 + $0x40] sm:$0xff] %v1483_v47  ;;  %vm1041_vm7 = vcmp.eq.s32.totalorder %v999_v31, %v4569_v19  ;;  %v1297_v57 = vmul.f32 0.0016666667, %v1233_v39  ;;  %v814_v22 = vunpack.c.h.bf16 %v98_v37 }
  0xd9   :  { %v4638_v59 = vadd.f32 %v872_v51, %v808_v40  ;;  %v4640_v0 = vadd.f32 %v873_v55, %v809_v46  ;;  %v3975_v55 = vsel %vm1041_vm7, 1.0, %v5239_v33  ;;  %v1296_v53 = vmul.f32 0.0016666667, %v1232_v48 }
  0xdb   :  { %5277 = vst [vmem:[#allocation31_spill] sm:$0xff] %v4638_v59  ;;  %v1420_v4 = vmul.f32 0.0033333334, %v4638_v59  ;;  %v642_v5 = vpop.f32.mrf.mxu2  ;;  %v1421_v8 = vmul.f32 0.0033333334, %v4640_v0  ;;  %v467_v10 = vpop.f32.mrf.mxu0 }
  0xdc   :  { %5278 = vst [vmem:[#allocation32_spill] sm:$0xff] %v4640_v0  ;;  %v731_v9 = vpop.f32.mrf.mxu3  ;;  %v556_v16 = vpop.f32.mrf.mxu1 }
  0xdd   :  { %v1484_v12 = vadd.f32 %v1420_v4, %v1292_v52  ;;  %v732_v13 = vadd.f32 %v731_v9, %v642_v5  ;;  %v1485_v17 = vadd.f32 %v1421_v8, %v1357_v2  ;;  %v557_v20 = vadd.f32 %v556_v16, %v467_v10  ;;  %v4661_v52 = vld [vmem:[#allocation5 + $0x40] sm:$0xff] }
  0xde   :  { %506 = vmatmul.bf16.gmra.mxu0 %v3803_v7  ;;  %v1000_v2 = vadd.s32 64, %v4567_v18  ;;  %v4314_v5 = vld [vmem:[#allocation8 + $0xc4] sm:$0xf]  ;;  %v1361_v8 = vadd.f32 %v3975_v55, %v1297_v57  ;;  %v1235_v9 = vunpack.c.l.bf16 %v4661_v52 }
  0xdf   :  { %1548 = vst [vmem:[#allocation10 + $0x48] sm:$0xff] %v1484_v12  ;;  %v874_v24 = vmul.f32 0.005, %v732_v13  ;;  %v875_v34 = vmul.f32 0.005, %v557_v20  ;;  %595 = vmatmul.bf16.gmra.mxu1 %v3807_v11  ;;  %v99_v12 = vld [vmem:[#allocation8 + $0x40] sm:$0xff]  ;;  %v3811_v13 = vor.u32 %v4315_v3, %v3810_v60  ;;  %v1236_v60 = vunpack.c.h.bf16 %v4661_v52 }
  0xe0   :  { %1549 = vst [vmem:[#allocation10 + $0x50] sm:$0xff] %v1485_v17  ;;  %684 = vmatmul.bf16.gmra.mxu2 %v3803_v7  ;;  %vm1043_vm8 = vcmp.eq.s32.totalorder %v1000_v2, %v4569_v19  ;;  %v3815_v17 = vor.u32 %v4314_v5, %v3812_v6 }
  0xe1   :  { %v4651_v32 = vadd.f32 %v874_v24, %v810_v14  ;;  %773 = vmatmul.bf16.gmra.mxu3 %v3807_v11  ;;  %v4653_v35 = vadd.f32 %v875_v34, %v811_v21  ;;  %v1234_v24 = vunpack.c.h.bf16 %v4648_v25  ;;  %v1300_v52 = vmul.f32 0.0016666667, %v1236_v60 }
  0xe3   :  { %5279 = vst [vmem:[#allocation33_spill] sm:$0xff] %v4651_v32  ;;  %v1422_v40 = vmul.f32 0.0033333334, %v4651_v32  ;;  %v645_v41 = vpop.f32.mrf.mxu2  ;;  %v1423_v42 = vmul.f32 0.0033333334, %v4653_v35  ;;  %v469_v45 = vpop.f32.mrf.mxu0 }
  0xe4   :  { %v734_v43 = vpop.f32.mrf.mxu3  ;;  %v558_v49 = vpop.f32.mrf.mxu1  ;;  %v1298_v25 = vmul.f32 0.0016666667, %v1234_v24 }
  0xe5   :  { %v1486_v46 = vadd.f32 %v1422_v40, %v1294_v23  ;;  %v735_v47 = vadd.f32 %v734_v43, %v645_v41  ;;  %v1487_v51 = vadd.f32 %v1423_v42, %v1359_v36  ;;  %v559_v54 = vadd.f32 %v558_v49, %v469_v45  ;;  %v4674_v41 = vld [vmem:[#allocation5 + $0x48] sm:$0xff] }
  0xe6   :  { %v815_v23 = vunpack.c.l.bf16 %v99_v12  ;;  %v1299_v36 = vmul.f32 0.0016666667, %v1235_v9  ;;  %v3976_v40 = vsel %vm1043_vm8, 1.0, %v5239_v33  ;;  %v1001_v42 = vadd.s32 72, %v4567_v18  ;;  %v4687_v9 = vld [vmem:[#allocation5 + $0x50] sm:$0xff] }
  0xe7   :  { %1550 = vst [vmem:[#allocation10 + $0x58] sm:$0xff] %v1486_v46  ;;  %v876_v56 = vmul.f32 0.005, %v735_v47  ;;  %v877_v63 = vmul.f32 0.005, %v559_v54  ;;  %v100_v46 = vld [vmem:[#allocation8 + $0x48] sm:$0xff]  ;;  %v1237_v47 = vunpack.c.l.bf16 %v4674_v41  ;;  %v816_v54 = vunpack.c.h.bf16 %v99_v12 }
  0xe8   :  { %1551 = vst [vmem:[#allocation10 + $0x60] sm:$0xff] %v1487_v51  ;;  %v1363_v45 = vadd.f32 %v3976_v40, %v1299_v36  ;;  %vm1045_vm9 = vcmp.eq.s32.totalorder %v1001_v42, %v4569_v19  ;;  %v817_v2 = vunpack.c.l.bf16 %v100_v46  ;;  %v1002_v12 = vadd.s32 80, %v4567_v18 }
  0xe9   :  { %v4664_v4 = vadd.f32 %v876_v56, %v812_v44  ;;  %v4666_v7 = vadd.f32 %v877_v63, %v813_v50  ;;  %v3977_v5 = vsel %vm1045_vm9, 1.0, %v5239_v33  ;;  %v1301_v6 = vmul.f32 0.0016666667, %v1237_v47 }
  0xea   :  { %vm1047_vm10 = vcmp.eq.s32.totalorder %v1002_v12, %v4569_v19 }
  0xeb   :  { %v1424_v10 = vmul.f32 0.0033333334, %v4664_v4  ;;  %v647_v11 = vpop.f32.mrf.mxu2  ;;  %v1425_v14 = vmul.f32 0.0033333334, %v4666_v7  ;;  %v472_v16 = vpop.f32.mrf.mxu0 }
  0xec   :  { %v736_v15 = vpop.f32.mrf.mxu3  ;;  %v561_v26 = vpop.f32.mrf.mxu1 }
  0xed   :  { %v1488_v20 = vadd.f32 %v1424_v10, %v1296_v53  ;;  %v737_v21 = vadd.f32 %v736_v15, %v647_v11  ;;  %v1489_v31 = vadd.f32 %v1425_v14, %v1361_v8  ;;  %v562_v34 = vadd.f32 %v561_v26, %v472_v16  ;;  %v3818_v10 = vld [vmem:[#allocation8 + $0xd0] sm:$0xf]  ;;  %v4316_v15 = vld [vmem:[#allocation8 + $0xd4] sm:$0xf]  ;;  %v3820_v16 = vld [vmem:[#allocation8 + $0xd8] sm:$0xf0] }
  0xee   :  { %511 = vmatmul.bf16.gmra.mxu0 %v3811_v13  ;;  %v101_v26 = vld [vmem:[#allocation8 + $0x50] sm:$0xff] }
  0xef   :  { %1552 = vst [vmem:[#allocation10 + $0x68] sm:$0xff] %v1488_v20  ;;  %v878_v39 = vmul.f32 0.005, %v737_v21  ;;  %v879_v43 = vmul.f32 0.005, %v562_v34  ;;  %600 = vmatmul.bf16.gmra.mxu1 %v3815_v17  ;;  %v1365_v20 = vadd.f32 %v3977_v5, %v1301_v6  ;;  %v1239_v21 = vunpack.c.l.bf16 %v4687_v9 }
  0xf0   :  { %1553 = vst [vmem:[#allocation10 + $0x70] sm:$0xff] %v1489_v31  ;;  %689 = vmatmul.bf16.gmra.mxu2 %v3811_v13  ;;  %v4317_v13 = vld [vmem:[#allocation8 + $0xd4] sm:$0xf0] }
  0xf1   :  { %v4677_v37 = vadd.f32 %v878_v39, %v814_v22  ;;  %778 = vmatmul.bf16.gmra.mxu3 %v3815_v17  ;;  %v4679_v44 = vadd.f32 %v879_v43, %v815_v23  ;;  %v3819_v31 = vor.u32 %v4317_v13, %v3818_v10  ;;  %v3823_v39 = vor.u32 %v4316_v15, %v3820_v16 }
  0xf2   :  { %v818_v43 = vunpack.c.h.bf16 %v100_v46  ;;  %v820_v10 = vunpack.c.h.bf16 %v101_v26 }
  0xf3   :  { %5280 = vst [vmem:[#allocation34_spill] sm:$0xff] %v4677_v37  ;;  %v1426_v48 = vmul.f32 0.0033333334, %v4677_v37  ;;  %v650_v49 = vpop.f32.mrf.mxu2  ;;  %v1427_v50 = vmul.f32 0.0033333334, %v4679_v44  ;;  %v474_v55 = vpop.f32.mrf.mxu0 }
  0xf4   :  { %v739_v51 = vpop.f32.mrf.mxu3  ;;  %v563_v63 = vpop.f32.mrf.mxu1 }
  0xf5   :  { %v1490_v57 = vadd.f32 %v1426_v48, %v1298_v25  ;;  %v740_v56 = vadd.f32 %v739_v51, %v650_v49  ;;  %v1491_v3 = vadd.f32 %v1427_v50, %v1363_v45  ;;  %v564_v53 = vadd.f32 %v563_v63, %v474_v55  ;;  %v4700_v55 = vld [vmem:[#allocation5 + $0x58] sm:$0xff] }
  0xf6   :  { %v1238_v25 = vunpack.c.h.bf16 %v4674_v41  ;;  %v819_v49 = vunpack.c.l.bf16 %v101_v26  ;;  %v1303_v50 = vmul.f32 0.0016666667, %v1239_v21  ;;  %v1004_v26 = vadd.s32 96, %v4567_v18 }
  0xf7   :  { %1554 = vst [vmem:[#allocation10 + $0x78] sm:$0xff] %v1490_v57  ;;  %v880_v8 = vmul.f32 0.005, %v740_v56  ;;  %v881_v11 = vmul.f32 0.005, %v564_v53  ;;  %v1003_v57 = vadd.s32 88, %v4567_v18 }
  0xf8   :  { %1555 = vst [vmem:[#allocation10 + $0x80] sm:$0xff] %v1491_v3  ;;  %v1302_v41 = vmul.f32 0.0016666667, %v1238_v25  ;;  %v1241_v3 = vunpack.c.l.bf16 %v4700_v55  ;;  %vm1051_vm12 = vcmp.eq.s32.totalorder %v1004_v26, %v4569_v19 }
  0xf9   :  { %v4690_v14 = vadd.f32 %v880_v8, %v816_v54  ;;  %v4692_v17 = vadd.f32 %v881_v11, %v817_v2  ;;  %v3978_v54 = vsel %vm1047_vm10, 1.0, %v5239_v33  ;;  %v102_v2 = vld [vmem:[#allocation8 + $0x58] sm:$0xff]  ;;  %vm1049_vm11 = vcmp.eq.s32.totalorder %v1003_v57, %v4569_v19 }
  0xfa   :  { %v1367_v63 = vadd.f32 %v3978_v54, %v1303_v50  ;;  %v821_v16 = vunpack.c.l.bf16 %v102_v2  ;;  %v103_v50 = vld [vmem:[#allocation8 + $0x60] sm:$0xff] }
  0xfb   :  { %v1428_v22 = vmul.f32 0.0033333334, %v4690_v14  ;;  %v652_v24 = vpop.f32.mrf.mxu2  ;;  %v1429_v34 = vmul.f32 0.0033333334, %v4692_v17  ;;  %v477_v36 = vpop.f32.mrf.mxu0 }
  0xfc   :  { %v741_v23 = vpop.f32.mrf.mxu3  ;;  %v566_v45 = vpop.f32.mrf.mxu1 }
  0xfd   :  { %v1492_v40 = vadd.f32 %v1428_v22, %v1300_v52  ;;  %v742_v42 = vadd.f32 %v741_v23, %v652_v24  ;;  %v1493_v47 = vadd.f32 %v1429_v34, %v1365_v20  ;;  %v567_v48 = vadd.f32 %v566_v45, %v477_v36  ;;  %v4713_v34 = vld [vmem:[#allocation5 + $0x60] sm:$0xff] }
  0xfe   :  { %516 = vmatmul.bf16.gmra.mxu0 %v3819_v31  ;;  %v1240_v52 = vunpack.c.h.bf16 %v4687_v9  ;;  %v3979_v22 = vsel %vm1049_vm11, 1.0, %v5239_v33  ;;  %v1305_v24 = vmul.f32 0.0016666667, %v1241_v3  ;;  %v3826_v23 = vld [vmem:[#allocation8 + $0xe0] sm:$0xf] }
  0xff   :  { %1556 = vst [vmem:[#allocation10 + $0x88] sm:$0xff] %v1492_v40  ;;  %v882_v51 = vmul.f32 0.005, %v742_v42  ;;  %v883_v56 = vmul.f32 0.005, %v567_v48  ;;  %605 = vmatmul.bf16.gmra.mxu1 %v3823_v39 }
 0x100   :  { %1557 = vst [vmem:[#allocation10 + $0x90] sm:$0xff] %v1493_v47  ;;  %694 = vmatmul.bf16.gmra.mxu2 %v3819_v31  ;;  %v1304_v9 = vmul.f32 0.0016666667, %v1240_v52  ;;  %v4318_v42 = vld [vmem:[#allocation8 + $0xe4] sm:$0xf]  ;;  %v1369_v45 = vadd.f32 %v3979_v22, %v1305_v24  ;;  %v1243_v47 = vunpack.c.l.bf16 %v4713_v34  ;;  %v3980_v52 = vsel %vm1051_vm12, 1.0, %v5239_v33 }
 0x101   :  { %v4703_v46 = vadd.f32 %v882_v51, %v818_v43  ;;  %783 = vmatmul.bf16.gmra.mxu3 %v3823_v39  ;;  %v4705_v60 = vadd.f32 %v883_v56, %v819_v49  ;;  %v4319_v39 = vld [vmem:[#allocation8 + $0xe4] sm:$0xf0]  ;;  %v3828_v43 = vld [vmem:[#allocation8 + $0xe8] sm:$0xf0] }
 0x102   :  { %v3827_v51 = vor.u32 %v4319_v39, %v3826_v23  ;;  %v104_v24 = vld [vmem:[#allocation8 + $0x68] sm:$0xff] }
 0x103   :  { %v1430_v53 = vmul.f32 0.0033333334, %v4703_v46  ;;  %v655_v5 = vpop.f32.mrf.mxu2  ;;  %v1431_v6 = vmul.f32 0.0033333334, %v4705_v60  ;;  %v479_v11 = vpop.f32.mrf.mxu0 }
 0x104   :  { %v744_v8 = vpop.f32.mrf.mxu3  ;;  %v568_v15 = vpop.f32.mrf.mxu1 }
 0x105   :  { %v1494_v12 = vadd.f32 %v1430_v53, %v1302_v41  ;;  %v745_v13 = vadd.f32 %v744_v8, %v655_v5  ;;  %v1495_v20 = vadd.f32 %v1431_v6, %v1367_v63  ;;  %v569_v21 = vadd.f32 %v568_v15, %v479_v11  ;;  %v4726_v15 = vld [vmem:[#allocation5 + $0x68] sm:$0xff] }
 0x106   :  { %v3831_v41 = vor.u32 %v4318_v42, %v3828_v43  ;;  %v822_v53 = vunpack.c.h.bf16 %v102_v2  ;;  %v1242_v5 = vunpack.c.h.bf16 %v4700_v55  ;;  %v823_v11 = vunpack.c.l.bf16 %v103_v50 }
 0x107   :  { %1558 = vst [vmem:[#allocation10 + $0x98] sm:$0xff] %v1494_v12  ;;  %v884_v31 = vmul.f32 0.005, %v745_v13  ;;  %v885_v36 = vmul.f32 0.005, %v569_v21 }
 0x108   :  { %1559 = vst [vmem:[#allocation10 + $0xa0] sm:$0xff] %v1495_v20  ;;  %v1307_v12 = vmul.f32 0.0016666667, %v1243_v47  ;;  %v1306_v55 = vmul.f32 0.0016666667, %v1242_v5  ;;  %v1244_v47 = vunpack.c.h.bf16 %v4713_v34 }
 0x109   :  { %v4716_v40 = vadd.f32 %v884_v31, %v820_v10  ;;  %v4718_v25 = vadd.f32 %v885_v36, %v821_v16  ;;  %v1005_v16 = vadd.s32 104, %v4567_v18  ;;  %v1245_v31 = vunpack.c.l.bf16 %v4726_v15  ;;  %v4321_v5 = vld [vmem:[#allocation8 + $0xf4] sm:$0xf0] }
 0x10a   :  { %v1371_v22 = vadd.f32 %v3980_v52, %v1307_v12  ;;  %v1308_v34 = vmul.f32 0.0016666667, %v1244_v47 }
 0x10b   :  { %v1432_v48 = vmul.f32 0.0033333334, %v4716_v40  ;;  %v657_v49 = vpop.f32.mrf.mxu2  ;;  %v1433_v54 = vmul.f32 0.0033333334, %v4718_v25  ;;  %v482_v56 = vpop.f32.mrf.mxu0  ;;  %vm1053_vm13 = vcmp.eq.s32.totalorder %v1005_v16, %v4569_v19 }
 0x10c   :  { %v746_v57 = vpop.f32.mrf.mxu3  ;;  %v571_v6 = vpop.f32.mrf.mxu1 }
 0x10d   :  { %v1496_v63 = vadd.f32 %v1432_v48, %v1304_v9  ;;  %v747_v3 = vadd.f32 %v746_v57, %v657_v49  ;;  %v1497_v8 = vadd.f32 %v1433_v54, %v1369_v45  ;;  %v572_v10 = vadd.f32 %v571_v6, %v482_v56 }
 0x10e   :  { %521 = vmatmul.bf16.gmra.mxu0 %v3827_v51  ;;  %v824_v9 = vunpack.c.h.bf16 %v103_v50  ;;  %v825_v49 = vunpack.c.l.bf16 %v104_v24  ;;  %v3981_v57 = vsel %vm1053_vm13, 1.0, %v5239_v33  ;;  %v1309_v56 = vmul.f32 0.0016666667, %v1245_v31 }
 0x10f   :  { %1560 = vst [vmem:[#allocation10 + $0xa8] sm:$0xff] %v1496_v63  ;;  %v886_v13 = vmul.f32 0.005, %v747_v3  ;;  %v887_v20 = vmul.f32 0.005, %v572_v10  ;;  %610 = vmatmul.bf16.gmra.mxu1 %v3831_v41  ;;  %v4739_v63 = vld [vmem:[#allocation5 + $0x70] sm:$0xff] }
 0x110   :  { %1561 = vst [vmem:[#allocation10 + $0xb0] sm:$0xff] %v1497_v8  ;;  %699 = vmatmul.bf16.gmra.mxu2 %v3827_v51  ;;  %v3834_v3 = vld [vmem:[#allocation8 + $0xf0] sm:$0xf]  ;;  %v1006_v50 = vadd.s32 112, %v4567_v18  ;;  %v4320_v8 = vld [vmem:[#allocation8 + $0xf4] sm:$0xf]  ;;  %v1373_v12 = vadd.f32 %v3981_v57, %v1309_v56 }
 0x111   :  { %v4729_v2 = vadd.f32 %v886_v13, %v822_v53  ;;  %788 = vmatmul.bf16.gmra.mxu3 %v3831_v41  ;;  %v4731_v21 = vadd.f32 %v887_v20, %v823_v11  ;;  %v3836_v10 = vld [vmem:[#allocation8 + $0xf8] sm:$0xf0]  ;;  %v1247_v13 = vunpack.c.l.bf16 %v4739_v63  ;;  %v105_v20 = vld [vmem:[#allocation8 + $0x70] sm:$0xff] }
 0x112   :  { %vm1055_vm14 = vcmp.eq.s32.totalorder %v1006_v50, %v4569_v19  ;;  %v74_v57 = vld [vmem:[#allocation5 + $0x78] sm:$0xff] }
 0x113   :  { %v1434_v23 = vmul.f32 0.0033333334, %v4729_v2  ;;  %v660_v36 = vpop.f32.mrf.mxu2  ;;  %v1435_v26 = vmul.f32 0.0033333334, %v4731_v21  ;;  %v484_v42 = vpop.f32.mrf.mxu0  ;;  %v1249_v50 = vunpack.c.l.bf16 %v74_v57 }
 0x114   :  { %v749_v39 = vpop.f32.mrf.mxu3  ;;  %v573_v48 = vpop.f32.mrf.mxu1 }
 0x115   :  { %v1498_v43 = vadd.f32 %v1434_v23, %v1306_v55  ;;  %v750_v45 = vadd.f32 %v749_v39, %v660_v36  ;;  %v1499_v51 = vadd.f32 %v1435_v26, %v1371_v22  ;;  %v574_v54 = vadd.f32 %v573_v48, %v484_v42 }
 0x116   :  { %v3835_v55 = vor.u32 %v4321_v5, %v3834_v3  ;;  %v3839_v36 = vor.u32 %v4320_v8, %v3836_v10  ;;  %v1246_v42 = vunpack.c.h.bf16 %v4726_v15  ;;  %v827_v48 = vunpack.c.l.bf16 %v105_v20  ;;  %v106_v8 = vld [vmem:[#allocation8 + $0x78] sm:$0xff] }
 0x117   :  { %1562 = vst [vmem:[#allocation10 + $0xb8] sm:$0xff] %v1498_v43  ;;  %v888_v41 = vmul.f32 0.005, %v750_v45  ;;  %v889_v53 = vmul.f32 0.005, %v574_v54  ;;  %v3982_v54 = vsel %vm1055_vm14, 1.0, %v5239_v33 }
 0x118   :  { %1563 = vst [vmem:[#allocation10 + $0xc0] sm:$0xff] %v1499_v51  ;;  %v1310_v15 = vmul.f32 0.0016666667, %v1246_v42 }
 0x119   :  { %v4742_v6 = vadd.f32 %v888_v41, %v824_v9  ;;  %v4744_v11 = vadd.f32 %v889_v53, %v825_v49  ;;  %v826_v9 = vunpack.c.h.bf16 %v104_v24  ;;  %v1311_v49 = vmul.f32 0.0016666667, %v1247_v13 }
 0x11a   :  { %v1007_v41 = vadd.s32 120, %v4567_v18 }
 0x11b   :  { %v1436_v52 = vmul.f32 0.0033333334, %v4742_v6  ;;  %v662_v16 = vpop.f32.mrf.mxu2  ;;  %v1437_v22 = vmul.f32 0.0033333334, %v4744_v11  ;;  %v487_v23 = vpop.f32.mrf.mxu0  ;;  %v1375_v53 = vadd.f32 %v3982_v54, %v1311_v49 }
 0x11c   :  { %v751_v31 = vpop.f32.mrf.mxu3  ;;  %v576_v43 = vpop.f32.mrf.mxu1  ;;  %vm1057_vm15 = vcmp.eq.s32.totalorder %v1007_v41, %v4569_v19  ;;  %v830_v41 = vunpack.c.h.bf16 %v106_v8 }
 0x11d   :  { %v1500_v26 = vadd.f32 %v1436_v52, %v1308_v34  ;;  %v752_v39 = vadd.f32 %v751_v31, %v662_v16  ;;  %v1501_v45 = vadd.f32 %v1437_v22, %v1373_v12  ;;  %v577_v47 = vadd.f32 %v576_v43, %v487_v23 }
 0x11e   :  { %526 = vmatmul.bf16.gmra.mxu0 %v3835_v55  ;;  %v1248_v22 = vunpack.c.h.bf16 %v4739_v63  ;;  %v3983_v42 = vsel %vm1057_vm15, 1.0, %v5239_v33 }
 0x11f   :  { %1564 = vst [vmem:[#allocation10 + $0xc8] sm:$0xff] %v1500_v26  ;;  %v890_v51 = vmul.f32 0.005, %v752_v39  ;;  %v891_v56 = vmul.f32 0.005, %v577_v47  ;;  %615 = vmatmul.bf16.gmra.mxu1 %v3839_v36  ;;  %v829_v26 = vunpack.c.l.bf16 %v106_v8 }
 0x120   :  { %1565 = vst [vmem:[#allocation10 + $0xd0] sm:$0xff] %v1501_v45  ;;  %704 = vmatmul.bf16.gmra.mxu2 %v3835_v55  ;;  %v828_v55 = vunpack.c.h.bf16 %v105_v20  ;;  %v1313_v39 = vmul.f32 0.0016666667, %v1249_v50  ;;  %v1312_v47 = vmul.f32 0.0016666667, %v1248_v22  ;;  %v107_v20 = vld [vmem:[#allocation8 + $0x80] sm:$0xff] }
 0x121   :  { %v4753_v24 = vadd.f32 %v890_v51, %v826_v9  ;;  %793 = vmatmul.bf16.gmra.mxu3 %v3839_v36  ;;  %v4755_v3 = vadd.f32 %v891_v56, %v827_v48  ;;  %v75_v50 = vld [vmem:[#allocation5 + $0x80] sm:$0xff]  ;;  %v4770_v22 = vadd.s32 128, %v4569_v19 }
 0x122   :  { %v1377_v49 = vadd.f32 %v3983_v42, %v1313_v39 }
 0x123   :  { %v1438_v5 = vmul.f32 0.0033333334, %v4753_v24  ;;  %v665_v34 = vpop.f32.mrf.mxu2  ;;  %v1439_v10 = vmul.f32 0.0033333334, %v4755_v3  ;;  %v489_v13 = vpop.f32.mrf.mxu0  ;;  %vm1090_vm15 = vcmp.eq.s32.totalorder %v1023_v29, %v4770_v22 }
 0x124   :  { %v754_v12 = vpop.f32.mrf.mxu3  ;;  %v578_v31 = vpop.f32.mrf.mxu1 }
 0x125   :  { %v1502_v52 = vadd.f32 %v1438_v5, %v1310_v15  ;;  %v755_v16 = vadd.f32 %v754_v12, %v665_v34  ;;  %v1503_v23 = vadd.f32 %v1439_v10, %v1375_v53  ;;  %v579_v36 = vadd.f32 %v578_v31, %v489_v13 }
 0x126   :  { %v1250_v15 = vunpack.c.h.bf16 %v74_v57  ;;  %v831_v12 = vunpack.c.l.bf16 %v107_v20  ;;  %v1251_v13 = vunpack.c.l.bf16 %v75_v50 }
 0x127   :  { %1566 = vst [vmem:[#allocation10 + $0xd8] sm:$0xff] %v1502_v52  ;;  %v892_v9 = vmul.f32 0.005, %v755_v16  ;;  %v893_v43 = vmul.f32 0.005, %v579_v36  ;;  %v1252_v36 = vunpack.c.h.bf16 %v75_v50 }
 0x128   :  { %1567 = vst [vmem:[#allocation10 + $0xe0] sm:$0xff] %v1503_v23  ;;  %v1314_v57 = vmul.f32 0.0016666667, %v1250_v15 }
 0x129   :  { %v4762_v45 = vadd.f32 %v892_v9, %v828_v55  ;;  %v4764_v48 = vadd.f32 %v893_v43, %v829_v26  ;;  %v1008_v55 = vadd.s32 128, %v4567_v18  ;;  %v108_v26 = vld [vmem:[#allocation8 + $0x88] sm:$0xff]  ;;  %v1315_v9 = vmul.f32 0.0016666667, %v1251_v13 }
 0x12b   :  { %v1440_v63 = vmul.f32 0.0033333334, %v4762_v45  ;;  %v667_v51 = vpop.f32.mrf.mxu2  ;;  %v1441_v54 = vmul.f32 0.0033333334, %v4764_v48  ;;  %v492_v53 = vpop.f32.mrf.mxu0  ;;  %vm1060_vm0 = vcmp.eq.s32.totalorder %v1008_v55, %v4770_v22  ;;  %v1667_v29 = vpack.c.bf16 %v4764_v48, %v4755_v3 }
 0x12c   :  { %v756_v56 = vpop.f32.mrf.mxu3  ;;  %v581_v10 = vpop.f32.mrf.mxu1  ;;  %v3984_v15 = vsel %vm1060_vm0, 1.0, %v5239_v33 }
 0x12d   :  { %v1504_v5 = vadd.f32 %v1440_v63, %v1312_v47  ;;  %v757_v34 = vadd.f32 %v756_v56, %v667_v51  ;;  %v1505_v52 = vadd.f32 %v1441_v54, %v1377_v49  ;;  %v582_v16 = vadd.f32 %v581_v10, %v492_v53  ;;  %v76_v47 = vld [vmem:[#allocation5 + $0x88] sm:$0xff] }
 0x12e   :  { %v832_v63 = vunpack.c.h.bf16 %v107_v20  ;;  %v833_v54 = vunpack.c.l.bf16 %v108_v26  ;;  %v1316_v53 = vmul.f32 0.0016666667, %v1252_v36  ;;  %v1253_v10 = vunpack.c.l.bf16 %v76_v47 }
 0x12f   :  { %1568 = vst [vmem:[#allocation10 + $0xe8] sm:$0xff] %v1504_v5  ;;  %v894_v31 = vmul.f32 0.005, %v757_v34  ;;  %v895_v23 = vmul.f32 0.005, %v582_v16 }
 0x130   :  { %1569 = vst [vmem:[#allocation10 + $0xf0] sm:$0xff] %v1505_v52  ;;  %v1254_v52 = vunpack.c.h.bf16 %v76_v47  ;;  %v1380_v55 = vadd.f32 %v3984_v15, %v1316_v53 }
 0x131   :  { %v4772_v8 = vadd.f32 %v894_v31, %v830_v41  ;;  %v4774_v39 = vadd.f32 %v895_v23, %v831_v12  ;;  %v1009_v12 = vadd.s32 136, %v4567_v18  ;;  %v1317_v23 = vmul.f32 0.0016666667, %v1253_v10 }
 0x133   :  { %5281 = vst [vmem:[#allocation35_spill] sm:$0xff] %v4774_v39  ;;  %v1442_v42 = vmul.f32 0.0033333334, %v4772_v8  ;;  %v670_v43 = vpop.f32.mrf.mxu2  ;;  %v1443_v19 = vmul.f32 0.0033333334, %v4774_v39  ;;  %v494_v51 = vpop.f32.mrf.mxu0  ;;  %vm1062_vm1 = vcmp.eq.s32.totalorder %v1009_v12, %v4770_v22 }
 0x134   :  { %v759_v49 = vpop.f32.mrf.mxu3  ;;  %v583_v50 = vpop.f32.mrf.mxu1 }
 0x135   :  { %v1506_v56 = vadd.f32 %v1442_v42, %v1314_v57  ;;  %v760_v41 = vadd.f32 %v759_v49, %v670_v43  ;;  %v1507_v5 = vadd.f32 %v1443_v19, %v1315_v9  ;;  %v584_v34 = vadd.f32 %v583_v50, %v494_v51  ;;  %v109_v57 = vld [vmem:[#allocation8 + $0x90] sm:$0xff] }
 0x136   :  { %v834_v19 = vunpack.c.h.bf16 %v108_v26  ;;  %v1318_v49 = vmul.f32 0.0016666667, %v1254_v52  ;;  %v835_v15 = vunpack.c.l.bf16 %v109_v57  ;;  %v110_v52 = vld [vmem:[#allocation8 + $0x98] sm:$0xff] }
 0x137   :  { %1570 = vst [vmem:[#allocation10 + $0xf8] sm:$0xff] %v1506_v56  ;;  %v896_v20 = vmul.f32 0.005, %v760_v41  ;;  %v897_v13 = vmul.f32 0.005, %v584_v34  ;;  %v77_v41 = vld [vmem:[#allocation5 + $0x90] sm:$0xff] }
 0x138   :  { %1571 = vst [vmem:[#allocation10 + $0x100] sm:$0xff] %v1507_v5  ;;  %v1255_v5 = vunpack.c.l.bf16 %v77_v41  ;;  %v1010_v34 = vadd.s32 144, %v4567_v18 }
 0x139   :  { %v4784_v16 = vadd.f32 %v896_v20, %v832_v63  ;;  %v4786_v31 = vadd.f32 %v897_v13, %v833_v54  ;;  %v3985_v63 = vsel %vm1062_vm1, 1.0, %v5239_v33  ;;  %v1256_v13 = vunpack.c.h.bf16 %v77_v41 }
 0x13a   :  { %v1382_v26 = vadd.f32 %v3985_v63, %v1318_v49  ;;  %vm1064_vm2 = vcmp.eq.s32.totalorder %v1010_v34, %v4770_v22  ;;  %v1011_v34 = vadd.s32 152, %v4567_v18 }
 0x13b   :  { %5282 = vst [vmem:[#allocation36_spill] sm:$0xff] %v4784_v16  ;;  %v1444_v36 = vmul.f32 0.0033333334, %v4784_v16  ;;  %v672_v9 = vpop.f32.mrf.mxu2  ;;  %v1445_v42 = vmul.f32 0.0033333334, %v4786_v31  ;;  %v497_v51 = vpop.f32.mrf.mxu0  ;;  %v3986_v49 = vsel %vm1064_vm2, 1.0, %v5239_v33 }
 0x13c   :  { %5283 = vst [vmem:[#allocation37_spill] sm:$0xff] %v4786_v31  ;;  %v761_v43 = vpop.f32.mrf.mxu3  ;;  %v586_v54 = vpop.f32.mrf.mxu1  ;;  %v1320_v63 = vmul.f32 0.0016666667, %v1256_v13  ;;  %vm1066_vm3 = vcmp.eq.s32.totalorder %v1011_v34, %v4770_v22  ;;  %v111_v13 = vld [vmem:[#allocation8 + $0xa0] sm:$0xff] }
 0x13d   :  { %v1508_v56 = vadd.f32 %v1444_v36, %v1380_v55  ;;  %v762_v47 = vadd.f32 %v761_v43, %v672_v9  ;;  %v1509_v53 = vadd.f32 %v1445_v42, %v1317_v23  ;;  %v587_v50 = vadd.f32 %v586_v54, %v497_v51  ;;  %v78_v42 = vld [vmem:[#allocation5 + $0x98] sm:$0xff] }
 0x13e   :  { %v1319_v36 = vmul.f32 0.0016666667, %v1255_v5  ;;  %v837_v54 = vunpack.c.l.bf16 %v110_v52  ;;  %v1257_v5 = vunpack.c.l.bf16 %v78_v42 }
 0x13f   :  { %1572 = vst [vmem:[#allocation10 + $0x108] sm:$0xff] %v1508_v56  ;;  %v898_v10 = vmul.f32 0.005, %v762_v47  ;;  %v899_v12 = vmul.f32 0.005, %v587_v50  ;;  %v836_v56 = vunpack.c.h.bf16 %v109_v57  ;;  %v1384_v57 = vadd.f32 %v3986_v49, %v1320_v63  ;;  %v79_v49 = vld [vmem:[#allocation5 + $0xa0] sm:$0xff] }
 0x140   :  { %1573 = vst [vmem:[#allocation10 + $0x110] sm:$0xff] %v1509_v53  ;;  %v839_v63 = vunpack.c.l.bf16 %v111_v13 }
 0x141   :  { %v4793_v20 = vadd.f32 %v898_v10, %v834_v19  ;;  %v4795_v55 = vadd.f32 %v899_v12, %v835_v15 }
 0x143   :  { %5284 = vst [vmem:[#allocation38_spill] sm:$0xff] %v4793_v20  ;;  %v1446_v23 = vmul.f32 0.0033333334, %v4793_v20  ;;  %v675_v9 = vpop.f32.mrf.mxu2  ;;  %v1447_v43 = vmul.f32 0.0033333334, %v4795_v55  ;;  %v499_v47 = vpop.f32.mrf.mxu0  ;;  %v1258_v20 = vunpack.c.h.bf16 %v78_v42 }
 0x144   :  { %5285 = vst [vmem:[#allocation39_spill] sm:$0xff] %v4795_v55  ;;  %v764_v51 = vpop.f32.mrf.mxu3  ;;  %v588_v41 = vpop.f32.mrf.mxu1 }
 0x145   :  { %v1510_v19 = vadd.f32 %v1446_v23, %v1382_v26  ;;  %v765_v53 = vadd.f32 %v764_v51, %v675_v9  ;;  %v1511_v15 = vadd.f32 %v1447_v43, %v1319_v36  ;;  %v589_v50 = vadd.f32 %v588_v41, %v499_v47 }
 0x146   :  { %v1321_v26 = vmul.f32 0.0016666667, %v1257_v5  ;;  %v838_v51 = vunpack.c.h.bf16 %v110_v52  ;;  %v1322_v47 = vmul.f32 0.0016666667, %v1258_v20  ;;  %v1012_v5 = vadd.s32 160, %v4567_v18 }
 0x147   :  { %1574 = vst [vmem:[#allocation10 + $0x118] sm:$0xff] %v1510_v19  ;;  %v900_v10 = vmul.f32 0.005, %v765_v53  ;;  %v901_v12 = vmul.f32 0.005, %v589_v50  ;;  %v1259_v50 = vunpack.c.l.bf16 %v79_v49  ;;  %v1260_v52 = vunpack.c.h.bf16 %v79_v49 }
 0x148   :  { %1575 = vst [vmem:[#allocation10 + $0x120] sm:$0xff] %v1511_v15  ;;  %vm1068_vm4 = vcmp.eq.s32.totalorder %v1012_v5, %v4770_v22  ;;  %v1013_v5 = vadd.s32 168, %v4567_v18 }
 0x149   :  { %v4802_v16 = vadd.f32 %v900_v10, %v836_v56  ;;  %v4804_v28 = vadd.f32 %v901_v12, %v837_v54  ;;  %v3987_v56 = vsel %vm1066_vm3, 1.0, %v5239_v33 }
 0x14a   :  { %v1386_v20 = vadd.f32 %v3987_v56, %v1322_v47  ;;  %v3988_v47 = vsel %vm1068_vm4, 1.0, %v5239_v33  ;;  %v1324_v56 = vmul.f32 0.0016666667, %v1260_v52  ;;  %vm1070_vm5 = vcmp.eq.s32.totalorder %v1013_v5, %v4770_v22  ;;  %v113_v52 = vld [vmem:[#allocation8 + $0xb0] sm:$0xff] }
 0x14b   :  { %5286 = vst [vmem:[#allocation40_spill] sm:$0xff] %v4802_v16  ;;  %v1448_v36 = vmul.f32 0.0033333334, %v4802_v16  ;;  %v677_v23 = vpop.f32.mrf.mxu2  ;;  %v1449_v9 = vmul.f32 0.0033333334, %v4804_v28  ;;  %v502_v19 = vpop.f32.mrf.mxu0 }
 0x14c   :  { %5287 = vst [vmem:[#allocation41_spill] sm:$0xff] %v4804_v28  ;;  %v766_v43 = vpop.f32.mrf.mxu3  ;;  %v591_v54 = vpop.f32.mrf.mxu1 }
 0x14d   :  { %v1512_v53 = vadd.f32 %v1448_v36, %v1384_v57  ;;  %v767_v42 = vadd.f32 %v766_v43, %v677_v23  ;;  %v1513_v41 = vadd.f32 %v1449_v9, %v1321_v26  ;;  %v592_v15 = vadd.f32 %v591_v54, %v502_v19  ;;  %v112_v57 = vld [vmem:[#allocation8 + $0xa8] sm:$0xff] }
 0x14e   :  { %v1323_v23 = vmul.f32 0.0016666667, %v1259_v50  ;;  %v80_v43 = vld [vmem:[#allocation5 + $0xa8] sm:$0xff] }
 0x14f   :  { %1576 = vst [vmem:[#allocation10 + $0x128] sm:$0xff] %v1512_v53  ;;  %v902_v34 = vmul.f32 0.005, %v767_v42  ;;  %v903_v10 = vmul.f32 0.005, %v592_v15  ;;  %v840_v42 = vunpack.c.h.bf16 %v111_v13  ;;  %v1262_v31 = vunpack.c.h.bf16 %v80_v43 }
 0x150   :  { %1577 = vst [vmem:[#allocation10 + $0x130] sm:$0xff] %v1513_v41  ;;  %v841_v41 = vunpack.c.l.bf16 %v112_v57  ;;  %v1388_v13 = vadd.f32 %v3988_v47, %v1324_v56  ;;  %v81_v47 = vld [vmem:[#allocation5 + $0xb0] sm:$0xff] }
 0x151   :  { %v4811_v12 = vadd.f32 %v902_v34, %v838_v51  ;;  %v4813_v36 = vadd.f32 %v903_v10, %v839_v63  ;;  %v1261_v34 = vunpack.c.l.bf16 %v80_v43 }
 0x153   :  { %5288 = vst [vmem:[#allocation42_spill] sm:$0xff] %v4811_v12  ;;  %v1450_v26 = vmul.f32 0.0033333334, %v4811_v12  ;;  %v680_v9 = vpop.f32.mrf.mxu2  ;;  %v1451_v19 = vmul.f32 0.0033333334, %v4813_v36  ;;  %v504_v54 = vpop.f32.mrf.mxu0 }
 0x154   :  { %5289 = vst [vmem:[#allocation43_spill] sm:$0xff] %v4813_v36  ;;  %v769_v53 = vpop.f32.mrf.mxu3  ;;  %v593_v49 = vpop.f32.mrf.mxu1 }
 0x155   :  { %v1514_v51 = vadd.f32 %v1450_v26, %v1386_v20  ;;  %v770_v15 = vadd.f32 %v769_v53, %v680_v9  ;;  %v1515_v63 = vadd.f32 %v1451_v19, %v1323_v23  ;;  %v594_v50 = vadd.f32 %v593_v49, %v504_v54 }
 0x156   :  { %v1325_v20 = vmul.f32 0.0016666667, %v1261_v34  ;;  %v842_v53 = vunpack.c.h.bf16 %v112_v57  ;;  %v1326_v54 = vmul.f32 0.0016666667, %v1262_v31  ;;  %v1264_v57 = vunpack.c.h.bf16 %v81_v47 }
 0x157   :  { %1578 = vst [vmem:[#allocation10 + $0x138] sm:$0xff] %v1514_v51  ;;  %v904_v10 = vmul.f32 0.005, %v770_v15  ;;  %v905_v61 = vmul.f32 0.005, %v594_v50  ;;  %v1014_v50 = vadd.s32 176, %v4567_v18 }
 0x158   :  { %1579 = vst [vmem:[#allocation10 + $0x140] sm:$0xff] %v1515_v63  ;;  %v1263_v63 = vunpack.c.l.bf16 %v81_v47 }
 0x159   :  { %v4820_v39 = vadd.f32 %v904_v10, %v840_v42  ;;  %v4822_v1 = vadd.f32 %v905_v61, %v841_v41  ;;  %v3989_v42 = vsel %vm1070_vm5, 1.0, %v5239_v33  ;;  %v843_v41 = vunpack.c.l.bf16 %v113_v52 }
 0x15a   :  { %v1390_v31 = vadd.f32 %v3989_v42, %v1326_v54  ;;  %vm1072_vm6 = vcmp.eq.s32.totalorder %v1014_v50, %v4770_v22  ;;  %v1328_v42 = vmul.f32 0.0016666667, %v1264_v57  ;;  %v1015_v50 = vadd.s32 184, %v4567_v18  ;;  %v115_v57 = vld [vmem:[#allocation8 + $0xc0] sm:$0xff] }
 0x15b   :  { %5290 = vst [vmem:[#allocation44_spill] sm:$0xff] %v4820_v39  ;;  %v1452_v23 = vmul.f32 0.0033333334, %v4820_v39  ;;  %v682_v26 = vpop.f32.mrf.mxu2  ;;  %v1453_v9 = vmul.f32 0.0033333334, %v4822_v1  ;;  %v507_v51 = vpop.f32.mrf.mxu0  ;;  %v3990_v54 = vsel %vm1072_vm6, 1.0, %v5239_v33 }
 0x15c   :  { %5291 = vst [vmem:[#allocation45_spill] sm:$0xff] %v4822_v1  ;;  %v771_v19 = vpop.f32.mrf.mxu3  ;;  %v596_v61 = vpop.f32.mrf.mxu1  ;;  %vm1074_vm7 = vcmp.eq.s32.totalorder %v1015_v50, %v4770_v22 }
 0x15d   :  { %v1516_v15 = vadd.f32 %v1452_v23, %v1388_v13  ;;  %v772_v43 = vadd.f32 %v771_v19, %v682_v26  ;;  %v1517_v56 = vadd.f32 %v1453_v9, %v1325_v20  ;;  %v597_v49 = vadd.f32 %v596_v61, %v507_v51  ;;  %v114_v13 = vld [vmem:[#allocation8 + $0xb8] sm:$0xff] }
 0x15e   :  { %v1327_v26 = vmul.f32 0.0016666667, %v1263_v63  ;;  %v82_v19 = vld [vmem:[#allocation5 + $0xb8] sm:$0xff] }
 0x15f   :  { %1580 = vst [vmem:[#allocation10 + $0x148] sm:$0xff] %v1516_v15  ;;  %v906_v34 = vmul.f32 0.005, %v772_v43  ;;  %v907_v5 = vmul.f32 0.005, %v597_v49  ;;  %v844_v43 = vunpack.c.h.bf16 %v113_v52  ;;  %v1266_v12 = vunpack.c.h.bf16 %v82_v19 }
 0x160   :  { %1581 = vst [vmem:[#allocation10 + $0x150] sm:$0xff] %v1517_v56  ;;  %v845_v56 = vunpack.c.l.bf16 %v114_v13  ;;  %v1392_v52 = vadd.f32 %v3990_v54, %v1328_v42  ;;  %v83_v54 = vld [vmem:[#allocation5 + $0xc0] sm:$0xff] }
 0x161   :  { %v4829_v10 = vadd.f32 %v906_v34, %v842_v53  ;;  %v4831_v23 = vadd.f32 %v907_v5, %v843_v41  ;;  %v1265_v34 = vunpack.c.l.bf16 %v82_v19 }
 0x163   :  { %5292 = vst [vmem:[#allocation46_spill] sm:$0xff] %v4829_v10  ;;  %v1454_v20 = vmul.f32 0.0033333334, %v4829_v10  ;;  %v685_v9 = vpop.f32.mrf.mxu2  ;;  %v1455_v51 = vmul.f32 0.0033333334, %v4831_v23  ;;  %v509_v61 = vpop.f32.mrf.mxu0 }
 0x164   :  { %v774_v15 = vpop.f32.mrf.mxu3  ;;  %v598_v47 = vpop.f32.mrf.mxu1 }
 0x165   :  { %v1518_v53 = vadd.f32 %v1454_v20, %v1390_v31  ;;  %v775_v49 = vadd.f32 %v774_v15, %v685_v9  ;;  %v1519_v41 = vadd.f32 %v1455_v51, %v1327_v26  ;;  %v599_v63 = vadd.f32 %v598_v47, %v509_v61 }
 0x166   :  { %v1329_v31 = vmul.f32 0.0016666667, %v1265_v34  ;;  %v846_v15 = vunpack.c.h.bf16 %v114_v13  ;;  %v1330_v61 = vmul.f32 0.0016666667, %v1266_v12  ;;  %v1268_v13 = vunpack.c.h.bf16 %v83_v54 }
 0x167   :  { %1582 = vst [vmem:[#allocation10 + $0x158] sm:$0xff] %v1518_v53  ;;  %v908_v5 = vmul.f32 0.005, %v775_v49  ;;  %v909_v38 = vmul.f32 0.005, %v599_v63  ;;  %v1016_v63 = vadd.s32 192, %v4567_v18 }
 0x168   :  { %1583 = vst [vmem:[#allocation10 + $0x160] sm:$0xff] %v1519_v41  ;;  %v1267_v41 = vunpack.c.l.bf16 %v83_v54 }
 0x169   :  { %v4838_v16 = vadd.f32 %v908_v5, %v844_v43  ;;  %v4840_v27 = vadd.f32 %v909_v38, %v845_v56  ;;  %v3991_v43 = vsel %vm1074_vm7, 1.0, %v5239_v33  ;;  %v847_v56 = vunpack.c.l.bf16 %v115_v57 }
 0x16a   :  { %v1394_v12 = vadd.f32 %v3991_v43, %v1330_v61  ;;  %vm1076_vm8 = vcmp.eq.s32.totalorder %v1016_v63, %v4770_v22  ;;  %v1332_v43 = vmul.f32 0.0016666667, %v1268_v13  ;;  %v1017_v63 = vadd.s32 200, %v4567_v18  ;;  %v117_v13 = vld [vmem:[#allocation8 + $0xd0] sm:$0xff] }
 0x16b   :  { %5293 = vst [vmem:[#allocation47_spill] sm:$0xff] %v4838_v16  ;;  %v1456_v26 = vmul.f32 0.0033333334, %v4838_v16  ;;  %v687_v20 = vpop.f32.mrf.mxu2  ;;  %v1457_v9 = vmul.f32 0.0033333334, %v4840_v27  ;;  %v512_v53 = vpop.f32.mrf.mxu0  ;;  %v3992_v61 = vsel %vm1076_vm8, 1.0, %v5239_v33 }
 0x16c   :  { %v776_v51 = vpop.f32.mrf.mxu3  ;;  %v601_v38 = vpop.f32.mrf.mxu1  ;;  %vm1078_vm9 = vcmp.eq.s32.totalorder %v1017_v63, %v4770_v22 }
 0x16d   :  { %v1520_v49 = vadd.f32 %v1456_v26, %v1392_v52  ;;  %v777_v19 = vadd.f32 %v776_v51, %v687_v20  ;;  %v1521_v42 = vadd.f32 %v1457_v9, %v1329_v31  ;;  %v602_v47 = vadd.f32 %v601_v38, %v512_v53  ;;  %v116_v52 = vld [vmem:[#allocation8 + $0xc8] sm:$0xff] }
 0x16e   :  { %v1331_v20 = vmul.f32 0.0016666667, %v1267_v41  ;;  %v84_v51 = vld [vmem:[#allocation5 + $0xc8] sm:$0xff] }
 0x16f   :  { %1584 = vst [vmem:[#allocation10 + $0x168] sm:$0xff] %v1520_v49  ;;  %v910_v34 = vmul.f32 0.005, %v777_v19  ;;  %v911_v50 = vmul.f32 0.005, %v602_v47  ;;  %v848_v19 = vunpack.c.h.bf16 %v115_v57  ;;  %v1270_v28 = vunpack.c.h.bf16 %v84_v51 }
 0x170   :  { %1585 = vst [vmem:[#allocation10 + $0x170] sm:$0xff] %v1521_v42  ;;  %v849_v42 = vunpack.c.l.bf16 %v116_v52  ;;  %v1396_v57 = vadd.f32 %v3992_v61, %v1332_v43  ;;  %v85_v61 = vld [vmem:[#allocation5 + $0xd0] sm:$0xff] }
 0x171   :  { %v4847_v5 = vadd.f32 %v910_v34, %v846_v15  ;;  %v4849_v26 = vadd.f32 %v911_v50, %v847_v56  ;;  %v1269_v34 = vunpack.c.l.bf16 %v84_v51 }
 0x173   :  { %5294 = vst [vmem:[#allocation48_spill] sm:$0xff] %v4847_v5  ;;  %v1458_v31 = vmul.f32 0.0033333334, %v4847_v5  ;;  %v690_v9 = vpop.f32.mrf.mxu2  ;;  %v1459_v53 = vmul.f32 0.0033333334, %v4849_v26  ;;  %v514_v38 = vpop.f32.mrf.mxu0 }
 0x174   :  { %v779_v49 = vpop.f32.mrf.mxu3  ;;  %v603_v54 = vpop.f32.mrf.mxu1 }
 0x175   :  { %v1522_v15 = vadd.f32 %v1458_v31, %v1394_v12  ;;  %v780_v47 = vadd.f32 %v779_v49, %v690_v9  ;;  %v1523_v56 = vadd.f32 %v1459_v53, %v1331_v20  ;;  %v604_v41 = vadd.f32 %v603_v54, %v514_v38 }
 0x176   :  { %v1333_v12 = vmul.f32 0.0016666667, %v1269_v34  ;;  %v850_v49 = vunpack.c.h.bf16 %v116_v52  ;;  %v1334_v38 = vmul.f32 0.0016666667, %v1270_v28  ;;  %v1272_v52 = vunpack.c.h.bf16 %v85_v61 }
 0x177   :  { %1586 = vst [vmem:[#allocation10 + $0x178] sm:$0xff] %v1522_v15  ;;  %v912_v50 = vmul.f32 0.005, %v780_v47  ;;  %v913_v58 = vmul.f32 0.005, %v604_v41  ;;  %v1018_v41 = vadd.s32 208, %v4567_v18 }
 0x178   :  { %1587 = vst [vmem:[#allocation10 + $0x180] sm:$0xff] %v1523_v56  ;;  %v1271_v56 = vunpack.c.l.bf16 %v85_v61 }
 0x179   :  { %v4856_v55 = vadd.f32 %v912_v50, %v848_v19  ;;  %v4858_v62 = vadd.f32 %v913_v58, %v849_v42  ;;  %v3993_v19 = vsel %vm1078_vm9, 1.0, %v5239_v33  ;;  %v851_v42 = vunpack.c.l.bf16 %v117_v13 }
 0x17a   :  { %v1398_v28 = vadd.f32 %v3993_v19, %v1334_v38  ;;  %vm1080_vm10 = vcmp.eq.s32.totalorder %v1018_v41, %v4770_v22  ;;  %v1336_v19 = vmul.f32 0.0016666667, %v1272_v52  ;;  %v1019_v41 = vadd.s32 216, %v4567_v18  ;;  %v119_v52 = vld [vmem:[#allocation8 + $0xe0] sm:$0xff] }
 0x17b   :  { %v1460_v20 = vmul.f32 0.0033333334, %v4856_v55  ;;  %v692_v31 = vpop.f32.mrf.mxu2  ;;  %v1461_v9 = vmul.f32 0.0033333334, %v4858_v62  ;;  %v517_v15 = vpop.f32.mrf.mxu0  ;;  %v3994_v38 = vsel %vm1080_vm10, 1.0, %v5239_v33 }
 0x17c   :  { %v781_v53 = vpop.f32.mrf.mxu3  ;;  %v606_v58 = vpop.f32.mrf.mxu1  ;;  %vm1082_vm11 = vcmp.eq.s32.totalorder %v1019_v41, %v4770_v22 }
 0x17d   :  { %v1524_v47 = vadd.f32 %v1460_v20, %v1396_v57  ;;  %v782_v51 = vadd.f32 %v781_v53, %v692_v31  ;;  %v1525_v43 = vadd.f32 %v1461_v9, %v1333_v12  ;;  %v607_v54 = vadd.f32 %v606_v58, %v517_v15  ;;  %v118_v57 = vld [vmem:[#allocation8 + $0xd8] sm:$0xff] }
 0x17e   :  { %v1335_v31 = vmul.f32 0.0016666667, %v1271_v56  ;;  %v86_v53 = vld [vmem:[#allocation5 + $0xd8] sm:$0xff] }
 0x17f   :  { %1588 = vst [vmem:[#allocation10 + $0x188] sm:$0xff] %v1524_v47  ;;  %v914_v34 = vmul.f32 0.005, %v782_v51  ;;  %v915_v63 = vmul.f32 0.005, %v607_v54  ;;  %v852_v51 = vunpack.c.h.bf16 %v117_v13  ;;  %v1274_v10 = vunpack.c.h.bf16 %v86_v53 }
 0x180   :  { %1589 = vst [vmem:[#allocation10 + $0x190] sm:$0xff] %v1525_v43  ;;  %v853_v43 = vunpack.c.l.bf16 %v118_v57  ;;  %v1400_v13 = vadd.f32 %v3994_v38, %v1336_v19  ;;  %v87_v38 = vld [vmem:[#allocation5 + $0xe0] sm:$0xff] }
 0x181   :  { %v4865_v50 = vadd.f32 %v914_v34, %v850_v49  ;;  %v4867_v20 = vadd.f32 %v915_v63, %v851_v42  ;;  %v1273_v34 = vunpack.c.l.bf16 %v86_v53 }
 0x183   :  { %v1462_v12 = vmul.f32 0.0033333334, %v4865_v50  ;;  %v695_v9 = vpop.f32.mrf.mxu2  ;;  %v1463_v15 = vmul.f32 0.0033333334, %v4867_v20  ;;  %v519_v58 = vpop.f32.mrf.mxu0 }
 0x184   :  { %v784_v47 = vpop.f32.mrf.mxu3  ;;  %v608_v61 = vpop.f32.mrf.mxu1 }
 0x185   :  { %v1526_v49 = vadd.f32 %v1462_v12, %v1398_v28  ;;  %v785_v54 = vadd.f32 %v784_v47, %v695_v9  ;;  %v1527_v42 = vadd.f32 %v1463_v15, %v1335_v31  ;;  %v609_v56 = vadd.f32 %v608_v61, %v519_v58 }
 0x186   :  { %v1337_v28 = vmul.f32 0.0016666667, %v1273_v34  ;;  %v854_v47 = vunpack.c.h.bf16 %v118_v57  ;;  %v1338_v58 = vmul.f32 0.0016666667, %v1274_v10  ;;  %v1276_v57 = vunpack.c.h.bf16 %v87_v38 }
 0x187   :  { %1590 = vst [vmem:[#allocation10 + $0x198] sm:$0xff] %v1526_v49  ;;  %v916_v63 = vmul.f32 0.005, %v785_v54  ;;  %v917_v30 = vmul.f32 0.005, %v609_v56  ;;  %v1020_v56 = vadd.s32 224, %v4567_v18 }
 0x188   :  { %1591 = vst [vmem:[#allocation10 + $0x1a0] sm:$0xff] %v1527_v42  ;;  %v1275_v42 = vunpack.c.l.bf16 %v87_v38 }
 0x189   :  { %v4874_v39 = vadd.f32 %v916_v63, %v852_v51  ;;  %v4876_v32 = vadd.f32 %v917_v30, %v853_v43  ;;  %v3995_v51 = vsel %vm1082_vm11, 1.0, %v5239_v33  ;;  %v855_v43 = vunpack.c.l.bf16 %v119_v52 }
 0x18a   :  { %v1402_v10 = vadd.f32 %v3995_v51, %v1338_v58  ;;  %vm1084_vm12 = vcmp.eq.s32.totalorder %v1020_v56, %v4770_v22  ;;  %v1340_v51 = vmul.f32 0.0016666667, %v1276_v57  ;;  %v1021_v56 = vadd.s32 232, %v4567_v18 }
 0x18b   :  { %v1464_v31 = vmul.f32 0.0033333334, %v4874_v39  ;;  %v697_v12 = vpop.f32.mrf.mxu2  ;;  %v1465_v9 = vmul.f32 0.0033333334, %v4876_v32  ;;  %v522_v49 = vpop.f32.mrf.mxu0  ;;  %v3996_v58 = vsel %vm1084_vm12, 1.0, %v5239_v33 }
 0x18c   :  { %v786_v15 = vpop.f32.mrf.mxu3  ;;  %v611_v30 = vpop.f32.mrf.mxu1  ;;  %vm1086_vm13 = vcmp.eq.s32.totalorder %v1021_v56, %v4770_v22 }
 0x18d   :  { %v1528_v54 = vadd.f32 %v1464_v31, %v1400_v13  ;;  %v787_v53 = vadd.f32 %v786_v15, %v697_v12  ;;  %v1529_v19 = vadd.f32 %v1465_v9, %v1337_v28  ;;  %v612_v61 = vadd.f32 %v611_v30, %v522_v49  ;;  %v120_v13 = vld [vmem:[#allocation8 + $0xe8] sm:$0xff] }
 0x18e   :  { %v1339_v12 = vmul.f32 0.0016666667, %v1275_v42  ;;  %v88_v15 = vld [vmem:[#allocation5 + $0xe8] sm:$0xff] }
 0x18f   :  { %1592 = vst [vmem:[#allocation10 + $0x1a8] sm:$0xff] %v1528_v54  ;;  %v918_v34 = vmul.f32 0.005, %v787_v53  ;;  %v919_v41 = vmul.f32 0.005, %v612_v61  ;;  %v856_v53 = vunpack.c.h.bf16 %v119_v52  ;;  %v1404_v52 = vadd.f32 %v3996_v58, %v1340_v51 }
 0x190   :  { %1593 = vst [vmem:[#allocation10 + $0x1b0] sm:$0xff] %v1529_v19  ;;  %v857_v19 = vunpack.c.l.bf16 %v120_v13  ;;  %v1278_v36 = vunpack.c.h.bf16 %v88_v15 }
 0x191   :  { %v4883_v63 = vadd.f32 %v918_v34, %v854_v47  ;;  %v4885_v31 = vadd.f32 %v919_v41, %v855_v43  ;;  %v1277_v34 = vunpack.c.l.bf16 %v88_v15  ;;  %v89_v15 = vld [vmem:[#allocation5 + $0xf0] sm:$0xff] }
 0x192   :  { %v1342_v58 = vmul.f32 0.0016666667, %v1278_v36 }
 0x193   :  { %v1466_v28 = vmul.f32 0.0033333334, %v4883_v63  ;;  %v700_v9 = vpop.f32.mrf.mxu2  ;;  %v1467_v49 = vmul.f32 0.0033333334, %v4885_v31  ;;  %v524_v30 = vpop.f32.mrf.mxu0 }
 0x194   :  { %v789_v54 = vpop.f32.mrf.mxu3  ;;  %v613_v38 = vpop.f32.mrf.mxu1 }
 0x195   :  { %v1530_v47 = vadd.f32 %v1466_v28, %v1402_v10  ;;  %v790_v61 = vadd.f32 %v789_v54, %v700_v9  ;;  %v1531_v43 = vadd.f32 %v1467_v49, %v1339_v12  ;;  %v614_v42 = vadd.f32 %v613_v38, %v524_v30  ;;  %v121_v28 = vld [vmem:[#allocation8 + $0xf0] sm:$0xff] }
 0x196   :  { %v1341_v10 = vmul.f32 0.0016666667, %v1277_v34  ;;  %v858_v54 = vunpack.c.h.bf16 %v120_v13  ;;  %v859_v38 = vunpack.c.l.bf16 %v121_v28  ;;  %v1022_v34 = vadd.s32 240, %v4567_v18 }
 0x197   :  { %1594 = vst [vmem:[#allocation10 + $0x1b8] sm:$0xff] %v1530_v47  ;;  %v920_v41 = vmul.f32 0.005, %v790_v61  ;;  %v921_v59 = vmul.f32 0.005, %v614_v42 }
 0x198   :  { %1595 = vst [vmem:[#allocation10 + $0x1c0] sm:$0xff] %v1531_v43  ;;  %v1279_v43 = vunpack.c.l.bf16 %v89_v15  ;;  %vm1088_vm14 = vcmp.eq.s32.totalorder %v1022_v34, %v4770_v22 }
 0x199   :  { %v4892_v1 = vadd.f32 %v920_v41, %v856_v53  ;;  %v4894_v0 = vadd.f32 %v921_v59, %v857_v19  ;;  %v3997_v53 = vsel %vm1086_vm13, 1.0, %v5239_v33 }
 0x19a   :  { %v1406_v13 = vadd.f32 %v3997_v53, %v1342_v58  ;;  %v5295_v58 = vmov 0.0  }
 0x19b   :  { %v1468_v57 = vmul.f32 0.0033333334, %v4892_v1  ;;  %v702_v12 = vpop.f32.mrf.mxu2  ;;  %v1469_v9 = vmul.f32 0.0033333334, %v4894_v0  ;;  %v527_v30 = vpop.f32.mrf.mxu0  ;;  %v3999_v18 = vsel %vm1090_vm15, 1.0, %v5295_v58 }
 0x19c   :  { %v791_v49 = vpop.f32.mrf.mxu3  ;;  %v616_v59 = vpop.f32.mrf.mxu1 }
 0x19d   :  { %v1532_v47 = vadd.f32 %v1468_v57, %v1404_v52  ;;  %v792_v61 = vadd.f32 %v791_v49, %v702_v12  ;;  %v1533_v19 = vadd.f32 %v1469_v9, %v1341_v10  ;;  %v617_v51 = vadd.f32 %v616_v59, %v527_v30  ;;  %v122_v49 = vld [vmem:[#allocation8 + $0xf8] sm:$0xff] }
 0x19e   :  { %v1280_v52 = vunpack.c.h.bf16 %v89_v15  ;;  %v1343_v12 = vmul.f32 0.0016666667, %v1279_v43  ;;  %v90_v10 = vld [vmem:[#allocation5 + $0xf8] sm:$0xff]  ;;  %v3998_v15 = vsel %vm1088_vm14, 1.0, %v5295_v58 }
 0x19f   :  { %1596 = vst [vmem:[#allocation10 + $0x1c8] sm:$0xff] %v1532_v47  ;;  %v922_v42 = vmul.f32 0.005, %v792_v61  ;;  %v923_v56 = vmul.f32 0.005, %v617_v51  ;;  %v860_v47 = vunpack.c.h.bf16 %v121_v28  ;;  %v1281_v43 = vunpack.c.l.bf16 %v90_v10 }
 0x1a0   :  { %1597 = vst [vmem:[#allocation10 + $0x1d0] sm:$0xff] %v1533_v19  ;;  %v1344_v51 = vmul.f32 0.0016666667, %v1280_v52  ;;  %v1282_v28 = vunpack.c.h.bf16 %v90_v10 }
 0x1a1   :  { %v4901_v41 = vadd.f32 %v922_v42, %v858_v54  ;;  %v987_v57 = vadd.f32 %v923_v56, %v859_v38  ;;  %v861_v42 = vunpack.c.l.bf16 %v122_v49 }
 0x1a2   :  { %v1408_v16 = vadd.f32 %v3998_v15, %v1344_v51 }
 0x1a3   :  { %v1470_v36 = vmul.f32 0.0033333334, %v4901_v41  ;;  %v705_v33 = vpop.f32.mrf.mxu2  ;;  %v1471_v9 = vmul.f32 0.0033333334, %v987_v57  ;;  %v529_v61 = vpop.f32.mrf.mxu0 }
 0x1a4   :  { %v794_v30 = vpop.f32.mrf.mxu3  ;;  %v618_v54 = vpop.f32.mrf.mxu1 }
 0x1a5   :  { %v1534_v59 = vadd.f32 %v1470_v36, %v1406_v13  ;;  %v795_v19 = vadd.f32 %v794_v30, %v705_v33  ;;  %v1535_v53 = vadd.f32 %v1471_v9, %v1343_v12  ;;  %v619_v38 = vadd.f32 %v618_v54, %v529_v61 }
 0x1a6   :  { %v1345_v13 = vmul.f32 0.0016666667, %v1281_v43  ;;  %v862_v61 = vunpack.c.h.bf16 %v122_v49 }
 0x1a7   :  { %1598 = vst [vmem:[#allocation10 + $0x1d8] sm:$0xff] %v1534_v59  ;;  %v924_v56 = vmul.f32 0.005, %v795_v19  ;;  %v925_v34 = vmul.f32 0.005, %v619_v38 }
 0x1a8   :  { %1599 = vst [vmem:[#allocation10 + $0x1e0] sm:$0xff] %v1535_v53  ;;  %v1346_v59 = vmul.f32 0.0016666667, %v1282_v28 }
 0x1a9   :  { %v988_v5 = vadd.f32 %v924_v56, %v860_v47  ;;  %v989_v37 = vadd.f32 %v925_v34, %v861_v42 }
 0x1aa   :  { %v1410_v10 = vadd.f32 %v3999_v18, %v1346_v59 }
 0x1ab   :  { %v1472_v33 = vmul.f32 0.0033333334, %v988_v5  ;;  %v707_v52 = vpop.f32.mrf.mxu2  ;;  %v1473_v12 = vmul.f32 0.0033333334, %v989_v37  ;;  %v1683_v22 = vpack.c.bf16 %v989_v37, %v987_v57 }
 0x1ac   :  { %v796_v36 = vpop.f32.mrf.mxu3 }
 0x1ad   :  { %v1536_v9 = vadd.f32 %v1472_v33, %v1408_v16  ;;  %v797_v30 = vadd.f32 %v796_v36, %v707_v52  ;;  %v1537_v19 = vadd.f32 %v1473_v12, %v1345_v13  ;;  %v1668_v16 = vpack.c.bf16 %v4772_v8, %v4762_v45 }
 0x1af   :  { %1600 = vst [vmem:[#allocation10 + $0x1e8] sm:$0xff] %v1536_v9  ;;  %v926_v54 = vmul.f32 0.005, %v797_v30 }
 0x1b0   :  { %1601 = vst [vmem:[#allocation10 + $0x1f0] sm:$0xff] %v1537_v19 }
 0x1b1   :  { %v990_v47 = vadd.f32 %v926_v54, %v862_v61 }
 0x1b3   :  { %v1474_v51 = vmul.f32 0.0033333334, %v990_v47  ;;  %v1684_v49 = vpack.c.bf16 %v990_v47, %v988_v5 }
 0x1b5   :  { %v1538_v42 = vadd.f32 %v1474_v51, %v1410_v10 }
 0x1b7   :  { %1602 = vst [vmem:[#allocation10 + $0x1f8] sm:$0xff] %v1538_v42 }
 0x1b8   :  { %4520 = dma.done.wait [#allocation4], 4096 }
 0x1b9   :  { %4521 = vsyncadd [#allocation4], 4294963200  ;;  %1845 = vmatpush.bf16.msrb.mxu0 %v1667_v29  ;;  %1934 = vmatpush.bf16.msrb.mxu1 %v1683_v22  ;;  %v1665_v53 = vpack.c.bf16 %v4744_v11, %v4731_v21  ;;  %v1681_v58 = vpack.c.bf16 %v4894_v0, %v4885_v31  ;;  %v1666_v3 = vpack.c.bf16 %v4753_v24, %v4742_v6  ;;  %v5301_v8 = vld [vmem:[#allocation43_spill] sm:$0xff]  ;;  %v5306_v5 = vld [vmem:[#allocation46_spill] sm:$0xff]  ;;  %s1615_s5 = sshll.u32 %s5214_s3, 4  ;;  %s4532_s6 = smov [#allocation3]   ;;  %s1616_s5 = int_to_ptr.hbm [resolvable:$true] %s1615_s5 }
 0x1ba   :  { %2023 = vmatpush.bf16.msrb.mxu2 %v1668_v16  ;;  %2112 = vmatpush.bf16.msrb.mxu3 %v1684_v49  ;;  %v1682_v37 = vpack.c.bf16 %v4901_v41, %v4892_v1  ;;  %v1663_v45 = vpack.c.bf16 %v4718_v25, %v4705_v60  ;;  %v1679_v48 = vpack.c.bf16 %v4876_v32, %v4867_v20  ;;  %v5310_v31 = vld [vmem:[#allocation41_spill] sm:$0xff]  ;;  %v5311_v57 = vld [vmem:[#allocation27_spill] sm:$0xff]  ;;  %v5313_v43 = vld [vmem:[#allocation40_spill] sm:$0xff]  ;;  %s1617_s7 = sshll.u32 %s4532_s6, 4  ;;  %s1618_s7 = int_to_ptr.vmem [resolvable:$true] %s1617_s7 }
 0x1bb   :  { %v1664_v0 = vpack.c.bf16 %v4729_v2, %v4716_v40  ;;  %v1680_v21 = vpack.c.bf16 %v4883_v63, %v4874_v39  ;;  %v1661_v1 = vpack.c.bf16 %v4692_v17, %v4679_v44  ;;  %v1677_v6 = vpack.c.bf16 %v4858_v62, %v4849_v26  ;;  %v5296_v62 = vld [vmem:[#allocation34_spill] sm:$0xff]  ;;  %v5297_v17 = vld [vmem:[#allocation47_spill] sm:$0xff]  ;;  %v5298_v2 = vld [vmem:[#allocation48_spill] sm:$0xff]  ;;  %1620 = dma.hbm_to_vmem [thread:$0]  %s1616_s5, 4096, %s1618_s7, [#allocation4 + $0x1] }
 0x1bc   :  { %v1662_v32 = vpack.c.bf16 %v4703_v46, %v4690_v14  ;;  %v1678_v60 = vpack.c.bf16 %v4865_v50, %v4856_v55  ;;  %v1659_v40 = vpack.c.bf16 %v4666_v7, %v4653_v35  ;;  %v1675_v25 = vpack.c.bf16 %v4840_v27, %v4831_v23  ;;  %v5299_v14 = vld [vmem:[#allocation30_spill] sm:$0xff]  ;;  %v5300_v46 = vld [vmem:[#allocation32_spill] sm:$0xff]  ;;  %v5302_v39 = vld [vmem:[#allocation45_spill] sm:$0xff] }
 0x1bd   :  { %1846 = vmatpush.bf16.msrb.mxu0 %v1665_v53  ;;  %1935 = vmatpush.bf16.msrb.mxu1 %v1681_v58  ;;  %v1660_v44 = vpack.c.bf16 %v5296_v62, %v4664_v4  ;;  %v1676_v11 = vpack.c.bf16 %v5298_v2, %v5297_v17  ;;  %v1657_v24 = vpack.c.bf16 %v5300_v46, %v5299_v14  ;;  %v5303_v35 = vld [vmem:[#allocation31_spill] sm:$0xff]  ;;  %v5304_v27 = vld [vmem:[#allocation33_spill] sm:$0xff]  ;;  %v5305_v23 = vld [vmem:[#allocation44_spill] sm:$0xff] }
 0x1be   :  { %2024 = vmatpush.bf16.msrb.mxu2 %v1666_v3  ;;  %2113 = vmatpush.bf16.msrb.mxu3 %v1682_v37  ;;  %v1673_v55 = vpack.c.bf16 %v5302_v39, %v5301_v8  ;;  %v1658_v7 = vpack.c.bf16 %v5304_v27, %v5303_v35  ;;  %v1674_v26 = vpack.c.bf16 %v5306_v5, %v5305_v23  ;;  %v5307_v4 = vld [vmem:[#allocation26_spill] sm:$0xff]  ;;  %v5308_v50 = vld [vmem:[#allocation28_spill] sm:$0xff]  ;;  %v5309_v63 = vld [vmem:[#allocation39_spill] sm:$0xff] }
 0x1bf   :  { %v1655_v20 = vpack.c.bf16 %v5308_v50, %v5307_v4  ;;  %v1671_v41 = vpack.c.bf16 %v5310_v31, %v5309_v63  ;;  %v5312_v15 = vld [vmem:[#allocation29_spill] sm:$0xff]  ;;  %v5314_v56 = vld [vmem:[#allocation42_spill] sm:$0xff]  ;;  %v5316_v33 = vld [vmem:[#allocation24_spill] sm:$0xff] }
 0x1c0   :  { %v1656_v38 = vpack.c.bf16 %v5312_v15, %v5311_v57  ;;  %v1672_v34 = vpack.c.bf16 %v5314_v56, %v5313_v43  ;;  %v4002_v28 = vld [vmem:[#allocation2] sm:$0xf]  ;;  %v5317_v12 = vld [vmem:[#allocation35_spill] sm:$0xff]  ;;  %v5318_v36 = vld [vmem:[#allocation37_spill] sm:$0xff] }
 0x1c1   :  { %1847 = vmatpush.bf16.msrb.mxu0 %v1663_v45  ;;  %1936 = vmatpush.bf16.msrb.mxu1 %v1679_v48  ;;  %v5315_v13 = vld [vmem:[#allocation22_spill] sm:$0xff]  ;;  %v1669_v9 = vpack.c.bf16 %v5318_v36, %v5317_v12  ;;  %v4323_v30 = vld [vmem:[#allocation2 + $0x4] sm:$0xf0]  ;;  %v4004_v59 = vld [vmem:[#allocation2 + $0x8] sm:$0xf0] }
 0x1c2   :  { %2025 = vmatpush.bf16.msrb.mxu2 %v1664_v0  ;;  %2114 = vmatpush.bf16.msrb.mxu3 %v1680_v21  ;;  %v1653_v52 = vpack.c.bf16 %v5316_v33, %v5315_v13  ;;  %v4322_v61 = vld [vmem:[#allocation2 + $0x4] sm:$0xf]  ;;  %v5319_v19 = vld [vmem:[#allocation23_spill] sm:$0xff]  ;;  %v5320_v18 = vld [vmem:[#allocation25_spill] sm:$0xff]  ;;  %v4003_v42 = vor.u32 %v4323_v30, %v4002_v28 }
 0x1c3   :  { %v1654_v54 = vpack.c.bf16 %v5320_v18, %v5319_v19  ;;  %v5321_v47 = vld [vmem:[#allocation36_spill] sm:$0xff]  ;;  %v5322_v10 = vld [vmem:[#allocation38_spill] sm:$0xff]  ;;  %v4007_v29 = vor.u32 %v4322_v61, %v4004_v59  ;;  %v4325_v16 = vld [vmem:[#allocation2 + $0x14] sm:$0xf0] }
 0x1c4   :  { %v1670_v51 = vpack.c.bf16 %v5322_v10, %v5321_v47  ;;  %v4010_v22 = vld [vmem:[#allocation2 + $0x10] sm:$0xf]  ;;  %v4324_v49 = vld [vmem:[#allocation2 + $0x14] sm:$0xf]  ;;  %v4012_v53 = vld [vmem:[#allocation2 + $0x18] sm:$0xf0] }
 0x1c5   :  { %1848 = vmatpush.bf16.msrb.mxu0 %v1661_v1  ;;  %1937 = vmatpush.bf16.msrb.mxu1 %v1677_v6  ;;  %v4011_v58 = vor.u32 %v4325_v16, %v4010_v22  ;;  %v4015_v3 = vor.u32 %v4324_v49, %v4012_v53  ;;  %v4018_v37 = vld [vmem:[#allocation2 + $0x20] sm:$0xf]  ;;  %v4327_v45 = vld [vmem:[#allocation2 + $0x24] sm:$0xf0]  ;;  %v4326_v48 = vld [vmem:[#allocation2 + $0x24] sm:$0xf] }
 0x1c6   :  { %2026 = vmatpush.bf16.msrb.mxu2 %v1662_v32  ;;  %2115 = vmatpush.bf16.msrb.mxu3 %v1678_v60  ;;  %v4020_v0 = vld [vmem:[#allocation2 + $0x28] sm:$0xf0]  ;;  %v4019_v21 = vor.u32 %v4327_v45, %v4018_v37  ;;  %v4026_v6 = vld [vmem:[#allocation2 + $0x30] sm:$0xf]  ;;  %v4329_v32 = vld [vmem:[#allocation2 + $0x34] sm:$0xf0] }
 0x1c7   :  { %v4023_v1 = vor.u32 %v4326_v48, %v4020_v0  ;;  %v4328_v60 = vld [vmem:[#allocation2 + $0x34] sm:$0xf]  ;;  %v4331_v17 = vld [vmem:[#allocation2 + $0x44] sm:$0xf0]  ;;  %v4330_v2 = vld [vmem:[#allocation2 + $0x44] sm:$0xf] }
 0x1c8   :  { %v4333_v8 = vld [vmem:[#allocation2 + $0x54] sm:$0xf0]  ;;  %v4332_v39 = vld [vmem:[#allocation2 + $0x54] sm:$0xf]  ;;  %v4335_v23 = vld [vmem:[#allocation2 + $0x64] sm:$0xf0] }
 0x1c9   :  { %1849 = vmatpush.bf16.msrb.mxu0 %v1659_v40  ;;  %1938 = vmatpush.bf16.msrb.mxu1 %v1675_v25  ;;  %v4028_v40 = vld [vmem:[#allocation2 + $0x38] sm:$0xf0]  ;;  %v4027_v25 = vor.u32 %v4329_v32, %v4026_v6  ;;  %v4334_v5 = vld [vmem:[#allocation2 + $0x64] sm:$0xf]  ;;  %v4337_v63 = vld [vmem:[#allocation2 + $0x74] sm:$0xf0] }
 0x1ca   :  { %2027 = vmatpush.bf16.msrb.mxu2 %v1660_v44  ;;  %2116 = vmatpush.bf16.msrb.mxu3 %v1676_v11  ;;  %v4031_v62 = vor.u32 %v4328_v60, %v4028_v40  ;;  %v4034_v44 = vld [vmem:[#allocation2 + $0x40] sm:$0xf]  ;;  %v4036_v11 = vld [vmem:[#allocation2 + $0x48] sm:$0xf0]  ;;  %v4336_v31 = vld [vmem:[#allocation2 + $0x74] sm:$0xf] }
 0x1cb   :  { %v4035_v14 = vor.u32 %v4331_v17, %v4034_v44  ;;  %v4039_v46 = vor.u32 %v4330_v2, %v4036_v11  ;;  %v4339_v43 = vld [vmem:[#allocation2 + $0x84] sm:$0xf0]  ;;  %v4338_v56 = vld [vmem:[#allocation2 + $0x84] sm:$0xf]  ;;  %v4341_v45 = vld [vmem:[#allocation2 + $0x94] sm:$0xf0] }
 0x1cc   :  { %v1621_v28 = vld [vmem:[#allocation2] sm:$0xff]  ;;  %v1622_v19 = vld [vmem:[#allocation2 + $0x8] sm:$0xff]  ;;  %v4340_v48 = vld [vmem:[#allocation2 + $0x94] sm:$0xf] }
 0x1cd   :  { %1850 = vmatpush.bf16.msrb.mxu0 %v1657_v24  ;;  %1939 = vmatpush.bf16.msrb.mxu1 %v1673_v55  ;;  %v4042_v24 = vld [vmem:[#allocation2 + $0x50] sm:$0xf]  ;;  %v4044_v55 = vld [vmem:[#allocation2 + $0x58] sm:$0xf0]  ;;  %v2393_v59 = vld [vmem:[#allocation10] sm:$0xff]  ;;  %v2203_v49 = vunpack.c.l.bf16 %v1622_v19 }
 0x1ce   :  { %2028 = vmatpush.bf16.msrb.mxu2 %v1658_v7  ;;  %2117 = vmatpush.bf16.msrb.mxu3 %v1674_v26  ;;  %v4043_v35 = vor.u32 %v4333_v8, %v4042_v24  ;;  %v4047_v27 = vor.u32 %v4332_v39, %v4044_v55  ;;  %v4050_v7 = vld [vmem:[#allocation2 + $0x60] sm:$0xf]  ;;  %v4052_v26 = vld [vmem:[#allocation2 + $0x68] sm:$0xf0]  ;;  %v4076_v0 = vld [vmem:[#allocation2 + $0x98] sm:$0xf0] }
 0x1cf   :  { %v4051_v4 = vor.u32 %v4335_v23, %v4050_v7  ;;  %v4055_v50 = vor.u32 %v4334_v5, %v4052_v26  ;;  %v2395_v32 = vld [vmem:[#allocation10 + $0x10] sm:$0xff]  ;;  %v4079_v17 = vor.u32 %v4340_v48, %v4076_v0  ;;  %v2396_v23 = vld [vmem:[#allocation10 + $0x18] sm:$0xff] }
 0x1d0   :  { %v1623_v60 = vld [vmem:[#allocation2 + $0x10] sm:$0xff] }
 0x1d1   :  { %1851 = vmatpush.bf16.msrb.mxu0 %v1655_v20  ;;  %1940 = vmatpush.bf16.msrb.mxu1 %v1671_v41  ;;  %v4058_v20 = vld [vmem:[#allocation2 + $0x70] sm:$0xf]  ;;  %v4060_v41 = vld [vmem:[#allocation2 + $0x78] sm:$0xf0]  ;;  %v2205_v55 = vunpack.c.l.bf16 %v1623_v60 }
 0x1d2   :  { %2029 = vmatpush.bf16.msrb.mxu2 %v1656_v38  ;;  %2118 = vmatpush.bf16.msrb.mxu3 %v1672_v34  ;;  %v4059_v57 = vor.u32 %v4337_v63, %v4058_v20  ;;  %v4063_v15 = vor.u32 %v4336_v31, %v4060_v41  ;;  %v4066_v38 = vld [vmem:[#allocation2 + $0x80] sm:$0xf]  ;;  %v4068_v34 = vld [vmem:[#allocation2 + $0x88] sm:$0xf0] }
 0x1d3   :  { %v4067_v13 = vor.u32 %v4339_v43, %v4066_v38  ;;  %v4071_v33 = vor.u32 %v4338_v56, %v4068_v34 }
 0x1d5   :  { %1852 = vmatpush.bf16.msrb.mxu0 %v1653_v52  ;;  %1941 = vmatpush.bf16.msrb.mxu1 %v1669_v9  ;;  %v2201_v9 = vunpack.c.l.bf16 %v1621_v28 }
 0x1d6   :  { %2030 = vmatpush.bf16.msrb.mxu2 %v1654_v54  ;;  %2119 = vmatpush.bf16.msrb.mxu3 %v1670_v51  ;;  %v2202_v51 = vunpack.c.h.bf16 %v1621_v28 }
 0x1d8   :  { %1853 = vmatmul.bf16.vlgmr.msrb.gmra.mxu0 %v4003_v42  ;;  %1942 = vmatmul.bf16.vlgmr.msrb.gmra.mxu1 %v4007_v29 }
 0x1d9   :  { %2031 = vmatmul.bf16.vlgmr.msrb.gmra.mxu2 %v4003_v42  ;;  %2120 = vmatmul.bf16.vlgmr.msrb.gmra.mxu3 %v4007_v29 }
 0x1e8   :  { %1858 = vmatmul.bf16.gmra.mxu0 %v4011_v58  ;;  %1947 = vmatmul.bf16.gmra.mxu1 %v4015_v3 }
 0x1e9   :  { %2036 = vmatmul.bf16.gmra.mxu2 %v4011_v58  ;;  %2125 = vmatmul.bf16.gmra.mxu3 %v4015_v3  ;;  %v4074_v3 = vld [vmem:[#allocation2 + $0x90] sm:$0xf] }
 0x1ea   :  { %v4075_v44 = vor.u32 %v4341_v45, %v4074_v3 }
 0x1f8   :  { %1863 = vmatmul.bf16.gmra.mxu0 %v4019_v21  ;;  %1952 = vmatmul.bf16.gmra.mxu1 %v4023_v1 }
 0x1f9   :  { %2041 = vmatmul.bf16.gmra.mxu2 %v4019_v21  ;;  %2130 = vmatmul.bf16.gmra.mxu3 %v4023_v1  ;;  %v2394_v21 = vld [vmem:[#allocation10 + $0x8] sm:$0xff] }
 0x208   :  { %1868 = vmatmul.bf16.gmra.mxu0 %v4027_v25  ;;  %1957 = vmatmul.bf16.gmra.mxu1 %v4031_v62 }
 0x209   :  { %2046 = vmatmul.bf16.gmra.mxu2 %v4027_v25  ;;  %2135 = vmatmul.bf16.gmra.mxu3 %v4031_v62 }
 0x218   :  { %1873 = vmatmul.bf16.gmra.mxu0 %v4035_v14  ;;  %1962 = vmatmul.bf16.gmra.mxu1 %v4039_v46 }
 0x219   :  { %2051 = vmatmul.bf16.gmra.mxu2 %v4035_v14  ;;  %2140 = vmatmul.bf16.gmra.mxu3 %v4039_v46  ;;  %v2204_v14 = vunpack.c.h.bf16 %v1622_v19 }
 0x228   :  { %1878 = vmatmul.bf16.gmra.mxu0 %v4043_v35  ;;  %1967 = vmatmul.bf16.gmra.mxu1 %v4047_v27 }
 0x229   :  { %2056 = vmatmul.bf16.gmra.mxu2 %v4043_v35  ;;  %2145 = vmatmul.bf16.gmra.mxu3 %v4047_v27 }
 0x238   :  { %1883 = vmatmul.bf16.gmra.mxu0 %v4051_v4  ;;  %1972 = vmatmul.bf16.gmra.mxu1 %v4055_v50 }
 0x239   :  { %2061 = vmatmul.bf16.gmra.mxu2 %v4051_v4  ;;  %2150 = vmatmul.bf16.gmra.mxu3 %v4055_v50  ;;  %v2397_v4 = vld [vmem:[#allocation10 + $0x20] sm:$0xff]  ;;  %v1624_v50 = vld [vmem:[#allocation2 + $0x18] sm:$0xff] }
 0x23a   :  { %v2207_v28 = vunpack.c.l.bf16 %v1624_v50 }
 0x248   :  { %1888 = vmatmul.bf16.gmra.mxu0 %v4059_v57  ;;  %1977 = vmatmul.bf16.gmra.mxu1 %v4063_v15 }
 0x249   :  { %2066 = vmatmul.bf16.gmra.mxu2 %v4059_v57  ;;  %2155 = vmatmul.bf16.gmra.mxu3 %v4063_v15  ;;  %v2206_v15 = vunpack.c.h.bf16 %v1623_v60  ;;  %v2400_v60 = vld [vmem:[#allocation10 + $0x38] sm:$0xff] }
 0x255   :  { %v1854_v52 = vpop.f32.mrf.mxu0  ;;  %v1943_v12 = vpop.f32.mrf.mxu1 }
 0x256   :  { %v1944_v36 = vadd.f32 %v1943_v12, %v1854_v52  ;;  %v4082_v52 = vld [vmem:[#allocation2 + $0xa0] sm:$0xf] }
 0x258   :  { %v2265_v30 = vmul.f32 0.005, %v1944_v36  ;;  %1893 = vmatmul.bf16.gmra.mxu0 %v4067_v13  ;;  %1982 = vmatmul.bf16.gmra.mxu1 %v4071_v33  ;;  %v4343_v36 = vld [vmem:[#allocation2 + $0xa4] sm:$0xf0] }
 0x259   :  { %2071 = vmatmul.bf16.gmra.mxu2 %v4067_v13  ;;  %2160 = vmatmul.bf16.gmra.mxu3 %v4071_v33 }
 0x25a   :  { %v4969_v61 = vadd.f32 %v2265_v30, %v2201_v9  ;;  %v4342_v9 = vld [vmem:[#allocation2 + $0xa4] sm:$0xf]  ;;  %v4084_v30 = vld [vmem:[#allocation2 + $0xa8] sm:$0xf0] }
 0x25c   :  { %5323 = vst [vmem:[#allocation34_spill] sm:$0xff] %v4969_v61  ;;  %v2457_v18 = vmul.f32 0.0033333334, %v4969_v61  ;;  %v2032_v54 = vpop.f32.mrf.mxu2  ;;  %v2121_v47 = vpop.f32.mrf.mxu3  ;;  %v2443_v61 = vld [vmem:[#allocation10 + $0x190] sm:$0xff] }
 0x25d   :  { %v2122_v10 = vadd.f32 %v2121_v47, %v2032_v54  ;;  %v1856_v42 = vpop.f32.mrf.mxu0  ;;  %v1945_v29 = vpop.f32.mrf.mxu1  ;;  %v2399_v54 = vld [vmem:[#allocation10 + $0x30] sm:$0xff]  ;;  %v1625_v47 = vld [vmem:[#allocation2 + $0x20] sm:$0xff] }
 0x25e   :  { %v2521_v22 = vadd.f32 %v2457_v18, %v2393_v59  ;;  %v1946_v16 = vadd.f32 %v1945_v29, %v1856_v42  ;;  %v2398_v59 = vld [vmem:[#allocation10 + $0x28] sm:$0xff]  ;;  %v4083_v29 = vor.u32 %v4343_v36, %v4082_v52  ;;  %v2209_v0 = vunpack.c.l.bf16 %v1625_v47 }
 0x25f   :  { %v2266_v53 = vmul.f32 0.005, %v2122_v10 }
 0x260   :  { %2585 = vst [vmem:[#allocation10] sm:$0xff] %v2521_v22  ;;  %v2267_v58 = vmul.f32 0.005, %v1946_v16  ;;  %v4087_v22 = vor.u32 %v4342_v9, %v4084_v30 }
 0x261   :  { %v4972_v37 = vadd.f32 %v2266_v53, %v2202_v51  ;;  %v2208_v53 = vunpack.c.h.bf16 %v1624_v50 }
 0x262   :  { %v4974_v1 = vadd.f32 %v2267_v58, %v2203_v49 }
 0x263   :  { %5324 = vst [vmem:[#allocation47_spill] sm:$0xff] %v4972_v37  ;;  %v2458_v6 = vmul.f32 0.0033333334, %v4972_v37  ;;  %v2439_v37 = vld [vmem:[#allocation10 + $0x170] sm:$0xff] }
 0x264   :  { %5325 = vst [vmem:[#allocation48_spill] sm:$0xff] %v4974_v1  ;;  %v2459_v40 = vmul.f32 0.0033333334, %v4974_v1  ;;  %v2034_v25 = vpop.f32.mrf.mxu2  ;;  %v2123_v62 = vpop.f32.mrf.mxu3 }
 0x265   :  { %v2522_v2 = vadd.f32 %v2458_v6, %v2394_v21  ;;  %v2124_v11 = vadd.f32 %v2123_v62, %v2034_v25  ;;  %v1859_v46 = vpop.f32.mrf.mxu0  ;;  %v1948_v24 = vpop.f32.mrf.mxu1  ;;  %v2401_v62 = vld [vmem:[#allocation10 + $0x40] sm:$0xff] }
 0x266   :  { %v2523_v8 = vadd.f32 %v2459_v40, %v2395_v32  ;;  %v1949_v39 = vadd.f32 %v1948_v24, %v1859_v46  ;;  %v2210_v24 = vunpack.c.h.bf16 %v1625_v47 }
 0x267   :  { %2586 = vst [vmem:[#allocation10 + $0x8] sm:$0xff] %v2522_v2  ;;  %v2268_v35 = vmul.f32 0.005, %v2124_v11 }
 0x268   :  { %2587 = vst [vmem:[#allocation10 + $0x10] sm:$0xff] %v2523_v8  ;;  %v2269_v27 = vmul.f32 0.005, %v1949_v39  ;;  %1898 = vmatmul.bf16.gmra.mxu0 %v4075_v44  ;;  %1987 = vmatmul.bf16.gmra.mxu1 %v4079_v17 }
 0x269   :  { %v4978_v7 = vadd.f32 %v2268_v35, %v2204_v14  ;;  %2076 = vmatmul.bf16.gmra.mxu2 %v4075_v44  ;;  %2165 = vmatmul.bf16.gmra.mxu3 %v4079_v17  ;;  %v1626_v44 = vld [vmem:[#allocation2 + $0x28] sm:$0xff] }
 0x26a   :  { %v4980_v5 = vadd.f32 %v2269_v27, %v2205_v55  ;;  %v2211_v27 = vunpack.c.l.bf16 %v1626_v44  ;;  %v2212_v9 = vunpack.c.h.bf16 %v1626_v44 }
 0x26b   :  { %5326 = vst [vmem:[#allocation30_spill] sm:$0xff] %v4978_v7  ;;  %v2460_v26 = vmul.f32 0.0033333334, %v4978_v7 }
 0x26c   :  { %5327 = vst [vmem:[#allocation32_spill] sm:$0xff] %v4980_v5  ;;  %v2461_v20 = vmul.f32 0.0033333334, %v4980_v5  ;;  %v2037_v63 = vpop.f32.mrf.mxu2  ;;  %v2126_v31 = vpop.f32.mrf.mxu3  ;;  %v2451_v5 = vld [vmem:[#allocation10 + $0x1d0] sm:$0xff] }
 0x26d   :  { %v2524_v41 = vadd.f32 %v2460_v26, %v2396_v23  ;;  %v2127_v57 = vadd.f32 %v2126_v31, %v2037_v63  ;;  %v1861_v38 = vpop.f32.mrf.mxu0  ;;  %v1950_v43 = vpop.f32.mrf.mxu1  ;;  %v4344_v63 = vld [vmem:[#allocation2 + $0xb4] sm:$0xf]  ;;  %v4092_v31 = vld [vmem:[#allocation2 + $0xb8] sm:$0xf0] }
 0x26e   :  { %v2525_v56 = vadd.f32 %v2461_v20, %v2397_v4  ;;  %v1951_v34 = vadd.f32 %v1950_v43, %v1861_v38  ;;  %v4090_v4 = vld [vmem:[#allocation2 + $0xb0] sm:$0xf]  ;;  %v4345_v20 = vld [vmem:[#allocation2 + $0xb4] sm:$0xf0] }
 0x26f   :  { %2588 = vst [vmem:[#allocation10 + $0x18] sm:$0xff] %v2524_v41  ;;  %v2270_v13 = vmul.f32 0.005, %v2127_v57  ;;  %v2402_v41 = vld [vmem:[#allocation10 + $0x48] sm:$0xff]  ;;  %v2403_v38 = vld [vmem:[#allocation10 + $0x50] sm:$0xff] }
 0x270   :  { %2589 = vst [vmem:[#allocation10 + $0x20] sm:$0xff] %v2525_v56  ;;  %v2271_v33 = vmul.f32 0.005, %v1951_v34  ;;  %v1627_v43 = vld [vmem:[#allocation2 + $0x30] sm:$0xff] }
 0x271   :  { %v4984_v12 = vadd.f32 %v2270_v13, %v2206_v15  ;;  %v4091_v13 = vor.u32 %v4345_v20, %v4090_v4  ;;  %v2213_v47 = vunpack.c.l.bf16 %v1627_v43 }
 0x272   :  { %v4986_v19 = vadd.f32 %v2271_v33, %v2207_v28  ;;  %v4095_v33 = vor.u32 %v4344_v63, %v4092_v31 }
 0x273   :  { %5328 = vst [vmem:[#allocation43_spill] sm:$0xff] %v4984_v12  ;;  %v2462_v18 = vmul.f32 0.0033333334, %v4984_v12  ;;  %v2447_v12 = vld [vmem:[#allocation10 + $0x1b0] sm:$0xff] }
 0x274   :  { %5329 = vst [vmem:[#allocation45_spill] sm:$0xff] %v4986_v19  ;;  %v2463_v10 = vmul.f32 0.0033333334, %v4986_v19  ;;  %v2039_v51 = vpop.f32.mrf.mxu2  ;;  %v2128_v42 = vpop.f32.mrf.mxu3 }
 0x275   :  { %v2526_v16 = vadd.f32 %v2462_v18, %v2398_v59  ;;  %v2129_v49 = vadd.f32 %v2128_v42, %v2039_v51  ;;  %v1864_v58 = vpop.f32.mrf.mxu0  ;;  %v1953_v3 = vpop.f32.mrf.mxu1 }
 0x276   :  { %v2527_v45 = vadd.f32 %v2463_v10, %v2399_v54  ;;  %v1954_v48 = vadd.f32 %v1953_v3, %v1864_v58 }
 0x277   :  { %2590 = vst [vmem:[#allocation10 + $0x28] sm:$0xff] %v2526_v16  ;;  %v2272_v21 = vmul.f32 0.005, %v2129_v49  ;;  %v2405_v49 = vld [vmem:[#allocation10 + $0x60] sm:$0xff] }
 0x278   :  { %2591 = vst [vmem:[#allocation10 + $0x30] sm:$0xff] %v2527_v45  ;;  %v2273_v6 = vmul.f32 0.005, %v1954_v48  ;;  %1903 = vmatmul.bf16.gmra.mxu0 %v4083_v29  ;;  %1992 = vmatmul.bf16.gmra.mxu1 %v4087_v22 }
 0x279   :  { %v4990_v32 = vadd.f32 %v2272_v21, %v2208_v53  ;;  %2081 = vmatmul.bf16.gmra.mxu2 %v4083_v29  ;;  %2170 = vmatmul.bf16.gmra.mxu3 %v4087_v22  ;;  %v2404_v29 = vld [vmem:[#allocation10 + $0x58] sm:$0xff]  ;;  %v2214_v21 = vunpack.c.h.bf16 %v1627_v43 }
 0x27a   :  { %v4992_v40 = vadd.f32 %v2273_v6, %v2209_v0  ;;  %v1628_v53 = vld [vmem:[#allocation2 + $0x38] sm:$0xff] }
 0x27b   :  { %5330 = vst [vmem:[#allocation31_spill] sm:$0xff] %v4990_v32  ;;  %v2464_v25 = vmul.f32 0.0033333334, %v4990_v32  ;;  %v2215_v44 = vunpack.c.l.bf16 %v1628_v53 }
 0x27c   :  { %v2465_v17 = vmul.f32 0.0033333334, %v4992_v40  ;;  %v2042_v2 = vpop.f32.mrf.mxu2  ;;  %v2131_v11 = vpop.f32.mrf.mxu3 }
 0x27d   :  { %v2528_v14 = vadd.f32 %v2464_v25, %v2400_v60  ;;  %v2132_v46 = vadd.f32 %v2131_v11, %v2042_v2  ;;  %v1866_v8 = vpop.f32.mrf.mxu0  ;;  %v1955_v39 = vpop.f32.mrf.mxu1  ;;  %v4098_v11 = vld [vmem:[#allocation2 + $0xc0] sm:$0xf] }
 0x27e   :  { %v2529_v55 = vadd.f32 %v2465_v17, %v2401_v62  ;;  %v1956_v35 = vadd.f32 %v1955_v39, %v1866_v8  ;;  %v4100_v8 = vld [vmem:[#allocation2 + $0xc8] sm:$0xf0] }
 0x27f   :  { %2592 = vst [vmem:[#allocation10 + $0x38] sm:$0xff] %v2528_v14  ;;  %v2274_v23 = vmul.f32 0.005, %v2132_v46  ;;  %v4347_v46 = vld [vmem:[#allocation2 + $0xc4] sm:$0xf0] }
 0x280   :  { %2593 = vst [vmem:[#allocation10 + $0x40] sm:$0xff] %v2529_v55  ;;  %v2275_v26 = vmul.f32 0.005, %v1956_v35  ;;  %v2406_v39 = vld [vmem:[#allocation10 + $0x68] sm:$0xff]  ;;  %v4099_v63 = vor.u32 %v4347_v46, %v4098_v11  ;;  %v2411_v46 = vld [vmem:[#allocation10 + $0x90] sm:$0xff] }
 0x281   :  { %v4996_v50 = vadd.f32 %v2274_v23, %v2210_v24  ;;  %v4346_v24 = vld [vmem:[#allocation2 + $0xc4] sm:$0xf] }
 0x282   :  { %v4998_v57 = vadd.f32 %v2275_v26, %v2211_v27  ;;  %v2407_v27 = vld [vmem:[#allocation10 + $0x70] sm:$0xff]  ;;  %v1629_v23 = vld [vmem:[#allocation2 + $0x40] sm:$0xff]  ;;  %v4103_v31 = vor.u32 %v4346_v24, %v4100_v8 }
 0x283   :  { %5331 = vst [vmem:[#allocation33_spill] sm:$0xff] %v4996_v50  ;;  %v2466_v15 = vmul.f32 0.0033333334, %v4996_v50  ;;  %v1631_v24 = vld [vmem:[#allocation2 + $0x50] sm:$0xff] }
 0x284   :  { %5332 = vst [vmem:[#allocation44_spill] sm:$0xff] %v4998_v57  ;;  %v2467_v56 = vmul.f32 0.0033333334, %v4998_v57  ;;  %v2044_v34 = vpop.f32.mrf.mxu2  ;;  %v2133_v28 = vpop.f32.mrf.mxu3 }
 0x285   :  { %v2530_v52 = vadd.f32 %v2466_v15, %v2402_v41  ;;  %v2134_v36 = vadd.f32 %v2133_v28, %v2044_v34  ;;  %v1869_v30 = vpop.f32.mrf.mxu0  ;;  %v1958_v59 = vpop.f32.mrf.mxu1 }
 0x286   :  { %v2531_v18 = vadd.f32 %v2467_v56, %v2403_v38  ;;  %v1959_v54 = vadd.f32 %v1958_v59, %v1869_v30  ;;  %v2216_v38 = vunpack.c.h.bf16 %v1628_v53 }
 0x287   :  { %2594 = vst [vmem:[#allocation10 + $0x48] sm:$0xff] %v2530_v52  ;;  %v2276_v10 = vmul.f32 0.005, %v2134_v36 }
 0x288   :  { %2595 = vst [vmem:[#allocation10 + $0x50] sm:$0xff] %v2531_v18  ;;  %v2277_v51 = vmul.f32 0.005, %v1959_v54  ;;  %1908 = vmatmul.bf16.gmra.mxu0 %v4091_v13  ;;  %1997 = vmatmul.bf16.gmra.mxu1 %v4095_v33  ;;  %v2409_v18 = vld [vmem:[#allocation10 + $0x80] sm:$0xff]  ;;  %v1630_v54 = vld [vmem:[#allocation2 + $0x48] sm:$0xff] }
 0x289   :  { %v5002_v42 = vadd.f32 %v2276_v10, %v2212_v9  ;;  %2086 = vmatmul.bf16.gmra.mxu2 %v4091_v13  ;;  %2175 = vmatmul.bf16.gmra.mxu3 %v4095_v33  ;;  %v2217_v13 = vunpack.c.l.bf16 %v1629_v23  ;;  %v2408_v9 = vld [vmem:[#allocation10 + $0x78] sm:$0xff] }
 0x28a   :  { %v5004_v22 = vadd.f32 %v2277_v51, %v2213_v47 }
 0x28b   :  { %5333 = vst [vmem:[#allocation46_spill] sm:$0xff] %v5002_v42  ;;  %v2468_v16 = vmul.f32 0.0033333334, %v5002_v42  ;;  %v1652_v42 = vld [vmem:[#allocation2 + $0xf8] sm:$0xff] }
 0x28c   :  { %v2469_v58 = vmul.f32 0.0033333334, %v5004_v22  ;;  %v2047_v3 = vpop.f32.mrf.mxu2  ;;  %v2136_v45 = vpop.f32.mrf.mxu3 }
 0x28d   :  { %v2532_v48 = vadd.f32 %v2468_v16, %v2404_v29  ;;  %v2137_v0 = vadd.f32 %v2136_v45, %v2047_v3  ;;  %v1871_v6 = vpop.f32.mrf.mxu0  ;;  %v1960_v60 = vpop.f32.mrf.mxu1 }
 0x28e   :  { %v2533_v25 = vadd.f32 %v2469_v58, %v2405_v49  ;;  %v1961_v62 = vadd.f32 %v1960_v60, %v1871_v6  ;;  %v2218_v49 = vunpack.c.h.bf16 %v1629_v23  ;;  %v4106_v6 = vld [vmem:[#allocation2 + $0xd0] sm:$0xf] }
 0x28f   :  { %2596 = vst [vmem:[#allocation10 + $0x58] sm:$0xff] %v2532_v48  ;;  %v2278_v17 = vmul.f32 0.005, %v2137_v0  ;;  %v2219_v48 = vunpack.c.l.bf16 %v1630_v54 }
 0x290   :  { %2597 = vst [vmem:[#allocation10 + $0x60] sm:$0xff] %v2533_v25  ;;  %v2279_v2 = vmul.f32 0.005, %v1961_v62  ;;  %v4349_v25 = vld [vmem:[#allocation2 + $0xd4] sm:$0xf0] }
 0x291   :  { %v5008_v14 = vadd.f32 %v2278_v17, %v2214_v21  ;;  %v4348_v62 = vld [vmem:[#allocation2 + $0xd4] sm:$0xf]  ;;  %v2410_v17 = vld [vmem:[#allocation10 + $0x88] sm:$0xff] }
 0x292   :  { %v5010_v55 = vadd.f32 %v2279_v2, %v2215_v44  ;;  %v4108_v44 = vld [vmem:[#allocation2 + $0xd8] sm:$0xf0] }
 0x293   :  { %v2470_v35 = vmul.f32 0.0033333334, %v5008_v14  ;;  %v4111_v23 = vor.u32 %v4348_v62, %v4108_v44  ;;  %v2414_v62 = vld [vmem:[#allocation10 + $0xa8] sm:$0xff] }
 0x294   :  { %v2471_v26 = vmul.f32 0.0033333334, %v5010_v55  ;;  %v2049_v4 = vpop.f32.mrf.mxu2  ;;  %v2138_v20 = vpop.f32.mrf.mxu3 }
 0x295   :  { %v2534_v41 = vadd.f32 %v2470_v35, %v2406_v39  ;;  %v2139_v15 = vadd.f32 %v2138_v20, %v2049_v4  ;;  %v1874_v43 = vpop.f32.mrf.mxu0  ;;  %v1963_v56 = vpop.f32.mrf.mxu1  ;;  %v2220_v20 = vunpack.c.h.bf16 %v1630_v54 }
 0x296   :  { %v2535_v34 = vadd.f32 %v2471_v26, %v2407_v27  ;;  %v1964_v28 = vadd.f32 %v1963_v56, %v1874_v43  ;;  %v4107_v27 = vor.u32 %v4349_v25, %v4106_v6  ;;  %v4350_v6 = vld [vmem:[#allocation2 + $0xe4] sm:$0xf]  ;;  %v4116_v25 = vld [vmem:[#allocation2 + $0xe8] sm:$0xf0] }
 0x297   :  { %2598 = vst [vmem:[#allocation10 + $0x68] sm:$0xff] %v2534_v41  ;;  %v2280_v33 = vmul.f32 0.005, %v2139_v15 }
 0x298   :  { %2599 = vst [vmem:[#allocation10 + $0x70] sm:$0xff] %v2535_v34  ;;  %v2281_v52 = vmul.f32 0.005, %v1964_v28  ;;  %1913 = vmatmul.bf16.gmra.mxu0 %v4099_v63  ;;  %2002 = vmatmul.bf16.gmra.mxu1 %v4103_v31  ;;  %v2412_v28 = vld [vmem:[#allocation10 + $0x98] sm:$0xff] }
 0x299   :  { %v5014_v36 = vadd.f32 %v2280_v33, %v2216_v38  ;;  %2091 = vmatmul.bf16.gmra.mxu2 %v4099_v63  ;;  %2180 = vmatmul.bf16.gmra.mxu3 %v4103_v31  ;;  %v2221_v38 = vunpack.c.l.bf16 %v1631_v24 }
 0x29a   :  { %v5016_v30 = vadd.f32 %v2281_v52, %v2217_v13  ;;  %v2413_v52 = vld [vmem:[#allocation10 + $0xa0] sm:$0xff] }
 0x29b   :  { %v2472_v59 = vmul.f32 0.0033333334, %v5014_v36 }
 0x29c   :  { %v2473_v47 = vmul.f32 0.0033333334, %v5016_v30  ;;  %v2052_v10 = vpop.f32.mrf.mxu2  ;;  %v2141_v51 = vpop.f32.mrf.mxu3 }
 0x29d   :  { %v2536_v29 = vadd.f32 %v2472_v59, %v2408_v9  ;;  %v2142_v16 = vadd.f32 %v2141_v51, %v2052_v10  ;;  %v1876_v53 = vpop.f32.mrf.mxu0  ;;  %v1965_v58 = vpop.f32.mrf.mxu1  ;;  %v1632_v9 = vld [vmem:[#allocation2 + $0x58] sm:$0xff]  ;;  %v2222_v51 = vunpack.c.h.bf16 %v1631_v24 }
 0x29e   :  { %v2537_v3 = vadd.f32 %v2473_v47, %v2409_v18  ;;  %v1966_v45 = vadd.f32 %v1965_v58, %v1876_v53  ;;  %v2223_v58 = vunpack.c.l.bf16 %v1632_v9 }
 0x29f   :  { %2600 = vst [vmem:[#allocation10 + $0x78] sm:$0xff] %v2536_v29  ;;  %v2282_v0 = vmul.f32 0.005, %v2142_v16 }
 0x2a0   :  { %2601 = vst [vmem:[#allocation10 + $0x80] sm:$0xff] %v2537_v3  ;;  %v2283_v21 = vmul.f32 0.005, %v1966_v45 }
 0x2a1   :  { %v5020_v60 = vadd.f32 %v2282_v0, %v2218_v49 }
 0x2a2   :  { %v5022_v2 = vadd.f32 %v2283_v21, %v2219_v48  ;;  %v4114_v48 = vld [vmem:[#allocation2 + $0xe0] sm:$0xf]  ;;  %v4351_v21 = vld [vmem:[#allocation2 + $0xe4] sm:$0xf0] }
 0x2a3   :  { %v2474_v11 = vmul.f32 0.0033333334, %v5020_v60 }
 0x2a4   :  { %v2475_v8 = vmul.f32 0.0033333334, %v5022_v2  ;;  %v2054_v39 = vpop.f32.mrf.mxu2  ;;  %v2143_v35 = vpop.f32.mrf.mxu3 }
 0x2a5   :  { %v2538_v26 = vadd.f32 %v2474_v11, %v2410_v17  ;;  %v2144_v4 = vadd.f32 %v2143_v35, %v2054_v39  ;;  %v1879_v63 = vpop.f32.mrf.mxu0  ;;  %v1968_v31 = vpop.f32.mrf.mxu1  ;;  %v2415_v11 = vld [vmem:[#allocation10 + $0xb0] sm:$0xff]  ;;  %v4115_v35 = vor.u32 %v4351_v21, %v4114_v48 }
 0x2a6   :  { %v2539_v41 = vadd.f32 %v2475_v8, %v2411_v46  ;;  %v1969_v15 = vadd.f32 %v1968_v31, %v1879_v63  ;;  %v1633_v46 = vld [vmem:[#allocation2 + $0x60] sm:$0xff]  ;;  %v4122_v21 = vld [vmem:[#allocation2 + $0xf0] sm:$0xf] }
 0x2a7   :  { %2602 = vst [vmem:[#allocation10 + $0x88] sm:$0xff] %v2538_v26  ;;  %v2284_v43 = vmul.f32 0.005, %v2144_v4  ;;  %v2224_v4 = vunpack.c.h.bf16 %v1632_v9  ;;  %v2417_v9 = vld [vmem:[#allocation10 + $0xc0] sm:$0xff] }
 0x2a8   :  { %2603 = vst [vmem:[#allocation10 + $0x90] sm:$0xff] %v2539_v41  ;;  %v2285_v56 = vmul.f32 0.005, %v1969_v15  ;;  %1918 = vmatmul.bf16.gmra.mxu0 %v4107_v27  ;;  %2007 = vmatmul.bf16.gmra.mxu1 %v4111_v23  ;;  %v2225_v15 = vunpack.c.l.bf16 %v1633_v46 }
 0x2a9   :  { %v5026_v34 = vadd.f32 %v2284_v43, %v2220_v20  ;;  %2096 = vmatmul.bf16.gmra.mxu2 %v4107_v27  ;;  %2185 = vmatmul.bf16.gmra.mxu3 %v4111_v23  ;;  %v4119_v27 = vor.u32 %v4350_v6, %v4116_v25  ;;  %v4353_v25 = vld [vmem:[#allocation2 + $0xf4] sm:$0xf0] }
 0x2aa   :  { %v5028_v13 = vadd.f32 %v2285_v56, %v2221_v38 }
 0x2ab   :  { %v2476_v33 = vmul.f32 0.0033333334, %v5026_v34 }
 0x2ac   :  { %v2477_v59 = vmul.f32 0.0033333334, %v5028_v13  ;;  %v2057_v18 = vpop.f32.mrf.mxu2  ;;  %v2146_v54 = vpop.f32.mrf.mxu3 }
 0x2ad   :  { %v2540_v47 = vadd.f32 %v2476_v33, %v2412_v28  ;;  %v2147_v10 = vadd.f32 %v2146_v54, %v2057_v18  ;;  %v1881_v29 = vpop.f32.mrf.mxu0  ;;  %v1970_v16 = vpop.f32.mrf.mxu1  ;;  %v2416_v28 = vld [vmem:[#allocation10 + $0xb8] sm:$0xff] }
 0x2ae   :  { %v2541_v49 = vadd.f32 %v2477_v59, %v2413_v52  ;;  %v1971_v53 = vadd.f32 %v1970_v16, %v1881_v29  ;;  %v1634_v59 = vld [vmem:[#allocation2 + $0x68] sm:$0xff]  ;;  %v2226_v29 = vunpack.c.h.bf16 %v1633_v46 }
 0x2af   :  { %2604 = vst [vmem:[#allocation10 + $0x98] sm:$0xff] %v2540_v47  ;;  %v2286_v3 = vmul.f32 0.005, %v2147_v10 }
 0x2b0   :  { %2605 = vst [vmem:[#allocation10 + $0xa0] sm:$0xff] %v2541_v49  ;;  %v2287_v45 = vmul.f32 0.005, %v1971_v53 }
 0x2b1   :  { %v5032_v0 = vadd.f32 %v2286_v3, %v2222_v51  ;;  %v2227_v3 = vunpack.c.l.bf16 %v1634_v59 }
 0x2b2   :  { %v5034_v44 = vadd.f32 %v2287_v45, %v2223_v58 }
 0x2b3   :  { %v2478_v17 = vmul.f32 0.0033333334, %v5032_v0 }
 0x2b4   :  { %v2479_v24 = vmul.f32 0.0033333334, %v5034_v44  ;;  %v2059_v8 = vpop.f32.mrf.mxu2  ;;  %v2148_v39 = vpop.f32.mrf.mxu3 }
 0x2b5   :  { %v2542_v23 = vadd.f32 %v2478_v17, %v2414_v62  ;;  %v2149_v26 = vadd.f32 %v2148_v39, %v2059_v8  ;;  %v1884_v20 = vpop.f32.mrf.mxu0  ;;  %v1973_v63 = vpop.f32.mrf.mxu1  ;;  %v4352_v62 = vld [vmem:[#allocation2 + $0xf4] sm:$0xf]  ;;  %v4124_v17 = vld [vmem:[#allocation2 + $0xf8] sm:$0xf0] }
 0x2b6   :  { %v2543_v31 = vadd.f32 %v2479_v24, %v2415_v11  ;;  %v1974_v41 = vadd.f32 %v1973_v63, %v1884_v20  ;;  %v2418_v11 = vld [vmem:[#allocation10 + $0xc8] sm:$0xff]  ;;  %v2419_v8 = vld [vmem:[#allocation10 + $0xd0] sm:$0xff] }
 0x2b7   :  { %2606 = vst [vmem:[#allocation10 + $0xa8] sm:$0xff] %v2542_v23  ;;  %v2288_v38 = vmul.f32 0.005, %v2149_v26  ;;  %v1635_v39 = vld [vmem:[#allocation2 + $0x70] sm:$0xff]  ;;  %v4123_v26 = vor.u32 %v4353_v25, %v4122_v21 }
 0x2b8   :  { %2607 = vst [vmem:[#allocation10 + $0xb0] sm:$0xff] %v2543_v31  ;;  %v2289_v43 = vmul.f32 0.005, %v1974_v41  ;;  %1923 = vmatmul.bf16.gmra.mxu0 %v4115_v35  ;;  %2012 = vmatmul.bf16.gmra.mxu1 %v4119_v27  ;;  %v2228_v31 = vunpack.c.h.bf16 %v1634_v59 }
 0x2b9   :  { %v5038_v56 = vadd.f32 %v2288_v38, %v2224_v4  ;;  %2101 = vmatmul.bf16.gmra.mxu2 %v4115_v35  ;;  %2190 = vmatmul.bf16.gmra.mxu3 %v4119_v27  ;;  %v4127_v4 = vor.u32 %v4352_v62, %v4124_v17 }
 0x2ba   :  { %v5040_v33 = vadd.f32 %v2289_v43, %v2225_v15 }
 0x2bb   :  { %v2480_v52 = vmul.f32 0.0033333334, %v5038_v56 }
 0x2bc   :  { %v2481_v18 = vmul.f32 0.0033333334, %v5040_v33  ;;  %v2062_v54 = vpop.f32.mrf.mxu2  ;;  %v2151_v47 = vpop.f32.mrf.mxu3 }
 0x2bd   :  { %v2544_v10 = vadd.f32 %v2480_v52, %v2416_v28  ;;  %v2152_v51 = vadd.f32 %v2151_v47, %v2062_v54  ;;  %v1886_v16 = vpop.f32.mrf.mxu0  ;;  %v1975_v49 = vpop.f32.mrf.mxu1  ;;  %v2229_v28 = vunpack.c.l.bf16 %v1635_v39  ;;  %v2420_v54 = vld [vmem:[#allocation10 + $0xd8] sm:$0xff] }
 0x2be   :  { %v2545_v53 = vadd.f32 %v2481_v18, %v2417_v9  ;;  %v1976_v58 = vadd.f32 %v1975_v49, %v1886_v16 }
 0x2bf   :  { %2608 = vst [vmem:[#allocation10 + $0xb8] sm:$0xff] %v2544_v10  ;;  %v2290_v45 = vmul.f32 0.005, %v2152_v51  ;;  %v2421_v10 = vld [vmem:[#allocation10 + $0xe0] sm:$0xff]  ;;  %v1636_v51 = vld [vmem:[#allocation2 + $0x78] sm:$0xff] }
 0x2c0   :  { %2609 = vst [vmem:[#allocation10 + $0xc0] sm:$0xff] %v2545_v53  ;;  %v2291_v48 = vmul.f32 0.005, %v1976_v58  ;;  %v2231_v62 = vunpack.c.l.bf16 %v1636_v51 }
 0x2c1   :  { %v5044_v6 = vadd.f32 %v2290_v45, %v2226_v29 }
 0x2c2   :  { %v5046_v24 = vadd.f32 %v2291_v48, %v2227_v3  ;;  %v2230_v3 = vunpack.c.h.bf16 %v1635_v39 }
 0x2c3   :  { %v2482_v46 = vmul.f32 0.0033333334, %v5044_v6 }
 0x2c4   :  { %v2483_v35 = vmul.f32 0.0033333334, %v5046_v24  ;;  %v2064_v27 = vpop.f32.mrf.mxu2  ;;  %v2153_v23 = vpop.f32.mrf.mxu3 }
 0x2c5   :  { %v2546_v20 = vadd.f32 %v2482_v46, %v2418_v11  ;;  %v2154_v63 = vadd.f32 %v2153_v23, %v2064_v27  ;;  %v1889_v41 = vpop.f32.mrf.mxu0  ;;  %v1978_v15 = vpop.f32.mrf.mxu1  ;;  %v2423_v23 = vld [vmem:[#allocation10 + $0xf0] sm:$0xff] }
 0x2c6   :  { %v2547_v38 = vadd.f32 %v2483_v35, %v2419_v8  ;;  %v1979_v43 = vadd.f32 %v1978_v15, %v1889_v41  ;;  %v2422_v8 = vld [vmem:[#allocation10 + $0xe8] sm:$0xff]  ;;  %v2232_v41 = vunpack.c.h.bf16 %v1636_v51 }
 0x2c7   :  { %2610 = vst [vmem:[#allocation10 + $0xc8] sm:$0xff] %v2546_v20  ;;  %v2292_v52 = vmul.f32 0.005, %v2154_v63 }
 0x2c8   :  { %2611 = vst [vmem:[#allocation10 + $0xd0] sm:$0xff] %v2547_v38  ;;  %v2293_v9 = vmul.f32 0.005, %v1979_v43  ;;  %1928 = vmatmul.bf16.gmra.mxu0 %v4123_v26  ;;  %2017 = vmatmul.bf16.gmra.mxu1 %v4127_v4 }
 0x2c9   :  { %v5050_v18 = vadd.f32 %v2292_v52, %v2228_v31  ;;  %2106 = vmatmul.bf16.gmra.mxu2 %v4123_v26  ;;  %2195 = vmatmul.bf16.gmra.mxu3 %v4127_v4  ;;  %v1637_v26 = vld [vmem:[#allocation2 + $0x80] sm:$0xff] }
 0x2ca   :  { %v5052_v47 = vadd.f32 %v2293_v9, %v2229_v28  ;;  %v2233_v52 = vunpack.c.l.bf16 %v1637_v26 }
 0x2cb   :  { %v2484_v59 = vmul.f32 0.0033333334, %v5050_v18 }
 0x2cc   :  { %v2485_v29 = vmul.f32 0.0033333334, %v5052_v47  ;;  %v2067_v16 = vpop.f32.mrf.mxu2  ;;  %v2156_v49 = vpop.f32.mrf.mxu3 }
 0x2cd   :  { %v2548_v53 = vadd.f32 %v2484_v59, %v2420_v54  ;;  %v2157_v58 = vadd.f32 %v2156_v49, %v2067_v16  ;;  %v1891_v45 = vpop.f32.mrf.mxu0  ;;  %v1980_v48 = vpop.f32.mrf.mxu1  ;;  %v2425_v49 = vld [vmem:[#allocation10 + $0x100] sm:$0xff] }
 0x2ce   :  { %v2549_v21 = vadd.f32 %v2485_v29, %v2421_v10  ;;  %v1981_v25 = vadd.f32 %v1980_v48, %v1891_v45  ;;  %v2424_v10 = vld [vmem:[#allocation10 + $0xf8] sm:$0xff] }
 0x2cf   :  { %2612 = vst [vmem:[#allocation10 + $0xd8] sm:$0xff] %v2548_v53  ;;  %v2294_v17 = vmul.f32 0.005, %v2157_v58  ;;  %v1638_v53 = vld [vmem:[#allocation2 + $0x88] sm:$0xff] }
 0x2d0   :  { %2613 = vst [vmem:[#allocation10 + $0xe0] sm:$0xff] %v2549_v21  ;;  %v2295_v11 = vmul.f32 0.005, %v1981_v25  ;;  %v2234_v21 = vunpack.c.h.bf16 %v1637_v26  ;;  %v2426_v26 = vld [vmem:[#allocation10 + $0x108] sm:$0xff] }
 0x2d1   :  { %v5056_v46 = vadd.f32 %v2294_v17, %v2230_v3 }
 0x2d2   :  { %v5058_v35 = vadd.f32 %v2295_v11, %v2231_v62 }
 0x2d3   :  { %v2486_v27 = vmul.f32 0.0033333334, %v5056_v46 }
 0x2d4   :  { %v2487_v39 = vmul.f32 0.0033333334, %v5058_v35  ;;  %v2069_v4 = vpop.f32.mrf.mxu2  ;;  %v2158_v20 = vpop.f32.mrf.mxu3 }
 0x2d5   :  { %v2550_v63 = vadd.f32 %v2486_v27, %v2422_v8  ;;  %v2159_v31 = vadd.f32 %v2158_v20, %v2069_v4  ;;  %v1894_v15 = vpop.f32.mrf.mxu0  ;;  %v1983_v38 = vpop.f32.mrf.mxu1  ;;  %v2235_v8 = vunpack.c.l.bf16 %v1638_v53 }
 0x2d6   :  { %v2551_v43 = vadd.f32 %v2487_v39, %v2423_v23  ;;  %v1984_v28 = vadd.f32 %v1983_v38, %v1894_v15 }
 0x2d7   :  { %2614 = vst [vmem:[#allocation10 + $0xe8] sm:$0xff] %v2550_v63  ;;  %v2296_v9 = vmul.f32 0.005, %v2159_v31  ;;  %v2427_v63 = vld [vmem:[#allocation10 + $0x110] sm:$0xff] }
 0x2d8   :  { %2615 = vst [vmem:[#allocation10 + $0xf0] sm:$0xff] %v2551_v43  ;;  %v2297_v54 = vmul.f32 0.005, %v1984_v28  ;;  %v1639_v31 = vld [vmem:[#allocation2 + $0x90] sm:$0xff] }
 0x2d9   :  { %v5062_v59 = vadd.f32 %v2296_v9, %v2232_v41 }
 0x2da   :  { %v5064_v29 = vadd.f32 %v2297_v54, %v2233_v52  ;;  %v2236_v52 = vunpack.c.h.bf16 %v1638_v53 }
 0x2db   :  { %v2488_v16 = vmul.f32 0.0033333334, %v5062_v59 }
 0x2dc   :  { %5334 = vst [vmem:[#allocation26_spill] sm:$0xff] %v5064_v29  ;;  %v2489_v51 = vmul.f32 0.0033333334, %v5064_v29  ;;  %v2072_v58 = vpop.f32.mrf.mxu2  ;;  %v2161_v3 = vpop.f32.mrf.mxu3  ;;  %v2441_v29 = vld [vmem:[#allocation10 + $0x180] sm:$0xff] }
 0x2dd   :  { %v2552_v45 = vadd.f32 %v2488_v16, %v2424_v10  ;;  %v2162_v48 = vadd.f32 %v2161_v3, %v2072_v58  ;;  %v1896_v25 = vpop.f32.mrf.mxu0  ;;  %v1985_v62 = vpop.f32.mrf.mxu1 }
 0x2de   :  { %v2553_v17 = vadd.f32 %v2489_v51, %v2425_v49  ;;  %v1986_v11 = vadd.f32 %v1985_v62, %v1896_v25  ;;  %v2237_v49 = vunpack.c.l.bf16 %v1639_v31  ;;  %v2429_v25 = vld [vmem:[#allocation10 + $0x120] sm:$0xff]  ;;  %v1640_v62 = vld [vmem:[#allocation2 + $0x98] sm:$0xff] }
 0x2df   :  { %2616 = vst [vmem:[#allocation10 + $0xf8] sm:$0xff] %v2552_v45  ;;  %v2298_v27 = vmul.f32 0.005, %v2162_v48  ;;  %v2428_v45 = vld [vmem:[#allocation10 + $0x118] sm:$0xff] }
 0x2e0   :  { %2617 = vst [vmem:[#allocation10 + $0x100] sm:$0xff] %v2553_v17  ;;  %v2299_v23 = vmul.f32 0.005, %v1986_v11 }
 0x2e1   :  { %v5071_v39 = vadd.f32 %v2298_v27, %v2234_v21 }
 0x2e2   :  { %v5073_v4 = vadd.f32 %v2299_v23, %v2235_v8  ;;  %v2238_v23 = vunpack.c.h.bf16 %v1639_v31 }
 0x2e3   :  { %5335 = vst [vmem:[#allocation28_spill] sm:$0xff] %v5071_v39  ;;  %v2490_v20 = vmul.f32 0.0033333334, %v5071_v39  ;;  %v2437_v39 = vld [vmem:[#allocation10 + $0x160] sm:$0xff] }
 0x2e4   :  { %5336 = vst [vmem:[#allocation39_spill] sm:$0xff] %v5073_v4  ;;  %v2491_v41 = vmul.f32 0.0033333334, %v5073_v4  ;;  %v2074_v15 = vpop.f32.mrf.mxu2  ;;  %v2163_v38 = vpop.f32.mrf.mxu3 }
 0x2e5   :  { %v2554_v43 = vadd.f32 %v2490_v20, %v2426_v26  ;;  %v2164_v28 = vadd.f32 %v2163_v38, %v2074_v15  ;;  %v1899_v9 = vpop.f32.mrf.mxu0  ;;  %v1988_v54 = vpop.f32.mrf.mxu1  ;;  %v2239_v15 = vunpack.c.l.bf16 %v1640_v62 }
 0x2e6   :  { %v2555_v10 = vadd.f32 %v2491_v41, %v2427_v63  ;;  %v1989_v16 = vadd.f32 %v1988_v54, %v1899_v9 }
 0x2e7   :  { %2618 = vst [vmem:[#allocation10 + $0x108] sm:$0xff] %v2554_v43  ;;  %v2300_v51 = vmul.f32 0.005, %v2164_v28 }
 0x2e8   :  { %2619 = vst [vmem:[#allocation10 + $0x110] sm:$0xff] %v2555_v10  ;;  %v2301_v58 = vmul.f32 0.005, %v1989_v16  ;;  %v2431_v10 = vld [vmem:[#allocation10 + $0x130] sm:$0xff]  ;;  %v1641_v16 = vld [vmem:[#allocation2 + $0xa0] sm:$0xff] }
 0x2e9   :  { %v5077_v3 = vadd.f32 %v2300_v51, %v2236_v52  ;;  %v2430_v52 = vld [vmem:[#allocation10 + $0x128] sm:$0xff] }
 0x2ea   :  { %v5079_v48 = vadd.f32 %v2301_v58, %v2237_v49 }
 0x2eb   :  { %5337 = vst [vmem:[#allocation41_spill] sm:$0xff] %v5077_v3  ;;  %v2492_v21 = vmul.f32 0.0033333334, %v5077_v3 }
 0x2ec   :  { %5338 = vst [vmem:[#allocation27_spill] sm:$0xff] %v5079_v48  ;;  %v2493_v53 = vmul.f32 0.0033333334, %v5079_v48  ;;  %v2077_v17 = vpop.f32.mrf.mxu2  ;;  %v2166_v11 = vpop.f32.mrf.mxu3  ;;  %v2449_v48 = vld [vmem:[#allocation10 + $0x1c0] sm:$0xff] }
 0x2ed   :  { %v2556_v8 = vadd.f32 %v2492_v21, %v2428_v45  ;;  %v2167_v27 = vadd.f32 %v2166_v11, %v2077_v17  ;;  %v1901_v26 = vpop.f32.mrf.mxu0  ;;  %v1990_v20 = vpop.f32.mrf.mxu1  ;;  %v2240_v21 = vunpack.c.h.bf16 %v1640_v62 }
 0x2ee   :  { %v2557_v63 = vadd.f32 %v2493_v53, %v2429_v25  ;;  %v1991_v41 = vadd.f32 %v1990_v20, %v1901_v26  ;;  %v2432_v20 = vld [vmem:[#allocation10 + $0x138] sm:$0xff] }
 0x2ef   :  { %2620 = vst [vmem:[#allocation10 + $0x118] sm:$0xff] %v2556_v8  ;;  %v2302_v38 = vmul.f32 0.005, %v2167_v27  ;;  %v2241_v8 = vunpack.c.l.bf16 %v1641_v16 }
 0x2f0   :  { %2621 = vst [vmem:[#allocation10 + $0x120] sm:$0xff] %v2557_v63  ;;  %v2303_v43 = vmul.f32 0.005, %v1991_v41 }
 0x2f1   :  { %v5083_v28 = vadd.f32 %v2302_v38, %v2238_v23  ;;  %v1642_v38 = vld [vmem:[#allocation2 + $0xa8] sm:$0xff] }
 0x2f2   :  { %v5085_v9 = vadd.f32 %v2303_v43, %v2239_v15  ;;  %v2433_v15 = vld [vmem:[#allocation10 + $0x140] sm:$0xff] }
 0x2f3   :  { %5339 = vst [vmem:[#allocation29_spill] sm:$0xff] %v5083_v28  ;;  %v2494_v54 = vmul.f32 0.0033333334, %v5083_v28  ;;  %v2445_v28 = vld [vmem:[#allocation10 + $0x1a0] sm:$0xff] }
 0x2f4   :  { %5340 = vst [vmem:[#allocation40_spill] sm:$0xff] %v5085_v9  ;;  %v2495_v31 = vmul.f32 0.0033333334, %v5085_v9  ;;  %v2079_v49 = vpop.f32.mrf.mxu2  ;;  %v2168_v51 = vpop.f32.mrf.mxu3 }
 0x2f5   :  { %v2558_v58 = vadd.f32 %v2494_v54, %v2430_v52  ;;  %v2169_v45 = vadd.f32 %v2168_v51, %v2079_v49  ;;  %v1904_v25 = vpop.f32.mrf.mxu0  ;;  %v1993_v53 = vpop.f32.mrf.mxu1 }
 0x2f6   :  { %v2559_v17 = vadd.f32 %v2495_v31, %v2431_v10  ;;  %v1994_v11 = vadd.f32 %v1993_v53, %v1904_v25  ;;  %v2242_v31 = vunpack.c.h.bf16 %v1641_v16 }
 0x2f7   :  { %2622 = vst [vmem:[#allocation10 + $0x128] sm:$0xff] %v2558_v58  ;;  %v2304_v27 = vmul.f32 0.005, %v2169_v45 }
 0x2f8   :  { %2623 = vst [vmem:[#allocation10 + $0x130] sm:$0xff] %v2559_v17  ;;  %v2305_v23 = vmul.f32 0.005, %v1994_v11  ;;  %v2434_v11 = vld [vmem:[#allocation10 + $0x148] sm:$0xff] }
 0x2f9   :  { %v5089_v26 = vadd.f32 %v2304_v27, %v2240_v21  ;;  %v2243_v21 = vunpack.c.l.bf16 %v1642_v38 }
 0x2fa   :  { %v5091_v63 = vadd.f32 %v2305_v23, %v2241_v8  ;;  %v2435_v23 = vld [vmem:[#allocation10 + $0x150] sm:$0xff] }
 0x2fb   :  { %5341 = vst [vmem:[#allocation42_spill] sm:$0xff] %v5089_v26  ;;  %v2496_v41 = vmul.f32 0.0033333334, %v5089_v26 }
 0x2fc   :  { %5342 = vst [vmem:[#allocation22_spill] sm:$0xff] %v5091_v63  ;;  %v2497_v62 = vmul.f32 0.0033333334, %v5091_v63  ;;  %v2082_v43 = vpop.f32.mrf.mxu2  ;;  %v2171_v52 = vpop.f32.mrf.mxu3 }
 0x2fd   :  { %v2560_v54 = vadd.f32 %v2496_v41, %v2432_v20  ;;  %v2172_v10 = vadd.f32 %v2171_v52, %v2082_v43  ;;  %v1906_v49 = vpop.f32.mrf.mxu0  ;;  %v1995_v51 = vpop.f32.mrf.mxu1  ;;  %v1643_v20 = vld [vmem:[#allocation2 + $0xb0] sm:$0xff]  ;;  %v2244_v52 = vunpack.c.h.bf16 %v1642_v38 }
 0x2fe   :  { %v2561_v58 = vadd.f32 %v2497_v62, %v2433_v15  ;;  %v1996_v45 = vadd.f32 %v1995_v51, %v1906_v49 }
 0x2ff   :  { %2624 = vst [vmem:[#allocation10 + $0x138] sm:$0xff] %v2560_v54  ;;  %v2306_v25 = vmul.f32 0.005, %v2172_v10 }
 0x300   :  { %2625 = vst [vmem:[#allocation10 + $0x140] sm:$0xff] %v2561_v58  ;;  %v2307_v53 = vmul.f32 0.005, %v1996_v45 }
 0x301   :  { %v5095_v17 = vadd.f32 %v2306_v25, %v2242_v31  ;;  %v2245_v31 = vunpack.c.l.bf16 %v1643_v20  ;;  %v2436_v25 = vld [vmem:[#allocation10 + $0x158] sm:$0xff] }
 0x302   :  { %v5097_v8 = vadd.f32 %v2307_v53, %v2243_v21 }
 0x303   :  { %5343 = vst [vmem:[#allocation24_spill] sm:$0xff] %v5095_v17  ;;  %v2498_v27 = vmul.f32 0.0033333334, %v5095_v17  ;;  %v2453_v17 = vld [vmem:[#allocation10 + $0x1e0] sm:$0xff] }
 0x304   :  { %5344 = vst [vmem:[#allocation35_spill] sm:$0xff] %v5097_v8  ;;  %v2499_v16 = vmul.f32 0.0033333334, %v5097_v8  ;;  %v2084_v41 = vpop.f32.mrf.mxu2  ;;  %v2173_v43 = vpop.f32.mrf.mxu3 }
 0x305   :  { %v2562_v15 = vadd.f32 %v2498_v27, %v2434_v11  ;;  %v2174_v62 = vadd.f32 %v2173_v43, %v2084_v41  ;;  %v1909_v54 = vpop.f32.mrf.mxu0  ;;  %v1998_v10 = vpop.f32.mrf.mxu1  ;;  %v1644_v11 = vld [vmem:[#allocation2 + $0xb8] sm:$0xff]  ;;  %v2246_v43 = vunpack.c.h.bf16 %v1643_v20 }
 0x306   :  { %v2563_v49 = vadd.f32 %v2499_v16, %v2435_v23  ;;  %v1999_v51 = vadd.f32 %v1998_v10, %v1909_v54 }
 0x307   :  { %2626 = vst [vmem:[#allocation10 + $0x148] sm:$0xff] %v2562_v15  ;;  %v2308_v58 = vmul.f32 0.005, %v2174_v62 }
 0x308   :  { %2627 = vst [vmem:[#allocation10 + $0x150] sm:$0xff] %v2563_v49  ;;  %v2309_v45 = vmul.f32 0.005, %v1999_v51 }
 0x309   :  { %v5101_v21 = vadd.f32 %v2308_v58, %v2244_v52  ;;  %v2247_v52 = vunpack.c.l.bf16 %v1644_v11  ;;  %v2438_v58 = vld [vmem:[#allocation10 + $0x168] sm:$0xff] }
 0x30a   :  { %v5103_v53 = vadd.f32 %v2309_v45, %v2245_v31 }
 0x30b   :  { %5345 = vst [vmem:[#allocation37_spill] sm:$0xff] %v5101_v21  ;;  %v2500_v3 = vmul.f32 0.0033333334, %v5101_v21 }
 0x30c   :  { %v2501_v38 = vmul.f32 0.0033333334, %v5103_v53  ;;  %v2087_v27 = vpop.f32.mrf.mxu2  ;;  %v2176_v41 = vpop.f32.mrf.mxu3 }
 0x30d   :  { %v2564_v23 = vadd.f32 %v2500_v3, %v2436_v25  ;;  %v2177_v16 = vadd.f32 %v2176_v41, %v2087_v27  ;;  %v1911_v15 = vpop.f32.mrf.mxu0  ;;  %v2000_v62 = vpop.f32.mrf.mxu1  ;;  %v1645_v3 = vld [vmem:[#allocation2 + $0xc0] sm:$0xff]  ;;  %v2248_v41 = vunpack.c.h.bf16 %v1644_v11 }
 0x30e   :  { %v2565_v54 = vadd.f32 %v2501_v38, %v2437_v39  ;;  %v2001_v10 = vadd.f32 %v2000_v62, %v1911_v15 }
 0x30f   :  { %2628 = vst [vmem:[#allocation10 + $0x158] sm:$0xff] %v2564_v23  ;;  %v2310_v49 = vmul.f32 0.005, %v2177_v16 }
 0x310   :  { %2629 = vst [vmem:[#allocation10 + $0x160] sm:$0xff] %v2565_v54  ;;  %v2311_v51 = vmul.f32 0.005, %v2001_v10 }
 0x311   :  { %v5107_v31 = vadd.f32 %v2310_v49, %v2246_v43  ;;  %v2249_v43 = vunpack.c.l.bf16 %v1645_v3  ;;  %v2440_v49 = vld [vmem:[#allocation10 + $0x178] sm:$0xff] }
 0x312   :  { %v5109_v45 = vadd.f32 %v2311_v51, %v2247_v52 }
 0x313   :  { %v2502_v7 = vmul.f32 0.0033333334, %v5107_v31 }
 0x314   :  { %v2503_v20 = vmul.f32 0.0033333334, %v5109_v45  ;;  %v2089_v25 = vpop.f32.mrf.mxu2  ;;  %v2178_v27 = vpop.f32.mrf.mxu3 }
 0x315   :  { %v2566_v39 = vadd.f32 %v2502_v7, %v2438_v58  ;;  %v2179_v38 = vadd.f32 %v2178_v27, %v2089_v25  ;;  %v1914_v23 = vpop.f32.mrf.mxu0  ;;  %v2003_v16 = vpop.f32.mrf.mxu1  ;;  %v1646_v7 = vld [vmem:[#allocation2 + $0xc8] sm:$0xff]  ;;  %v2250_v27 = vunpack.c.h.bf16 %v1645_v3 }
 0x316   :  { %v2567_v15 = vadd.f32 %v2503_v20, %v2439_v37  ;;  %v2004_v62 = vadd.f32 %v2003_v16, %v1914_v23 }
 0x317   :  { %2630 = vst [vmem:[#allocation10 + $0x168] sm:$0xff] %v2566_v39  ;;  %v2312_v54 = vmul.f32 0.005, %v2179_v38 }
 0x318   :  { %2631 = vst [vmem:[#allocation10 + $0x170] sm:$0xff] %v2567_v15  ;;  %v2313_v10 = vmul.f32 0.005, %v2004_v62 }
 0x319   :  { %v5113_v52 = vadd.f32 %v2312_v54, %v2248_v41  ;;  %v2251_v41 = vunpack.c.l.bf16 %v1646_v7  ;;  %v2442_v54 = vld [vmem:[#allocation10 + $0x188] sm:$0xff] }
 0x31a   :  { %v5115_v51 = vadd.f32 %v2313_v10, %v2249_v43 }
 0x31b   :  { %v2504_v4 = vmul.f32 0.0033333334, %v5113_v52 }
 0x31c   :  { %v2505_v11 = vmul.f32 0.0033333334, %v5115_v51  ;;  %v2092_v58 = vpop.f32.mrf.mxu2  ;;  %v2181_v25 = vpop.f32.mrf.mxu3 }
 0x31d   :  { %v2568_v37 = vadd.f32 %v2504_v4, %v2440_v49  ;;  %v2182_v20 = vadd.f32 %v2181_v25, %v2092_v58  ;;  %v1916_v39 = vpop.f32.mrf.mxu0  ;;  %v2005_v38 = vpop.f32.mrf.mxu1  ;;  %v1647_v4 = vld [vmem:[#allocation2 + $0xd0] sm:$0xff]  ;;  %v2252_v25 = vunpack.c.h.bf16 %v1646_v7 }
 0x31e   :  { %v2569_v23 = vadd.f32 %v2505_v11, %v2441_v29  ;;  %v2006_v16 = vadd.f32 %v2005_v38, %v1916_v39 }
 0x31f   :  { %2632 = vst [vmem:[#allocation10 + $0x178] sm:$0xff] %v2568_v37  ;;  %v2314_v15 = vmul.f32 0.005, %v2182_v20 }
 0x320   :  { %2633 = vst [vmem:[#allocation10 + $0x180] sm:$0xff] %v2569_v23  ;;  %v2315_v62 = vmul.f32 0.005, %v2006_v16 }
 0x321   :  { %v5119_v43 = vadd.f32 %v2314_v15, %v2250_v27  ;;  %v2253_v27 = vunpack.c.l.bf16 %v1647_v4  ;;  %v2444_v15 = vld [vmem:[#allocation10 + $0x198] sm:$0xff] }
 0x322   :  { %v5121_v10 = vadd.f32 %v2315_v62, %v2251_v41 }
 0x323   :  { %v2506_v1 = vmul.f32 0.0033333334, %v5119_v43 }
 0x324   :  { %v2507_v3 = vmul.f32 0.0033333334, %v5121_v10  ;;  %v2094_v49 = vpop.f32.mrf.mxu2  ;;  %v2183_v58 = vpop.f32.mrf.mxu3 }
 0x325   :  { %v2570_v29 = vadd.f32 %v2506_v1, %v2442_v54  ;;  %v2184_v11 = vadd.f32 %v2183_v58, %v2094_v49  ;;  %v1919_v37 = vpop.f32.mrf.mxu0  ;;  %v2008_v20 = vpop.f32.mrf.mxu1  ;;  %v1648_v1 = vld [vmem:[#allocation2 + $0xd8] sm:$0xff]  ;;  %v2254_v58 = vunpack.c.h.bf16 %v1647_v4 }
 0x326   :  { %v2571_v39 = vadd.f32 %v2507_v3, %v2443_v61  ;;  %v2009_v38 = vadd.f32 %v2008_v20, %v1919_v37 }
 0x327   :  { %2634 = vst [vmem:[#allocation10 + $0x188] sm:$0xff] %v2570_v29  ;;  %v2316_v23 = vmul.f32 0.005, %v2184_v11 }
 0x328   :  { %2635 = vst [vmem:[#allocation10 + $0x190] sm:$0xff] %v2571_v39  ;;  %v2317_v16 = vmul.f32 0.005, %v2009_v38 }
 0x329   :  { %v5125_v41 = vadd.f32 %v2316_v23, %v2252_v25  ;;  %v2255_v25 = vunpack.c.l.bf16 %v1648_v1  ;;  %v2446_v23 = vld [vmem:[#allocation10 + $0x1a8] sm:$0xff] }
 0x32a   :  { %v5127_v62 = vadd.f32 %v2317_v16, %v2253_v27 }
 0x32b   :  { %v2508_v26 = vmul.f32 0.0033333334, %v5125_v41 }
 0x32c   :  { %v2509_v7 = vmul.f32 0.0033333334, %v5127_v62  ;;  %v2097_v54 = vpop.f32.mrf.mxu2  ;;  %v2186_v49 = vpop.f32.mrf.mxu3 }
 0x32d   :  { %v2572_v61 = vadd.f32 %v2508_v26, %v2444_v15  ;;  %v2187_v3 = vadd.f32 %v2186_v49, %v2097_v54  ;;  %v1921_v29 = vpop.f32.mrf.mxu0  ;;  %v2010_v11 = vpop.f32.mrf.mxu1  ;;  %v1649_v26 = vld [vmem:[#allocation2 + $0xe0] sm:$0xff]  ;;  %v2256_v49 = vunpack.c.h.bf16 %v1648_v1 }
 0x32e   :  { %v2573_v37 = vadd.f32 %v2509_v7, %v2445_v28  ;;  %v2011_v20 = vadd.f32 %v2010_v11, %v1921_v29 }
 0x32f   :  { %2636 = vst [vmem:[#allocation10 + $0x198] sm:$0xff] %v2572_v61  ;;  %v2318_v39 = vmul.f32 0.005, %v2187_v3 }
 0x330   :  { %2637 = vst [vmem:[#allocation10 + $0x1a0] sm:$0xff] %v2573_v37  ;;  %v2319_v38 = vmul.f32 0.005, %v2011_v20 }
 0x331   :  { %v5131_v27 = vadd.f32 %v2318_v39, %v2254_v58  ;;  %v2257_v58 = vunpack.c.l.bf16 %v1649_v26  ;;  %v2448_v39 = vld [vmem:[#allocation10 + $0x1b8] sm:$0xff] }
 0x332   :  { %v5133_v16 = vadd.f32 %v2319_v38, %v2255_v25 }
 0x333   :  { %v2510_v32 = vmul.f32 0.0033333334, %v5131_v27 }
 0x334   :  { %v2511_v4 = vmul.f32 0.0033333334, %v5133_v16  ;;  %v2099_v15 = vpop.f32.mrf.mxu2  ;;  %v2188_v54 = vpop.f32.mrf.mxu3 }
 0x335   :  { %v2574_v28 = vadd.f32 %v2510_v32, %v2446_v23  ;;  %v2189_v7 = vadd.f32 %v2188_v54, %v2099_v15  ;;  %v1924_v61 = vpop.f32.mrf.mxu0  ;;  %v2013_v3 = vpop.f32.mrf.mxu1  ;;  %v1650_v32 = vld [vmem:[#allocation2 + $0xe8] sm:$0xff]  ;;  %v2258_v54 = vunpack.c.h.bf16 %v1649_v26 }
 0x336   :  { %v2575_v29 = vadd.f32 %v2511_v4, %v2447_v12  ;;  %v2014_v11 = vadd.f32 %v2013_v3, %v1924_v61 }
 0x337   :  { %2638 = vst [vmem:[#allocation10 + $0x1a8] sm:$0xff] %v2574_v28  ;;  %v2320_v37 = vmul.f32 0.005, %v2189_v7 }
 0x338   :  { %2639 = vst [vmem:[#allocation10 + $0x1b0] sm:$0xff] %v2575_v29  ;;  %v2321_v20 = vmul.f32 0.005, %v2014_v11 }
 0x339   :  { %v5137_v25 = vadd.f32 %v2320_v37, %v2256_v49  ;;  %v2259_v49 = vunpack.c.l.bf16 %v1650_v32  ;;  %v2450_v37 = vld [vmem:[#allocation10 + $0x1c8] sm:$0xff] }
 0x33a   :  { %v5139_v38 = vadd.f32 %v2321_v20, %v2257_v58 }
 0x33b   :  { %v2512_v9 = vmul.f32 0.0033333334, %v5137_v25 }
 0x33c   :  { %v2513_v1 = vmul.f32 0.0033333334, %v5139_v38  ;;  %v2102_v23 = vpop.f32.mrf.mxu2  ;;  %v2191_v15 = vpop.f32.mrf.mxu3 }
 0x33d   :  { %v2576_v12 = vadd.f32 %v2512_v9, %v2448_v39  ;;  %v2192_v4 = vadd.f32 %v2191_v15, %v2102_v23  ;;  %v1926_v28 = vpop.f32.mrf.mxu0  ;;  %v2015_v7 = vpop.f32.mrf.mxu1  ;;  %v1651_v9 = vld [vmem:[#allocation2 + $0xf0] sm:$0xff]  ;;  %v2260_v15 = vunpack.c.h.bf16 %v1650_v32 }
 0x33e   :  { %v2577_v61 = vadd.f32 %v2513_v1, %v2449_v48  ;;  %v2016_v3 = vadd.f32 %v2015_v7, %v1926_v28 }
 0x33f   :  { %2640 = vst [vmem:[#allocation10 + $0x1b8] sm:$0xff] %v2576_v12  ;;  %v2322_v29 = vmul.f32 0.005, %v2192_v4 }
 0x340   :  { %2641 = vst [vmem:[#allocation10 + $0x1c0] sm:$0xff] %v2577_v61  ;;  %v2323_v11 = vmul.f32 0.005, %v2016_v3 }
 0x341   :  { %v5143_v58 = vadd.f32 %v2322_v29, %v2258_v54  ;;  %v2261_v54 = vunpack.c.l.bf16 %v1651_v9  ;;  %v2452_v29 = vld [vmem:[#allocation10 + $0x1d8] sm:$0xff] }
 0x342   :  { %v5145_v20 = vadd.f32 %v2323_v11, %v2259_v49 }
 0x343   :  { %v2514_v19 = vmul.f32 0.0033333334, %v5143_v58 }
 0x344   :  { %v2515_v26 = vmul.f32 0.0033333334, %v5145_v20  ;;  %v2104_v39 = vpop.f32.mrf.mxu2  ;;  %v2193_v23 = vpop.f32.mrf.mxu3 }
 0x345   :  { %v2578_v48 = vadd.f32 %v2514_v19, %v2450_v37  ;;  %v2194_v1 = vadd.f32 %v2193_v23, %v2104_v39  ;;  %v1929_v12 = vpop.f32.mrf.mxu0  ;;  %v2018_v4 = vpop.f32.mrf.mxu1  ;;  %v2262_v39 = vunpack.c.h.bf16 %v1651_v9  ;;  %v2264_v9 = vunpack.c.h.bf16 %v1652_v42 }
 0x346   :  { %v2579_v28 = vadd.f32 %v2515_v26, %v2451_v5  ;;  %v2019_v7 = vadd.f32 %v2018_v4, %v1929_v12 }
 0x347   :  { %2642 = vst [vmem:[#allocation10 + $0x1c8] sm:$0xff] %v2578_v48  ;;  %v2324_v61 = vmul.f32 0.005, %v2194_v1  ;;  %v2263_v48 = vunpack.c.l.bf16 %v1652_v42 }
 0x348   :  { %2643 = vst [vmem:[#allocation10 + $0x1d0] sm:$0xff] %v2579_v28  ;;  %v2325_v3 = vmul.f32 0.005, %v2019_v7  ;;  %v2454_v28 = vld [vmem:[#allocation10 + $0x1e8] sm:$0xff] }
 0x349   :  { %v2388_v49 = vadd.f32 %v2324_v61, %v2260_v15  ;;  %v2455_v61 = vld [vmem:[#allocation10 + $0x1f0] sm:$0xff] }
 0x34a   :  { %v2389_v11 = vadd.f32 %v2325_v3, %v2261_v54 }
 0x34b   :  { %v2516_v21 = vmul.f32 0.0033333334, %v2388_v49 }
 0x34c   :  { %v2517_v50 = vmul.f32 0.0033333334, %v2389_v11  ;;  %v2107_v8 = vpop.f32.mrf.mxu2  ;;  %v2196_v19 = vpop.f32.mrf.mxu3 }
 0x34d   :  { %v2580_v37 = vadd.f32 %v2516_v21, %v2452_v29  ;;  %v2197_v32 = vadd.f32 %v2196_v19, %v2107_v8  ;;  %v1931_v23 = vpop.f32.mrf.mxu0  ;;  %v2020_v5 = vpop.f32.mrf.mxu1  ;;  %v2456_v19 = vld [vmem:[#allocation10 + $0x1f8] sm:$0xff] }
 0x34e   :  { %v2581_v26 = vadd.f32 %v2517_v50, %v2453_v17  ;;  %v2021_v12 = vadd.f32 %v2020_v5, %v1931_v23  ;;  %v2698_v5 = vpack.c.bf16 %v5062_v59, %v5056_v46 }
 0x34f   :  { %2644 = vst [vmem:[#allocation10 + $0x1d8] sm:$0xff] %v2580_v37  ;;  %v2326_v1 = vmul.f32 0.005, %v2197_v32 }
 0x350   :  { %2645 = vst [vmem:[#allocation10 + $0x1e0] sm:$0xff] %v2581_v26  ;;  %v2327_v15 = vmul.f32 0.005, %v2021_v12 }
 0x351   :  { %v2390_v4 = vadd.f32 %v2326_v1, %v2262_v39  ;;  %v2697_v39 = vpack.c.bf16 %v5058_v35, %v5052_v47 }
 0x352   :  { %v2391_v7 = vadd.f32 %v2327_v15, %v2263_v48 }
 0x353   :  { %v2518_v54 = vmul.f32 0.0033333334, %v2390_v4 }
 0x354   :  { %v2519_v3 = vmul.f32 0.0033333334, %v2391_v7  ;;  %v2109_v63 = vpop.f32.mrf.mxu2  ;;  %v2198_v57 = vpop.f32.mrf.mxu3  ;;  %v2713_v23 = vpack.c.bf16 %v2391_v7, %v2389_v11 }
 0x355   :  { %v2582_v21 = vadd.f32 %v2518_v54, %v2454_v28  ;;  %v2199_v8 = vadd.f32 %v2198_v57, %v2109_v63 }
 0x356   :  { %v2583_v29 = vadd.f32 %v2519_v3, %v2455_v61 }
 0x357   :  { %2646 = vst [vmem:[#allocation10 + $0x1e8] sm:$0xff] %v2582_v21  ;;  %v2328_v50 = vmul.f32 0.005, %v2199_v8 }
 0x358   :  { %2647 = vst [vmem:[#allocation10 + $0x1f0] sm:$0xff] %v2583_v29 }
 0x359   :  { %v2392_v17 = vadd.f32 %v2328_v50, %v2264_v9 }
 0x35b   :  { %v2520_v37 = vmul.f32 0.0033333334, %v2392_v17  ;;  %v2714_v26 = vpack.c.bf16 %v2392_v17, %v2390_v4 }
 0x35d   :  { %v2584_v32 = vadd.f32 %v2520_v37, %v2456_v19 }
 0x35f   :  { %2648 = vst [vmem:[#allocation10 + $0x1f8] sm:$0xff] %v2584_v32 }
 0x360   :  { %4522 = dma.done.wait [#allocation4 + $0x1], 4096 }
 0x361   :  { %4523 = vsyncadd [#allocation4 + $0x1], 4294963200  ;;  %2875 = vmatpush.bf16.msra.mxu0 %v2697_v39  ;;  %2964 = vmatpush.bf16.msra.mxu1 %v2713_v23  ;;  %v2695_v57 = vpack.c.bf16 %v5046_v24, %v5040_v33  ;;  %v2711_v42 = vpack.c.bf16 %v5145_v20, %v5139_v38  ;;  %v2696_v47 = vpack.c.bf16 %v5050_v18, %v5044_v6  ;;  %v5347_v63 = vld [vmem:[#allocation22_spill] sm:$0xff]  ;;  %v5359_v38 = vld [vmem:[#allocation29_spill] sm:$0xff]  ;;  %s4533_s3 = smov [#allocation10]   ;;  %s3685_s11 = sshll.u32 %s5215_s4, 4  ;;  %s3686_s11 = int_to_ptr.hbm [resolvable:$true] %s3685_s11 }
 0x362   :  { %3053 = vmatpush.bf16.msra.mxu2 %v2698_v5  ;;  %3142 = vmatpush.bf16.msra.mxu3 %v2714_v26  ;;  %v2712_v35 = vpack.c.bf16 %v2388_v49, %v5143_v58  ;;  %v2693_v46 = vpack.c.bf16 %v5034_v44, %v5028_v13  ;;  %v2709_v59 = vpack.c.bf16 %v5133_v16, %v5127_v62  ;;  %v5356_v62 = vld [vmem:[#allocation40_spill] sm:$0xff]  ;;  %v5358_v16 = vld [vmem:[#allocation31_spill] sm:$0xff]  ;;  %v5360_v58 = vld [vmem:[#allocation42_spill] sm:$0xff]  ;;  %s3683_s8 = sshll.u32 %s4533_s3, 4  ;;  %s4534_s12 = smov 256   ;;  %s3684_s8 = int_to_ptr.vmem [resolvable:$true] %s3683_s8 }
 0x363   :  { %v2694_v33 = vpack.c.bf16 %v5038_v56, %v5032_v0  ;;  %v2710_v24 = vpack.c.bf16 %v5137_v25, %v5131_v27  ;;  %v2691_v6 = vpack.c.bf16 %v5022_v2, %v5016_v30  ;;  %v2707_v18 = vpack.c.bf16 %v5121_v10, %v5115_v51  ;;  %v5348_v51 = vld [vmem:[#allocation35_spill] sm:$0xff]  ;;  %v5352_v10 = vld [vmem:[#allocation37_spill] sm:$0xff]  ;;  %v4130_v49 = vld [vmem:[#allocation3] sm:$0xf]  ;;  %s4535_s13 = smov 16  }
 0x364   :  { %v2692_v13 = vpack.c.bf16 %v5026_v34, %v5020_v60  ;;  %v2708_v44 = vpack.c.bf16 %v5125_v41, %v5119_v43  ;;  %v2689_v0 = vpack.c.bf16 %v5010_v55, %v5004_v22  ;;  %v2705_v56 = vpack.c.bf16 %v5109_v45, %v5103_v53  ;;  %v5346_v60 = vld [vmem:[#allocation44_spill] sm:$0xff]  ;;  %v5349_v22 = vld [vmem:[#allocation33_spill] sm:$0xff]  ;;  %v5350_v55 = vld [vmem:[#allocation46_spill] sm:$0xff] }
 0x365   :  { %2876 = vmatpush.bf16.msra.mxu0 %v2695_v57  ;;  %2965 = vmatpush.bf16.msra.mxu1 %v2711_v42  ;;  %v2690_v30 = vpack.c.bf16 %v5014_v36, %v5008_v14  ;;  %v2706_v2 = vpack.c.bf16 %v5113_v52, %v5107_v31  ;;  %v2687_v34 = vpack.c.bf16 %v5346_v60, %v4992_v40  ;;  %v5351_v45 = vld [vmem:[#allocation24_spill] sm:$0xff]  ;;  %v5354_v36 = vld [vmem:[#allocation45_spill] sm:$0xff]  ;;  %v5355_v52 = vld [vmem:[#allocation27_spill] sm:$0xff] }
 0x366   :  { %3054 = vmatpush.bf16.msra.mxu2 %v2696_v47  ;;  %3143 = vmatpush.bf16.msra.mxu3 %v2712_v35  ;;  %v2703_v43 = vpack.c.bf16 %v5348_v51, %v5347_v63  ;;  %v2688_v53 = vpack.c.bf16 %v5350_v55, %v5349_v22  ;;  %v2704_v41 = vpack.c.bf16 %v5352_v10, %v5351_v45  ;;  %v5353_v14 = vld [vmem:[#allocation32_spill] sm:$0xff]  ;;  %v5357_v40 = vld [vmem:[#allocation43_spill] sm:$0xff]  ;;  %v5361_v11 = vld [vmem:[#allocation34_spill] sm:$0xff] }
 0x367   :  { %v2685_v31 = vpack.c.bf16 %v5354_v36, %v5353_v14  ;;  %v2701_v27 = vpack.c.bf16 %v5356_v62, %v5355_v52  ;;  %v2686_v25 = vpack.c.bf16 %v5358_v16, %v5357_v40  ;;  %v2702_v20 = vpack.c.bf16 %v5360_v58, %v5359_v38  ;;  %v5362_v12 = vld [vmem:[#allocation48_spill] sm:$0xff]  ;;  %v5363_v1 = vld [vmem:[#allocation26_spill] sm:$0xff]  ;;  %v5364_v15 = vld [vmem:[#allocation39_spill] sm:$0xff] }
 0x368   :  { %v2683_v48 = vpack.c.bf16 %v5362_v12, %v5361_v11  ;;  %v2699_v4 = vpack.c.bf16 %v5364_v15, %v5363_v1  ;;  %v4355_v28 = vld [vmem:[#allocation3 + $0x4] sm:$0xf0]  ;;  %v4354_v7 = vld [vmem:[#allocation3 + $0x4] sm:$0xf]  ;;  %v4132_v54 = vld [vmem:[#allocation3 + $0x8] sm:$0xf0] }
 0x369   :  { %2877 = vmatpush.bf16.msra.mxu0 %v2693_v46  ;;  %2966 = vmatpush.bf16.msra.mxu1 %v2709_v59  ;;  %v5365_v61 = vld [vmem:[#allocation47_spill] sm:$0xff]  ;;  %v5366_v3 = vld [vmem:[#allocation30_spill] sm:$0xff]  ;;  %v5367_v8 = vld [vmem:[#allocation28_spill] sm:$0xff]  ;;  %v4131_v50 = vor.u32 %v4355_v28, %v4130_v49  ;;  %v4135_v17 = vor.u32 %v4354_v7, %v4132_v54 }
 0x36a   :  { %3055 = vmatpush.bf16.msra.mxu2 %v2694_v33  ;;  %3144 = vmatpush.bf16.msra.mxu3 %v2710_v24  ;;  %v2684_v21 = vpack.c.bf16 %v5366_v3, %v5365_v61  ;;  %v5368_v9 = vld [vmem:[#allocation41_spill] sm:$0xff]  ;;  %v4138_v19 = vld [vmem:[#allocation3 + $0x10] sm:$0xf]  ;;  %v4356_v32 = vld [vmem:[#allocation3 + $0x14] sm:$0xf] }
 0x36b   :  { %v2700_v29 = vpack.c.bf16 %v5368_v9, %v5367_v8  ;;  %v4357_v37 = vld [vmem:[#allocation3 + $0x14] sm:$0xf0]  ;;  %v4140_v39 = vld [vmem:[#allocation3 + $0x18] sm:$0xf0]  ;;  %v4146_v26 = vld [vmem:[#allocation3 + $0x20] sm:$0xf] }
 0x36c   :  { %v4139_v23 = vor.u32 %v4357_v37, %v4138_v19  ;;  %v4143_v5 = vor.u32 %v4356_v32, %v4140_v39  ;;  %v4359_v57 = vld [vmem:[#allocation3 + $0x24] sm:$0xf0]  ;;  %v4358_v42 = vld [vmem:[#allocation3 + $0x24] sm:$0xf]  ;;  %v4148_v47 = vld [vmem:[#allocation3 + $0x28] sm:$0xf0] }
 0x36d   :  { %2878 = vmatpush.bf16.msra.mxu0 %v2691_v6  ;;  %2967 = vmatpush.bf16.msra.mxu1 %v2707_v18  ;;  %v4147_v35 = vor.u32 %v4359_v57, %v4146_v26  ;;  %v4151_v46 = vor.u32 %v4358_v42, %v4148_v47  ;;  %v4154_v59 = vld [vmem:[#allocation3 + $0x30] sm:$0xf]  ;;  %v4361_v33 = vld [vmem:[#allocation3 + $0x34] sm:$0xf0]  ;;  %v4360_v24 = vld [vmem:[#allocation3 + $0x34] sm:$0xf] }
 0x36e   :  { %3056 = vmatpush.bf16.msra.mxu2 %v2692_v13  ;;  %3145 = vmatpush.bf16.msra.mxu3 %v2708_v44  ;;  %v4156_v6 = vld [vmem:[#allocation3 + $0x38] sm:$0xf0]  ;;  %v4155_v18 = vor.u32 %v4361_v33, %v4154_v59  ;;  %v4162_v44 = vld [vmem:[#allocation3 + $0x40] sm:$0xf]  ;;  %v4365_v63 = vld [vmem:[#allocation3 + $0x54] sm:$0xf0] }
 0x36f   :  { %v4159_v13 = vor.u32 %v4360_v24, %v4156_v6  ;;  %v4364_v51 = vld [vmem:[#allocation3 + $0x54] sm:$0xf]  ;;  %v4367_v45 = vld [vmem:[#allocation3 + $0x64] sm:$0xf0]  ;;  %v4366_v10 = vld [vmem:[#allocation3 + $0x64] sm:$0xf] }
 0x370   :  { %v4369_v52 = vld [vmem:[#allocation3 + $0x74] sm:$0xf0]  ;;  %v4368_v62 = vld [vmem:[#allocation3 + $0x74] sm:$0xf]  ;;  %v4194_v38 = vld [vmem:[#allocation3 + $0x80] sm:$0xf] }
 0x371   :  { %2879 = vmatpush.bf16.msra.mxu0 %v2689_v0  ;;  %2968 = vmatpush.bf16.msra.mxu1 %v2705_v56  ;;  %v4363_v0 = vld [vmem:[#allocation3 + $0x44] sm:$0xf0]  ;;  %v4362_v56 = vld [vmem:[#allocation3 + $0x44] sm:$0xf]  ;;  %v4196_v49 = vld [vmem:[#allocation3 + $0x88] sm:$0xf0] }
 0x372   :  { %3057 = vmatpush.bf16.msra.mxu2 %v2690_v30  ;;  %3146 = vmatpush.bf16.msra.mxu3 %v2706_v2  ;;  %v4164_v30 = vld [vmem:[#allocation3 + $0x48] sm:$0xf0]  ;;  %v4163_v2 = vor.u32 %v4363_v0, %v4162_v44  ;;  %v4371_v58 = vld [vmem:[#allocation3 + $0x84] sm:$0xf0]  ;;  %v3231_v61 = vld [vmem:[#allocation10] sm:$0xff] }
 0x373   :  { %v4167_v60 = vor.u32 %v4362_v56, %v4164_v30  ;;  %v4195_v12 = vor.u32 %v4371_v58, %v4194_v38  ;;  %v2652_v7 = vld [vmem:[#allocation3 + $0x8] sm:$0xff]  ;;  %v2653_v26 = vld [vmem:[#allocation3 + $0x10] sm:$0xff]  ;;  %v4373_v33 = vld [vmem:[#allocation3 + $0x94] sm:$0xf0] }
 0x374   :  { %v3297_v8 = vunpack.c.l.bf16 %v2652_v7  ;;  %v3232_v57 = vld [vmem:[#allocation10 + $0x8] sm:$0xff]  ;;  %v3233_v42 = vld [vmem:[#allocation10 + $0x10] sm:$0xff]  ;;  %v3298_v59 = vunpack.c.h.bf16 %v2652_v7  ;;  %v4204_v6 = vld [vmem:[#allocation3 + $0x98] sm:$0xf0] }
 0x375   :  { %2880 = vmatpush.bf16.msra.mxu0 %v2687_v34  ;;  %2969 = vmatpush.bf16.msra.mxu1 %v2703_v43  ;;  %v4170_v34 = vld [vmem:[#allocation3 + $0x50] sm:$0xf]  ;;  %v4172_v43 = vld [vmem:[#allocation3 + $0x58] sm:$0xf0]  ;;  %v4372_v24 = vld [vmem:[#allocation3 + $0x94] sm:$0xf] }
 0x376   :  { %3058 = vmatpush.bf16.msra.mxu2 %v2688_v53  ;;  %3147 = vmatpush.bf16.msra.mxu3 %v2704_v41  ;;  %v4171_v22 = vor.u32 %v4365_v63, %v4170_v34  ;;  %v4175_v55 = vor.u32 %v4364_v51, %v4172_v43  ;;  %v4178_v53 = vld [vmem:[#allocation3 + $0x60] sm:$0xf]  ;;  %v4180_v41 = vld [vmem:[#allocation3 + $0x68] sm:$0xf0]  ;;  %v3362_v63 = vmul.f32 0.0016666667, %v3298_v59 }
 0x377   :  { %v4179_v14 = vor.u32 %v4367_v45, %v4178_v53  ;;  %v4183_v36 = vor.u32 %v4366_v10, %v4180_v41  ;;  %v2654_v45 = vld [vmem:[#allocation3 + $0x18] sm:$0xff]  ;;  %v4210_v7 = vld [vmem:[#allocation3 + $0xa0] sm:$0xf] }
 0x378   :  { %v3234_v10 = vld [vmem:[#allocation10 + $0x18] sm:$0xff] }
 0x379   :  { %2881 = vmatpush.bf16.msra.mxu0 %v2685_v31  ;;  %2970 = vmatpush.bf16.msra.mxu1 %v2701_v27  ;;  %v4186_v31 = vld [vmem:[#allocation3 + $0x70] sm:$0xf]  ;;  %v4188_v27 = vld [vmem:[#allocation3 + $0x78] sm:$0xf0] }
 0x37a   :  { %3059 = vmatpush.bf16.msra.mxu2 %v2686_v25  ;;  %3148 = vmatpush.bf16.msra.mxu3 %v2702_v20  ;;  %v4187_v40 = vor.u32 %v4369_v52, %v4186_v31  ;;  %v4191_v16 = vor.u32 %v4368_v62, %v4188_v27  ;;  %v2651_v25 = vld [vmem:[#allocation3] sm:$0xff]  ;;  %v3300_v31 = vunpack.c.h.bf16 %v2653_v26  ;;  %v3301_v62 = vunpack.c.l.bf16 %v2654_v45  ;;  %v3238_v59 = vld [vmem:[#allocation10 + $0x38] sm:$0xff] }
 0x37b   :  { %v4370_v20 = vld [vmem:[#allocation3 + $0x84] sm:$0xf]  ;;  %v3295_v11 = vunpack.c.l.bf16 %v2651_v25  ;;  %v3296_v3 = vunpack.c.h.bf16 %v2651_v25 }
 0x37c   :  { %v3364_v58 = vmul.f32 0.0016666667, %v3300_v31 }
 0x37d   :  { %2882 = vmatpush.bf16.msra.mxu0 %v2683_v48  ;;  %2971 = vmatpush.bf16.msra.mxu1 %v2699_v4  ;;  %v4199_v48 = vor.u32 %v4370_v20, %v4196_v49  ;;  %v3359_v28 = vmul.f32 0.0016666667, %v3295_v11  ;;  %v3360_v19 = vmul.f32 0.0016666667, %v3296_v3  ;;  %v4375_v3 = vld [vmem:[#allocation3 + $0xa4] sm:$0xf0] }
 0x37e   :  { %3060 = vmatpush.bf16.msra.mxu2 %v2684_v21  ;;  %3149 = vmatpush.bf16.msra.mxu3 %v2700_v29 }
 0x380   :  { %2883 = vmatmul.bf16.vlgmr.msra.gmra.mxu0 %v4131_v50  ;;  %2972 = vmatmul.bf16.vlgmr.msra.gmra.mxu1 %v4135_v17 }
 0x381   :  { %3061 = vmatmul.bf16.vlgmr.msra.gmra.mxu2 %v4131_v50  ;;  %3150 = vmatmul.bf16.vlgmr.msra.gmra.mxu3 %v4135_v17 }
 0x390   :  { %2888 = vmatmul.bf16.gmra.mxu0 %v4139_v23  ;;  %2977 = vmatmul.bf16.gmra.mxu1 %v4143_v5 }
 0x391   :  { %3066 = vmatmul.bf16.gmra.mxu2 %v4139_v23  ;;  %3155 = vmatmul.bf16.gmra.mxu3 %v4143_v5  ;;  %v3361_v23 = vmul.f32 0.0016666667, %v3297_v8  ;;  %v4212_v8 = vld [vmem:[#allocation3 + $0xa8] sm:$0xf0] }
 0x3a0   :  { %2893 = vmatmul.bf16.gmra.mxu0 %v4147_v35  ;;  %2982 = vmatmul.bf16.gmra.mxu1 %v4151_v46 }
 0x3a1   :  { %3071 = vmatmul.bf16.gmra.mxu2 %v4147_v35  ;;  %3160 = vmatmul.bf16.gmra.mxu3 %v4151_v46  ;;  %v4202_v35 = vld [vmem:[#allocation3 + $0x90] sm:$0xf] }
 0x3b0   :  { %2898 = vmatmul.bf16.gmra.mxu0 %v4155_v18  ;;  %2987 = vmatmul.bf16.gmra.mxu1 %v4159_v13 }
 0x3b1   :  { %3076 = vmatmul.bf16.gmra.mxu2 %v4155_v18  ;;  %3165 = vmatmul.bf16.gmra.mxu3 %v4159_v13  ;;  %v3299_v13 = vunpack.c.l.bf16 %v2653_v26 }
 0x3c0   :  { %2903 = vmatmul.bf16.gmra.mxu0 %v4163_v2  ;;  %2992 = vmatmul.bf16.gmra.mxu1 %v4167_v60 }
 0x3c1   :  { %3081 = vmatmul.bf16.gmra.mxu2 %v4163_v2  ;;  %3170 = vmatmul.bf16.gmra.mxu3 %v4167_v60  ;;  %v4203_v2 = vor.u32 %v4373_v33, %v4202_v35  ;;  %v4207_v60 = vor.u32 %v4372_v24, %v4204_v6  ;;  %v3239_v6 = vld [vmem:[#allocation10 + $0x40] sm:$0xff] }
 0x3d0   :  { %2908 = vmatmul.bf16.gmra.mxu0 %v4171_v22  ;;  %2997 = vmatmul.bf16.gmra.mxu1 %v4175_v55 }
 0x3d1   :  { %3086 = vmatmul.bf16.gmra.mxu2 %v4171_v22  ;;  %3175 = vmatmul.bf16.gmra.mxu3 %v4175_v55  ;;  %v3363_v55 = vmul.f32 0.0016666667, %v3299_v13 }
 0x3e0   :  { %2913 = vmatmul.bf16.gmra.mxu0 %v4179_v14  ;;  %3002 = vmatmul.bf16.gmra.mxu1 %v4183_v36 }
 0x3e1   :  { %3091 = vmatmul.bf16.gmra.mxu2 %v4179_v14  ;;  %3180 = vmatmul.bf16.gmra.mxu3 %v4183_v36  ;;  %v3235_v36 = vld [vmem:[#allocation10 + $0x20] sm:$0xff] }
 0x3f0   :  { %2918 = vmatmul.bf16.gmra.mxu0 %v4187_v40  ;;  %3007 = vmatmul.bf16.gmra.mxu1 %v4191_v16 }
 0x3f1   :  { %3096 = vmatmul.bf16.gmra.mxu2 %v4187_v40  ;;  %3185 = vmatmul.bf16.gmra.mxu3 %v4191_v16 }
 0x3fd   :  { %v2884_v1 = vpop.f32.mrf.mxu0  ;;  %v2973_v15 = vpop.f32.mrf.mxu1 }
 0x3fe   :  { %v2974_v4 = vadd.f32 %v2973_v15, %v2884_v1  ;;  %v2655_v1 = vld [vmem:[#allocation3 + $0x20] sm:$0xff]  ;;  %v3236_v15 = vld [vmem:[#allocation10 + $0x28] sm:$0xff] }
 0x400   :  { %v3423_v54 = vmul.f32 1.6666667e-05, %v2974_v4  ;;  %2923 = vmatmul.bf16.gmra.mxu0 %v4195_v12  ;;  %3012 = vmatmul.bf16.gmra.mxu1 %v4199_v48  ;;  %v3237_v4 = vld [vmem:[#allocation10 + $0x30] sm:$0xff] }
 0x401   :  { %3101 = vmatmul.bf16.gmra.mxu2 %v4195_v12  ;;  %3190 = vmatmul.bf16.gmra.mxu3 %v4199_v48  ;;  %v3365_v12 = vmul.f32 0.0016666667, %v3301_v62  ;;  %v4376_v62 = vld [vmem:[#allocation3 + $0xb4] sm:$0xf] }
 0x402   :  { %v3487_v21 = vadd.f32 %v3423_v54, %v3359_v28 }
 0x404   :  { %v3551_v9 = vadd.f32 %v3487_v21, %v3231_v61  ;;  %v3062_v29 = vpop.f32.mrf.mxu2  ;;  %v3151_v50 = vpop.f32.mrf.mxu3  ;;  %v3302_v61 = vunpack.c.h.bf16 %v2654_v45  ;;  %v4374_v21 = vld [vmem:[#allocation3 + $0xa4] sm:$0xf]  ;;  %v3240_v45 = vld [vmem:[#allocation10 + $0x48] sm:$0xff] }
 0x405   :  { %v3152_v17 = vadd.f32 %v3151_v50, %v3062_v29  ;;  %v2886_v37 = vpop.f32.mrf.mxu0  ;;  %v2975_v32 = vpop.f32.mrf.mxu1  ;;  %v3303_v29 = vunpack.c.l.bf16 %v2655_v1 }
 0x406   :  { %3615 = vst [vmem:[#allocation10] sm:$0xff] %v3551_v9  ;;  %v2976_v39 = vadd.f32 %v2975_v32, %v2886_v37  ;;  %v4211_v32 = vor.u32 %v4375_v3, %v4210_v7 }
 0x407   :  { %v3424_v5 = vmul.f32 1.6666667e-05, %v3152_v17 }
 0x408   :  { %v3425_v47 = vmul.f32 1.6666667e-05, %v2976_v39  ;;  %v4215_v39 = vor.u32 %v4374_v21, %v4212_v8  ;;  %v3243_v8 = vld [vmem:[#allocation10 + $0x60] sm:$0xff] }
 0x409   :  { %v3488_v46 = vadd.f32 %v3424_v5, %v3360_v19  ;;  %v3366_v5 = vmul.f32 0.0016666667, %v3302_v61  ;;  %v3242_v61 = vld [vmem:[#allocation10 + $0x58] sm:$0xff] }
 0x40a   :  { %v3489_v18 = vadd.f32 %v3425_v47, %v3361_v23  ;;  %v3367_v47 = vmul.f32 0.0016666667, %v3303_v29 }
 0x40b   :  { %v3552_v44 = vadd.f32 %v3488_v46, %v3232_v57  ;;  %v2656_v46 = vld [vmem:[#allocation3 + $0x28] sm:$0xff] }
 0x40c   :  { %v3553_v0 = vadd.f32 %v3489_v18, %v3233_v42  ;;  %v3064_v56 = vpop.f32.mrf.mxu2  ;;  %v3153_v30 = vpop.f32.mrf.mxu3  ;;  %v3304_v18 = vunpack.c.h.bf16 %v2655_v1  ;;  %v3306_v31 = vunpack.c.h.bf16 %v2656_v46 }
 0x40d   :  { %3616 = vst [vmem:[#allocation10 + $0x8] sm:$0xff] %v3552_v44  ;;  %v3154_v34 = vadd.f32 %v3153_v30, %v3064_v56  ;;  %v2889_v51 = vpop.f32.mrf.mxu0  ;;  %v2978_v43 = vpop.f32.mrf.mxu1  ;;  %v3305_v44 = vunpack.c.l.bf16 %v2656_v46  ;;  %v3244_v46 = vld [vmem:[#allocation10 + $0x68] sm:$0xff] }
 0x40e   :  { %3617 = vst [vmem:[#allocation10 + $0x10] sm:$0xff] %v3553_v0  ;;  %v2979_v22 = vadd.f32 %v2978_v43, %v2889_v51 }
 0x40f   :  { %v3426_v53 = vmul.f32 1.6666667e-05, %v3154_v34  ;;  %v3368_v34 = vmul.f32 0.0016666667, %v3304_v18 }
 0x410   :  { %v3427_v41 = vmul.f32 1.6666667e-05, %v2979_v22  ;;  %2928 = vmatmul.bf16.gmra.mxu0 %v4203_v2  ;;  %3017 = vmatmul.bf16.gmra.mxu1 %v4207_v60  ;;  %v3369_v22 = vmul.f32 0.0016666667, %v3305_v44  ;;  %v4378_v44 = vld [vmem:[#allocation3 + $0xc4] sm:$0xf] }
 0x411   :  { %v3490_v14 = vadd.f32 %v3426_v53, %v3362_v63  ;;  %3106 = vmatmul.bf16.gmra.mxu2 %v4203_v2  ;;  %3195 = vmatmul.bf16.gmra.mxu3 %v4207_v60  ;;  %v2657_v53 = vld [vmem:[#allocation3 + $0x30] sm:$0xff] }
 0x412   :  { %v3491_v52 = vadd.f32 %v3427_v41, %v3363_v55 }
 0x413   :  { %v3554_v27 = vadd.f32 %v3490_v14, %v3234_v10  ;;  %v3241_v10 = vld [vmem:[#allocation10 + $0x50] sm:$0xff] }
 0x414   :  { %v3555_v40 = vadd.f32 %v3491_v52, %v3235_v36  ;;  %v3067_v16 = vpop.f32.mrf.mxu2  ;;  %v3156_v25 = vpop.f32.mrf.mxu3  ;;  %v4218_v14 = vld [vmem:[#allocation3 + $0xb0] sm:$0xf]  ;;  %v4377_v52 = vld [vmem:[#allocation3 + $0xb4] sm:$0xf0] }
 0x415   :  { %3618 = vst [vmem:[#allocation10 + $0x18] sm:$0xff] %v3554_v27  ;;  %v3157_v38 = vadd.f32 %v3156_v25, %v3067_v16  ;;  %v2891_v20 = vpop.f32.mrf.mxu0  ;;  %v2980_v49 = vpop.f32.mrf.mxu1  ;;  %v4220_v27 = vld [vmem:[#allocation3 + $0xb8] sm:$0xf0]  ;;  %v3307_v16 = vunpack.c.l.bf16 %v2657_v53 }
 0x416   :  { %3619 = vst [vmem:[#allocation10 + $0x20] sm:$0xff] %v3555_v40  ;;  %v2981_v11 = vadd.f32 %v2980_v49, %v2891_v20  ;;  %v4219_v49 = vor.u32 %v4377_v52, %v4218_v14 }
 0x417   :  { %v3428_v48 = vmul.f32 1.6666667e-05, %v3157_v38 }
 0x418   :  { %v3429_v28 = vmul.f32 1.6666667e-05, %v2981_v11  ;;  %v4223_v11 = vor.u32 %v4376_v62, %v4220_v27  ;;  %v3247_v27 = vld [vmem:[#allocation10 + $0x80] sm:$0xff] }
 0x419   :  { %v3492_v54 = vadd.f32 %v3428_v48, %v3364_v58  ;;  %v3370_v48 = vmul.f32 0.0016666667, %v3306_v31  ;;  %v3246_v31 = vld [vmem:[#allocation10 + $0x78] sm:$0xff] }
 0x41a   :  { %v3493_v9 = vadd.f32 %v3429_v28, %v3365_v12  ;;  %v3371_v28 = vmul.f32 0.0016666667, %v3307_v16 }
 0x41b   :  { %v3556_v50 = vadd.f32 %v3492_v54, %v3236_v15  ;;  %v2658_v54 = vld [vmem:[#allocation3 + $0x38] sm:$0xff] }
 0x41c   :  { %v3557_v17 = vadd.f32 %v3493_v9, %v3237_v4  ;;  %v3069_v19 = vpop.f32.mrf.mxu2  ;;  %v3158_v37 = vpop.f32.mrf.mxu3  ;;  %v3308_v9 = vunpack.c.h.bf16 %v2657_v53  ;;  %v3310_v18 = vunpack.c.h.bf16 %v2658_v54 }
 0x41d   :  { %3620 = vst [vmem:[#allocation10 + $0x28] sm:$0xff] %v3556_v50  ;;  %v3159_v23 = vadd.f32 %v3158_v37, %v3069_v19  ;;  %v2894_v26 = vpop.f32.mrf.mxu0  ;;  %v2983_v57 = vpop.f32.mrf.mxu1  ;;  %v3309_v50 = vunpack.c.l.bf16 %v2658_v54  ;;  %v3248_v54 = vld [vmem:[#allocation10 + $0x88] sm:$0xff] }
 0x41e   :  { %3621 = vst [vmem:[#allocation10 + $0x30] sm:$0xff] %v3557_v17  ;;  %v2984_v42 = vadd.f32 %v2983_v57, %v2894_v26 }
 0x41f   :  { %v3430_v35 = vmul.f32 1.6666667e-05, %v3159_v23  ;;  %v3372_v23 = vmul.f32 0.0016666667, %v3308_v9 }
 0x420   :  { %v3431_v33 = vmul.f32 1.6666667e-05, %v2984_v42  ;;  %2933 = vmatmul.bf16.gmra.mxu0 %v4211_v32  ;;  %3022 = vmatmul.bf16.gmra.mxu1 %v4215_v39  ;;  %v3373_v42 = vmul.f32 0.0016666667, %v3309_v50  ;;  %v4380_v50 = vld [vmem:[#allocation3 + $0xd4] sm:$0xf] }
 0x421   :  { %v3494_v24 = vadd.f32 %v3430_v35, %v3366_v5  ;;  %3111 = vmatmul.bf16.gmra.mxu2 %v4211_v32  ;;  %3200 = vmatmul.bf16.gmra.mxu3 %v4215_v39  ;;  %v2659_v35 = vld [vmem:[#allocation3 + $0x40] sm:$0xff] }
 0x422   :  { %v3495_v13 = vadd.f32 %v3431_v33, %v3367_v47 }
 0x423   :  { %v3558_v0 = vadd.f32 %v3494_v24, %v3238_v59  ;;  %v3245_v59 = vld [vmem:[#allocation10 + $0x70] sm:$0xff]  ;;  %v4226_v24 = vld [vmem:[#allocation3 + $0xc0] sm:$0xf] }
 0x424   :  { %v3559_v56 = vadd.f32 %v3495_v13, %v3239_v6  ;;  %v3072_v30 = vpop.f32.mrf.mxu2  ;;  %v3161_v2 = vpop.f32.mrf.mxu3  ;;  %v4379_v13 = vld [vmem:[#allocation3 + $0xc4] sm:$0xf0] }
 0x425   :  { %3622 = vst [vmem:[#allocation10 + $0x38] sm:$0xff] %v3558_v0  ;;  %v3162_v60 = vadd.f32 %v3161_v2, %v3072_v30  ;;  %v2896_v63 = vpop.f32.mrf.mxu0  ;;  %v2985_v51 = vpop.f32.mrf.mxu1  ;;  %v4228_v0 = vld [vmem:[#allocation3 + $0xc8] sm:$0xf0]  ;;  %v3311_v30 = vunpack.c.l.bf16 %v2659_v35 }
 0x426   :  { %3623 = vst [vmem:[#allocation10 + $0x40] sm:$0xff] %v3559_v56  ;;  %v2986_v43 = vadd.f32 %v2985_v51, %v2896_v63  ;;  %v4227_v51 = vor.u32 %v4379_v13, %v4226_v24 }
 0x427   :  { %v3432_v55 = vmul.f32 1.6666667e-05, %v3162_v60 }
 0x428   :  { %v3433_v41 = vmul.f32 1.6666667e-05, %v2986_v43  ;;  %v4231_v43 = vor.u32 %v4378_v44, %v4228_v0  ;;  %v3251_v0 = vld [vmem:[#allocation10 + $0xa0] sm:$0xff] }
 0x429   :  { %v3496_v36 = vadd.f32 %v3432_v55, %v3368_v34  ;;  %v3374_v55 = vmul.f32 0.0016666667, %v3310_v18  ;;  %v3250_v18 = vld [vmem:[#allocation10 + $0x98] sm:$0xff] }
 0x42a   :  { %v3497_v40 = vadd.f32 %v3433_v41, %v3369_v22  ;;  %v3375_v41 = vmul.f32 0.0016666667, %v3311_v30 }
 0x42b   :  { %v3560_v25 = vadd.f32 %v3496_v36, %v3240_v45  ;;  %v2660_v36 = vld [vmem:[#allocation3 + $0x48] sm:$0xff] }
 0x42c   :  { %v3561_v38 = vadd.f32 %v3497_v40, %v3241_v10  ;;  %v3074_v58 = vpop.f32.mrf.mxu2  ;;  %v3163_v20 = vpop.f32.mrf.mxu3  ;;  %v3312_v40 = vunpack.c.h.bf16 %v2659_v35  ;;  %v3314_v9 = vunpack.c.h.bf16 %v2660_v36 }
 0x42d   :  { %3624 = vst [vmem:[#allocation10 + $0x48] sm:$0xff] %v3560_v25  ;;  %v3164_v12 = vadd.f32 %v3163_v20, %v3074_v58  ;;  %v2899_v1 = vpop.f32.mrf.mxu0  ;;  %v2988_v15 = vpop.f32.mrf.mxu1  ;;  %v3313_v25 = vunpack.c.l.bf16 %v2660_v36  ;;  %v3252_v36 = vld [vmem:[#allocation10 + $0xa8] sm:$0xff] }
 0x42e   :  { %3625 = vst [vmem:[#allocation10 + $0x50] sm:$0xff] %v3561_v38  ;;  %v2989_v4 = vadd.f32 %v2988_v15, %v2899_v1 }
 0x42f   :  { %v3434_v7 = vmul.f32 1.6666667e-05, %v3164_v12  ;;  %v3376_v12 = vmul.f32 0.0016666667, %v3312_v40 }
 0x430   :  { %v3435_v3 = vmul.f32 1.6666667e-05, %v2989_v4  ;;  %2938 = vmatmul.bf16.gmra.mxu0 %v4219_v49  ;;  %3027 = vmatmul.bf16.gmra.mxu1 %v4223_v11  ;;  %v3377_v4 = vmul.f32 0.0016666667, %v3313_v25  ;;  %v4382_v25 = vld [vmem:[#allocation3 + $0xe4] sm:$0xf] }
 0x431   :  { %v3498_v21 = vadd.f32 %v3434_v7, %v3370_v48  ;;  %3116 = vmatmul.bf16.gmra.mxu2 %v4219_v49  ;;  %3205 = vmatmul.bf16.gmra.mxu3 %v4223_v11  ;;  %v2661_v7 = vld [vmem:[#allocation3 + $0x50] sm:$0xff] }
 0x432   :  { %v3499_v29 = vadd.f32 %v3435_v3, %v3371_v28 }
 0x433   :  { %v3562_v17 = vadd.f32 %v3498_v21, %v3242_v61  ;;  %v3249_v61 = vld [vmem:[#allocation10 + $0x90] sm:$0xff] }
 0x434   :  { %v3563_v19 = vadd.f32 %v3499_v29, %v3243_v8  ;;  %v3077_v37 = vpop.f32.mrf.mxu2  ;;  %v3166_v32 = vpop.f32.mrf.mxu3  ;;  %v4234_v21 = vld [vmem:[#allocation3 + $0xd0] sm:$0xf]  ;;  %v4381_v29 = vld [vmem:[#allocation3 + $0xd4] sm:$0xf0] }
 0x435   :  { %3626 = vst [vmem:[#allocation10 + $0x58] sm:$0xff] %v3562_v17  ;;  %v3167_v39 = vadd.f32 %v3166_v32, %v3077_v37  ;;  %v2901_v5 = vpop.f32.mrf.mxu0  ;;  %v2990_v26 = vpop.f32.mrf.mxu1  ;;  %v4236_v17 = vld [vmem:[#allocation3 + $0xd8] sm:$0xf0]  ;;  %v3315_v37 = vunpack.c.l.bf16 %v2661_v7 }
 0x436   :  { %3627 = vst [vmem:[#allocation10 + $0x60] sm:$0xff] %v3563_v19  ;;  %v2991_v57 = vadd.f32 %v2990_v26, %v2901_v5  ;;  %v4235_v26 = vor.u32 %v4381_v29, %v4234_v21 }
 0x437   :  { %v3436_v47 = vmul.f32 1.6666667e-05, %v3167_v39 }
 0x438   :  { %v3437_v33 = vmul.f32 1.6666667e-05, %v2991_v57  ;;  %v4239_v57 = vor.u32 %v4380_v50, %v4236_v17  ;;  %v3255_v17 = vld [vmem:[#allocation10 + $0xc0] sm:$0xff] }
 0x439   :  { %v3500_v6 = vadd.f32 %v3436_v47, %v3372_v23  ;;  %v3378_v47 = vmul.f32 0.0016666667, %v3314_v9  ;;  %v3254_v9 = vld [vmem:[#allocation10 + $0xb8] sm:$0xff] }
 0x43a   :  { %v3501_v56 = vadd.f32 %v3437_v33, %v3373_v42  ;;  %v3379_v33 = vmul.f32 0.0016666667, %v3315_v37 }
 0x43b   :  { %v3564_v2 = vadd.f32 %v3500_v6, %v3244_v46  ;;  %v2662_v6 = vld [vmem:[#allocation3 + $0x58] sm:$0xff] }
 0x43c   :  { %v3565_v60 = vadd.f32 %v3501_v56, %v3245_v59  ;;  %v3079_v34 = vpop.f32.mrf.mxu2  ;;  %v3168_v63 = vpop.f32.mrf.mxu3  ;;  %v3316_v56 = vunpack.c.h.bf16 %v2661_v7  ;;  %v3318_v40 = vunpack.c.h.bf16 %v2662_v6 }
 0x43d   :  { %3628 = vst [vmem:[#allocation10 + $0x68] sm:$0xff] %v3564_v2  ;;  %v3169_v22 = vadd.f32 %v3168_v63, %v3079_v34  ;;  %v2904_v53 = vpop.f32.mrf.mxu0  ;;  %v2993_v45 = vpop.f32.mrf.mxu1  ;;  %v3317_v2 = vunpack.c.l.bf16 %v2662_v6  ;;  %v3256_v6 = vld [vmem:[#allocation10 + $0xc8] sm:$0xff] }
 0x43e   :  { %3629 = vst [vmem:[#allocation10 + $0x70] sm:$0xff] %v3565_v60  ;;  %v2994_v10 = vadd.f32 %v2993_v45, %v2904_v53 }
 0x43f   :  { %v3438_v14 = vmul.f32 1.6666667e-05, %v3169_v22  ;;  %v3380_v22 = vmul.f32 0.0016666667, %v3316_v56 }
 0x440   :  { %v3439_v52 = vmul.f32 1.6666667e-05, %v2994_v10  ;;  %2943 = vmatmul.bf16.gmra.mxu0 %v4227_v51  ;;  %3032 = vmatmul.bf16.gmra.mxu1 %v4231_v43  ;;  %v3381_v10 = vmul.f32 0.0016666667, %v3317_v2  ;;  %v4384_v2 = vld [vmem:[#allocation3 + $0xf4] sm:$0xf] }
 0x441   :  { %v3502_v62 = vadd.f32 %v3438_v14, %v3374_v55  ;;  %3121 = vmatmul.bf16.gmra.mxu2 %v4227_v51  ;;  %3210 = vmatmul.bf16.gmra.mxu3 %v4231_v43  ;;  %v2663_v14 = vld [vmem:[#allocation3 + $0x60] sm:$0xff] }
 0x442   :  { %v3503_v16 = vadd.f32 %v3439_v52, %v3375_v41 }
 0x443   :  { %v3566_v38 = vadd.f32 %v3502_v62, %v3246_v31  ;;  %v3253_v31 = vld [vmem:[#allocation10 + $0xb0] sm:$0xff]  ;;  %v4242_v62 = vld [vmem:[#allocation3 + $0xe0] sm:$0xf] }
 0x444   :  { %v3567_v58 = vadd.f32 %v3503_v16, %v3247_v27  ;;  %v3082_v20 = vpop.f32.mrf.mxu2  ;;  %v3171_v49 = vpop.f32.mrf.mxu3  ;;  %v4383_v16 = vld [vmem:[#allocation3 + $0xe4] sm:$0xf0] }
 0x445   :  { %3630 = vst [vmem:[#allocation10 + $0x78] sm:$0xff] %v3566_v38  ;;  %v3172_v11 = vadd.f32 %v3171_v49, %v3082_v20  ;;  %v2906_v48 = vpop.f32.mrf.mxu0  ;;  %v2995_v1 = vpop.f32.mrf.mxu1  ;;  %v4244_v38 = vld [vmem:[#allocation3 + $0xe8] sm:$0xf0]  ;;  %v3319_v20 = vunpack.c.l.bf16 %v2663_v14 }
 0x446   :  { %3631 = vst [vmem:[#allocation10 + $0x80] sm:$0xff] %v3567_v58  ;;  %v2996_v15 = vadd.f32 %v2995_v1, %v2906_v48  ;;  %v4243_v1 = vor.u32 %v4383_v16, %v4242_v62 }
 0x447   :  { %v3440_v28 = vmul.f32 1.6666667e-05, %v3172_v11 }
 0x448   :  { %v3441_v3 = vmul.f32 1.6666667e-05, %v2996_v15  ;;  %v4247_v15 = vor.u32 %v4382_v25, %v4244_v38  ;;  %v3259_v38 = vld [vmem:[#allocation10 + $0xe0] sm:$0xff] }
 0x449   :  { %v3504_v8 = vadd.f32 %v3440_v28, %v3376_v12  ;;  %v3382_v28 = vmul.f32 0.0016666667, %v3318_v40  ;;  %v3258_v40 = vld [vmem:[#allocation10 + $0xd8] sm:$0xff] }
 0x44a   :  { %v3505_v19 = vadd.f32 %v3441_v3, %v3377_v4  ;;  %v3383_v3 = vmul.f32 0.0016666667, %v3319_v20 }
 0x44b   :  { %v3568_v32 = vadd.f32 %v3504_v8, %v3248_v54  ;;  %v2664_v8 = vld [vmem:[#allocation3 + $0x68] sm:$0xff] }
 0x44c   :  { %v3569_v39 = vadd.f32 %v3505_v19, %v3249_v61  ;;  %v3084_v23 = vpop.f32.mrf.mxu2  ;;  %v3173_v5 = vpop.f32.mrf.mxu3  ;;  %v3320_v19 = vunpack.c.h.bf16 %v2663_v14  ;;  %v3322_v56 = vunpack.c.h.bf16 %v2664_v8 }
 0x44d   :  { %3632 = vst [vmem:[#allocation10 + $0x88] sm:$0xff] %v3568_v32  ;;  %v3174_v42 = vadd.f32 %v3173_v5, %v3084_v23  ;;  %v2909_v35 = vpop.f32.mrf.mxu0  ;;  %v2998_v46 = vpop.f32.mrf.mxu1  ;;  %v3321_v32 = vunpack.c.l.bf16 %v2664_v8  ;;  %v3260_v8 = vld [vmem:[#allocation10 + $0xe8] sm:$0xff] }
 0x44e   :  { %3633 = vst [vmem:[#allocation10 + $0x90] sm:$0xff] %v3569_v39  ;;  %v2999_v59 = vadd.f32 %v2998_v46, %v2909_v35 }
 0x44f   :  { %v3442_v24 = vmul.f32 1.6666667e-05, %v3174_v42  ;;  %v3384_v42 = vmul.f32 0.0016666667, %v3320_v19 }
 0x450   :  { %v3443_v13 = vmul.f32 1.6666667e-05, %v2999_v59  ;;  %2948 = vmatmul.bf16.gmra.mxu0 %v4235_v26  ;;  %3037 = vmatmul.bf16.gmra.mxu1 %v4239_v57  ;;  %v3385_v59 = vmul.f32 0.0016666667, %v3321_v32 }
 0x451   :  { %v3506_v44 = vadd.f32 %v3442_v24, %v3378_v47  ;;  %3126 = vmatmul.bf16.gmra.mxu2 %v4235_v26  ;;  %3215 = vmatmul.bf16.gmra.mxu3 %v4239_v57  ;;  %v2665_v24 = vld [vmem:[#allocation3 + $0x70] sm:$0xff] }
 0x452   :  { %v3507_v30 = vadd.f32 %v3443_v13, %v3379_v33 }
 0x453   :  { %v3570_v60 = vadd.f32 %v3506_v44, %v3250_v18  ;;  %v3257_v18 = vld [vmem:[#allocation10 + $0xd0] sm:$0xff] }
 0x454   :  { %v3571_v34 = vadd.f32 %v3507_v30, %v3251_v0  ;;  %v3087_v63 = vpop.f32.mrf.mxu2  ;;  %v3176_v51 = vpop.f32.mrf.mxu3  ;;  %v4250_v44 = vld [vmem:[#allocation3 + $0xf0] sm:$0xf]  ;;  %v4385_v30 = vld [vmem:[#allocation3 + $0xf4] sm:$0xf0] }
 0x455   :  { %3634 = vst [vmem:[#allocation10 + $0x98] sm:$0xff] %v3570_v60  ;;  %v3177_v43 = vadd.f32 %v3176_v51, %v3087_v63  ;;  %v2911_v55 = vpop.f32.mrf.mxu0  ;;  %v3000_v53 = vpop.f32.mrf.mxu1  ;;  %v4252_v60 = vld [vmem:[#allocation3 + $0xf8] sm:$0xf0]  ;;  %v3323_v63 = vunpack.c.l.bf16 %v2665_v24 }
 0x456   :  { %3635 = vst [vmem:[#allocation10 + $0xa0] sm:$0xff] %v3571_v34  ;;  %v3001_v45 = vadd.f32 %v3000_v53, %v2911_v55  ;;  %v4251_v53 = vor.u32 %v4385_v30, %v4250_v44 }
 0x457   :  { %v3444_v41 = vmul.f32 1.6666667e-05, %v3177_v43 }
 0x458   :  { %v3445_v52 = vmul.f32 1.6666667e-05, %v3001_v45  ;;  %v4255_v45 = vor.u32 %v4384_v2, %v4252_v60 }
 0x459   :  { %v3508_v27 = vadd.f32 %v3444_v41, %v3380_v22  ;;  %v3386_v41 = vmul.f32 0.0016666667, %v3322_v56 }
 0x45a   :  { %v3509_v58 = vadd.f32 %v3445_v52, %v3381_v10  ;;  %v3387_v52 = vmul.f32 0.0016666667, %v3323_v63 }
 0x45b   :  { %v3572_v49 = vadd.f32 %v3508_v27, %v3252_v36  ;;  %v2666_v27 = vld [vmem:[#allocation3 + $0x78] sm:$0xff] }
 0x45c   :  { %v3573_v11 = vadd.f32 %v3509_v58, %v3253_v31  ;;  %v3089_v12 = vpop.f32.mrf.mxu2  ;;  %v3178_v48 = vpop.f32.mrf.mxu3  ;;  %v3324_v58 = vunpack.c.h.bf16 %v2665_v24  ;;  %v3262_v24 = vld [vmem:[#allocation10 + $0xf8] sm:$0xff] }
 0x45d   :  { %3636 = vst [vmem:[#allocation10 + $0xa8] sm:$0xff] %v3572_v49  ;;  %v3179_v4 = vadd.f32 %v3178_v48, %v3089_v12  ;;  %v2914_v7 = vpop.f32.mrf.mxu0  ;;  %v3003_v54 = vpop.f32.mrf.mxu1  ;;  %v3325_v49 = vunpack.c.l.bf16 %v2666_v27 }
 0x45e   :  { %3637 = vst [vmem:[#allocation10 + $0xb0] sm:$0xff] %v3573_v11  ;;  %v3004_v61 = vadd.f32 %v3003_v54, %v2914_v7 }
 0x45f   :  { %v3446_v21 = vmul.f32 1.6666667e-05, %v3179_v4  ;;  %v3388_v4 = vmul.f32 0.0016666667, %v3324_v58 }
 0x460   :  { %v3447_v29 = vmul.f32 1.6666667e-05, %v3004_v61  ;;  %2953 = vmatmul.bf16.gmra.mxu0 %v4243_v1  ;;  %3042 = vmatmul.bf16.gmra.mxu1 %v4247_v15  ;;  %v3389_v61 = vmul.f32 0.0016666667, %v3325_v49 }
 0x461   :  { %v3510_v50 = vadd.f32 %v3446_v21, %v3382_v28  ;;  %3131 = vmatmul.bf16.gmra.mxu2 %v4243_v1  ;;  %3220 = vmatmul.bf16.gmra.mxu3 %v4247_v15  ;;  %v2667_v21 = vld [vmem:[#allocation3 + $0x80] sm:$0xff] }
 0x462   :  { %v3511_v37 = vadd.f32 %v3447_v29, %v3383_v3  ;;  %v3328_v44 = vunpack.c.h.bf16 %v2667_v21 }
 0x463   :  { %v3574_v39 = vadd.f32 %v3510_v50, %v3254_v9  ;;  %v3261_v50 = vld [vmem:[#allocation10 + $0xf0] sm:$0xff] }
 0x464   :  { %v3575_v23 = vadd.f32 %v3511_v37, %v3255_v17  ;;  %v3092_v5 = vpop.f32.mrf.mxu2  ;;  %v3181_v26 = vpop.f32.mrf.mxu3  ;;  %v3326_v17 = vunpack.c.h.bf16 %v2666_v27  ;;  %v3327_v37 = vunpack.c.l.bf16 %v2667_v21 }
 0x465   :  { %3638 = vst [vmem:[#allocation10 + $0xb8] sm:$0xff] %v3574_v39  ;;  %v3182_v57 = vadd.f32 %v3181_v26, %v3092_v5  ;;  %v2916_v47 = vpop.f32.mrf.mxu0  ;;  %v3005_v35 = vpop.f32.mrf.mxu1 }
 0x466   :  { %3639 = vst [vmem:[#allocation10 + $0xc0] sm:$0xff] %v3575_v23  ;;  %v3006_v46 = vadd.f32 %v3005_v35, %v2916_v47 }
 0x467   :  { %v3448_v33 = vmul.f32 1.6666667e-05, %v3182_v57  ;;  %v3390_v57 = vmul.f32 0.0016666667, %v3326_v17 }
 0x468   :  { %v3449_v13 = vmul.f32 1.6666667e-05, %v3006_v46  ;;  %v3391_v46 = vmul.f32 0.0016666667, %v3327_v37 }
 0x469   :  { %v3512_v0 = vadd.f32 %v3448_v33, %v3384_v42  ;;  %v2668_v33 = vld [vmem:[#allocation3 + $0x88] sm:$0xff] }
 0x46a   :  { %v3513_v34 = vadd.f32 %v3449_v13, %v3385_v59  ;;  %v3263_v13 = vld [vmem:[#allocation10 + $0x100] sm:$0xff]  ;;  %v3329_v56 = vunpack.c.l.bf16 %v2668_v33 }
 0x46b   :  { %v3576_v51 = vadd.f32 %v3512_v0, %v3256_v6 }
 0x46c   :  { %v3577_v43 = vadd.f32 %v3513_v34, %v3257_v18  ;;  %v3094_v22 = vpop.f32.mrf.mxu2  ;;  %v3183_v55 = vpop.f32.mrf.mxu3 }
 0x46d   :  { %3640 = vst [vmem:[#allocation10 + $0xc8] sm:$0xff] %v3576_v51  ;;  %v3184_v10 = vadd.f32 %v3183_v55, %v3094_v22  ;;  %v2919_v14 = vpop.f32.mrf.mxu0  ;;  %v3008_v36 = vpop.f32.mrf.mxu1  ;;  %v3392_v51 = vmul.f32 0.0016666667, %v3328_v44 }
 0x46e   :  { %3641 = vst [vmem:[#allocation10 + $0xd0] sm:$0xff] %v3577_v43  ;;  %v3009_v31 = vadd.f32 %v3008_v36, %v2919_v14 }
 0x46f   :  { %v3450_v62 = vmul.f32 1.6666667e-05, %v3184_v10  ;;  %v2669_v10 = vld [vmem:[#allocation3 + $0x90] sm:$0xff] }
 0x470   :  { %v3451_v16 = vmul.f32 1.6666667e-05, %v3009_v31  ;;  %2958 = vmatmul.bf16.gmra.mxu0 %v4251_v53  ;;  %3047 = vmatmul.bf16.gmra.mxu1 %v4255_v45  ;;  %v3265_v31 = vld [vmem:[#allocation10 + $0x110] sm:$0xff]  ;;  %v3331_v27 = vunpack.c.l.bf16 %v2669_v10 }
 0x471   :  { %v3514_v25 = vadd.f32 %v3450_v62, %v3386_v41  ;;  %3136 = vmatmul.bf16.gmra.mxu2 %v4251_v53  ;;  %3225 = vmatmul.bf16.gmra.mxu3 %v4255_v45  ;;  %v3393_v53 = vmul.f32 0.0016666667, %v3329_v56  ;;  %v3264_v41 = vld [vmem:[#allocation10 + $0x108] sm:$0xff] }
 0x472   :  { %v3515_v20 = vadd.f32 %v3451_v16, %v3387_v52  ;;  %v3330_v52 = vunpack.c.h.bf16 %v2668_v33 }
 0x473   :  { %v3578_v11 = vadd.f32 %v3514_v25, %v3258_v40 }
 0x474   :  { %v3579_v12 = vadd.f32 %v3515_v20, %v3259_v38  ;;  %v3097_v48 = vpop.f32.mrf.mxu2  ;;  %v3186_v1 = vpop.f32.mrf.mxu3  ;;  %v3394_v20 = vmul.f32 0.0016666667, %v3330_v52 }
 0x475   :  { %3642 = vst [vmem:[#allocation10 + $0xd8] sm:$0xff] %v3578_v11  ;;  %v3187_v15 = vadd.f32 %v3186_v1, %v3097_v48  ;;  %v2921_v28 = vpop.f32.mrf.mxu0  ;;  %v3010_v7 = vpop.f32.mrf.mxu1  ;;  %v3395_v48 = vmul.f32 0.0016666667, %v3331_v27 }
 0x476   :  { %3643 = vst [vmem:[#allocation10 + $0xe0] sm:$0xff] %v3579_v12  ;;  %v3011_v54 = vadd.f32 %v3010_v7, %v2921_v28 }
 0x477   :  { %v3452_v3 = vmul.f32 1.6666667e-05, %v3187_v15  ;;  %v2670_v15 = vld [vmem:[#allocation3 + $0x98] sm:$0xff] }
 0x478   :  { %v3453_v9 = vmul.f32 1.6666667e-05, %v3011_v54  ;;  %v3267_v54 = vld [vmem:[#allocation10 + $0x120] sm:$0xff]  ;;  %v3333_v21 = vunpack.c.l.bf16 %v2670_v15 }
 0x479   :  { %v3516_v29 = vadd.f32 %v3452_v3, %v3388_v4  ;;  %v3266_v4 = vld [vmem:[#allocation10 + $0x118] sm:$0xff] }
 0x47a   :  { %v3517_v19 = vadd.f32 %v3453_v9, %v3389_v61  ;;  %v3332_v61 = vunpack.c.h.bf16 %v2669_v10 }
 0x47b   :  { %v3580_v32 = vadd.f32 %v3516_v29, %v3260_v8 }
 0x47c   :  { %v3581_v39 = vadd.f32 %v3517_v19, %v3261_v50  ;;  %v3099_v23 = vpop.f32.mrf.mxu2  ;;  %v3188_v5 = vpop.f32.mrf.mxu3  ;;  %v3396_v19 = vmul.f32 0.0016666667, %v3332_v61 }
 0x47d   :  { %3644 = vst [vmem:[#allocation10 + $0xe8] sm:$0xff] %v3580_v32  ;;  %v3189_v26 = vadd.f32 %v3188_v5, %v3099_v23  ;;  %v2924_v42 = vpop.f32.mrf.mxu0  ;;  %v3013_v47 = vpop.f32.mrf.mxu1  ;;  %v3397_v23 = vmul.f32 0.0016666667, %v3333_v21 }
 0x47e   :  { %3645 = vst [vmem:[#allocation10 + $0xf0] sm:$0xff] %v3581_v39  ;;  %v3014_v35 = vadd.f32 %v3013_v47, %v2924_v42 }
 0x47f   :  { %v3454_v59 = vmul.f32 1.6666667e-05, %v3189_v26  ;;  %v2671_v26 = vld [vmem:[#allocation3 + $0xa0] sm:$0xff] }
 0x480   :  { %v3455_v6 = vmul.f32 1.6666667e-05, %v3014_v35  ;;  %v3269_v35 = vld [vmem:[#allocation10 + $0x130] sm:$0xff]  ;;  %v3335_v33 = vunpack.c.l.bf16 %v2671_v26 }
 0x481   :  { %v3518_v18 = vadd.f32 %v3454_v59, %v3390_v57  ;;  %v3268_v57 = vld [vmem:[#allocation10 + $0x128] sm:$0xff] }
 0x482   :  { %v3519_v0 = vadd.f32 %v3455_v6, %v3391_v46  ;;  %v3334_v46 = vunpack.c.h.bf16 %v2670_v15 }
 0x483   :  { %v3582_v30 = vadd.f32 %v3518_v18, %v3262_v24 }
 0x484   :  { %v3583_v2 = vadd.f32 %v3519_v0, %v3263_v13  ;;  %v3102_v60 = vpop.f32.mrf.mxu2  ;;  %v3191_v34 = vpop.f32.mrf.mxu3  ;;  %v3398_v0 = vmul.f32 0.0016666667, %v3334_v46 }
 0x485   :  { %3646 = vst [vmem:[#allocation10 + $0xf8] sm:$0xff] %v3582_v30  ;;  %v3192_v63 = vadd.f32 %v3191_v34, %v3102_v60  ;;  %v2926_v43 = vpop.f32.mrf.mxu0  ;;  %v3015_v22 = vpop.f32.mrf.mxu1  ;;  %v3399_v60 = vmul.f32 0.0016666667, %v3335_v33 }
 0x486   :  { %3647 = vst [vmem:[#allocation10 + $0x100] sm:$0xff] %v3583_v2  ;;  %v3016_v55 = vadd.f32 %v3015_v22, %v2926_v43 }
 0x487   :  { %v3456_v45 = vmul.f32 1.6666667e-05, %v3192_v63  ;;  %v2672_v63 = vld [vmem:[#allocation3 + $0xa8] sm:$0xff] }
 0x488   :  { %v3457_v14 = vmul.f32 1.6666667e-05, %v3016_v55  ;;  %v3271_v55 = vld [vmem:[#allocation10 + $0x140] sm:$0xff]  ;;  %v3337_v10 = vunpack.c.l.bf16 %v2672_v63 }
 0x489   :  { %v3520_v36 = vadd.f32 %v3456_v45, %v3392_v51  ;;  %v3270_v51 = vld [vmem:[#allocation10 + $0x138] sm:$0xff] }
 0x48a   :  { %v3521_v62 = vadd.f32 %v3457_v14, %v3393_v53  ;;  %v3336_v53 = vunpack.c.h.bf16 %v2671_v26 }
 0x48b   :  { %v3584_v40 = vadd.f32 %v3520_v36, %v3264_v41 }
 0x48c   :  { %v3585_v16 = vadd.f32 %v3521_v62, %v3265_v31  ;;  %v3104_v25 = vpop.f32.mrf.mxu2  ;;  %v3193_v38 = vpop.f32.mrf.mxu3  ;;  %v3400_v62 = vmul.f32 0.0016666667, %v3336_v53 }
 0x48d   :  { %3648 = vst [vmem:[#allocation10 + $0x108] sm:$0xff] %v3584_v40  ;;  %v3194_v58 = vadd.f32 %v3193_v38, %v3104_v25  ;;  %v2929_v49 = vpop.f32.mrf.mxu0  ;;  %v3018_v11 = vpop.f32.mrf.mxu1  ;;  %v3401_v25 = vmul.f32 0.0016666667, %v3337_v10 }
 0x48e   :  { %3649 = vst [vmem:[#allocation10 + $0x110] sm:$0xff] %v3585_v16  ;;  %v3019_v12 = vadd.f32 %v3018_v11, %v2929_v49 }
 0x48f   :  { %v3458_v1 = vmul.f32 1.6666667e-05, %v3194_v58  ;;  %v2673_v58 = vld [vmem:[#allocation3 + $0xb0] sm:$0xff] }
 0x490   :  { %v3459_v28 = vmul.f32 1.6666667e-05, %v3019_v12  ;;  %v3273_v12 = vld [vmem:[#allocation10 + $0x150] sm:$0xff]  ;;  %v3339_v15 = vunpack.c.l.bf16 %v2673_v58 }
 0x491   :  { %v3522_v7 = vadd.f32 %v3458_v1, %v3394_v20  ;;  %v3272_v20 = vld [vmem:[#allocation10 + $0x148] sm:$0xff] }
 0x492   :  { %v3523_v3 = vadd.f32 %v3459_v28, %v3395_v48  ;;  %v3338_v48 = vunpack.c.h.bf16 %v2672_v63 }
 0x493   :  { %v3586_v8 = vadd.f32 %v3522_v7, %v3266_v4 }
 0x494   :  { %v3587_v9 = vadd.f32 %v3523_v3, %v3267_v54  ;;  %v3107_v29 = vpop.f32.mrf.mxu2  ;;  %v3196_v50 = vpop.f32.mrf.mxu3  ;;  %v3402_v3 = vmul.f32 0.0016666667, %v3338_v48 }
 0x495   :  { %3650 = vst [vmem:[#allocation10 + $0x118] sm:$0xff] %v3586_v8  ;;  %v3197_v17 = vadd.f32 %v3196_v50, %v3107_v29  ;;  %v2931_v37 = vpop.f32.mrf.mxu0  ;;  %v3020_v32 = vpop.f32.mrf.mxu1  ;;  %v3403_v29 = vmul.f32 0.0016666667, %v3339_v15 }
 0x496   :  { %3651 = vst [vmem:[#allocation10 + $0x120] sm:$0xff] %v3587_v9  ;;  %v3021_v39 = vadd.f32 %v3020_v32, %v2931_v37 }
 0x497   :  { %v3460_v5 = vmul.f32 1.6666667e-05, %v3197_v17  ;;  %v2674_v17 = vld [vmem:[#allocation3 + $0xb8] sm:$0xff] }
 0x498   :  { %v3461_v42 = vmul.f32 1.6666667e-05, %v3021_v39  ;;  %v3275_v39 = vld [vmem:[#allocation10 + $0x160] sm:$0xff]  ;;  %v3341_v26 = vunpack.c.l.bf16 %v2674_v17 }
 0x499   :  { %v3524_v47 = vadd.f32 %v3460_v5, %v3396_v19  ;;  %v3274_v19 = vld [vmem:[#allocation10 + $0x158] sm:$0xff] }
 0x49a   :  { %v3525_v59 = vadd.f32 %v3461_v42, %v3397_v23  ;;  %v3340_v23 = vunpack.c.h.bf16 %v2673_v58 }
 0x49b   :  { %v3588_v24 = vadd.f32 %v3524_v47, %v3268_v57 }
 0x49c   :  { %v3589_v6 = vadd.f32 %v3525_v59, %v3269_v35  ;;  %v3109_v18 = vpop.f32.mrf.mxu2  ;;  %v3198_v13 = vpop.f32.mrf.mxu3  ;;  %v3404_v59 = vmul.f32 0.0016666667, %v3340_v23 }
 0x49d   :  { %3652 = vst [vmem:[#allocation10 + $0x128] sm:$0xff] %v3588_v24  ;;  %v3199_v44 = vadd.f32 %v3198_v13, %v3109_v18  ;;  %v2934_v56 = vpop.f32.mrf.mxu0  ;;  %v3023_v30 = vpop.f32.mrf.mxu1  ;;  %v3405_v18 = vmul.f32 0.0016666667, %v3341_v26 }
 0x49e   :  { %3653 = vst [vmem:[#allocation10 + $0x130] sm:$0xff] %v3589_v6  ;;  %v3024_v2 = vadd.f32 %v3023_v30, %v2934_v56 }
 0x49f   :  { %v3462_v34 = vmul.f32 1.6666667e-05, %v3199_v44  ;;  %v2675_v44 = vld [vmem:[#allocation3 + $0xc0] sm:$0xff] }
 0x4a0   :  { %v3463_v43 = vmul.f32 1.6666667e-05, %v3024_v2  ;;  %v3277_v2 = vld [vmem:[#allocation10 + $0x170] sm:$0xff]  ;;  %v3343_v63 = vunpack.c.l.bf16 %v2675_v44 }
 0x4a1   :  { %v3526_v22 = vadd.f32 %v3462_v34, %v3398_v0  ;;  %v3276_v0 = vld [vmem:[#allocation10 + $0x168] sm:$0xff] }
 0x4a2   :  { %v3527_v45 = vadd.f32 %v3463_v43, %v3399_v60  ;;  %v3342_v60 = vunpack.c.h.bf16 %v2674_v17 }
 0x4a3   :  { %v3590_v41 = vadd.f32 %v3526_v22, %v3270_v51 }
 0x4a4   :  { %v3591_v14 = vadd.f32 %v3527_v45, %v3271_v55  ;;  %v3112_v36 = vpop.f32.mrf.mxu2  ;;  %v3201_v31 = vpop.f32.mrf.mxu3  ;;  %v3406_v45 = vmul.f32 0.0016666667, %v3342_v60 }
 0x4a5   :  { %3654 = vst [vmem:[#allocation10 + $0x138] sm:$0xff] %v3590_v41  ;;  %v3202_v52 = vadd.f32 %v3201_v31, %v3112_v36  ;;  %v2936_v27 = vpop.f32.mrf.mxu0  ;;  %v3025_v40 = vpop.f32.mrf.mxu1  ;;  %v3407_v36 = vmul.f32 0.0016666667, %v3343_v63 }
 0x4a6   :  { %3655 = vst [vmem:[#allocation10 + $0x140] sm:$0xff] %v3591_v14  ;;  %v3026_v16 = vadd.f32 %v3025_v40, %v2936_v27 }
 0x4a7   :  { %v3464_v38 = vmul.f32 1.6666667e-05, %v3202_v52  ;;  %v2676_v52 = vld [vmem:[#allocation3 + $0xc8] sm:$0xff] }
 0x4a8   :  { %v3465_v49 = vmul.f32 1.6666667e-05, %v3026_v16  ;;  %v3279_v16 = vld [vmem:[#allocation10 + $0x180] sm:$0xff]  ;;  %v3345_v58 = vunpack.c.l.bf16 %v2676_v52 }
 0x4a9   :  { %v3528_v11 = vadd.f32 %v3464_v38, %v3400_v62  ;;  %v3278_v62 = vld [vmem:[#allocation10 + $0x178] sm:$0xff] }
 0x4aa   :  { %v3529_v1 = vadd.f32 %v3465_v49, %v3401_v25  ;;  %v3344_v25 = vunpack.c.h.bf16 %v2675_v44 }
 0x4ab   :  { %v3592_v4 = vadd.f32 %v3528_v11, %v3272_v20 }
 0x4ac   :  { %v3593_v28 = vadd.f32 %v3529_v1, %v3273_v12  ;;  %v3114_v7 = vpop.f32.mrf.mxu2  ;;  %v3203_v54 = vpop.f32.mrf.mxu3  ;;  %v3408_v1 = vmul.f32 0.0016666667, %v3344_v25 }
 0x4ad   :  { %3656 = vst [vmem:[#allocation10 + $0x148] sm:$0xff] %v3592_v4  ;;  %v3204_v61 = vadd.f32 %v3203_v54, %v3114_v7  ;;  %v2939_v21 = vpop.f32.mrf.mxu0  ;;  %v3028_v8 = vpop.f32.mrf.mxu1  ;;  %v3409_v7 = vmul.f32 0.0016666667, %v3345_v58 }
 0x4ae   :  { %3657 = vst [vmem:[#allocation10 + $0x150] sm:$0xff] %v3593_v28  ;;  %v3029_v9 = vadd.f32 %v3028_v8, %v2939_v21 }
 0x4af   :  { %v3466_v50 = vmul.f32 1.6666667e-05, %v3204_v61  ;;  %v2677_v61 = vld [vmem:[#allocation3 + $0xd0] sm:$0xff] }
 0x4b0   :  { %v3467_v37 = vmul.f32 1.6666667e-05, %v3029_v9  ;;  %v3281_v9 = vld [vmem:[#allocation10 + $0x190] sm:$0xff]  ;;  %v3347_v17 = vunpack.c.l.bf16 %v2677_v61 }
 0x4b1   :  { %v3530_v32 = vadd.f32 %v3466_v50, %v3402_v3  ;;  %v3280_v3 = vld [vmem:[#allocation10 + $0x188] sm:$0xff] }
 0x4b2   :  { %v3531_v5 = vadd.f32 %v3467_v37, %v3403_v29  ;;  %v3346_v29 = vunpack.c.h.bf16 %v2676_v52 }
 0x4b3   :  { %v3594_v57 = vadd.f32 %v3530_v32, %v3274_v19 }
 0x4b4   :  { %v3595_v42 = vadd.f32 %v3531_v5, %v3275_v39  ;;  %v3117_v47 = vpop.f32.mrf.mxu2  ;;  %v3206_v35 = vpop.f32.mrf.mxu3  ;;  %v3410_v5 = vmul.f32 0.0016666667, %v3346_v29 }
 0x4b5   :  { %3658 = vst [vmem:[#allocation10 + $0x158] sm:$0xff] %v3594_v57  ;;  %v3207_v46 = vadd.f32 %v3206_v35, %v3117_v47  ;;  %v2941_v33 = vpop.f32.mrf.mxu0  ;;  %v3030_v24 = vpop.f32.mrf.mxu1  ;;  %v3411_v47 = vmul.f32 0.0016666667, %v3347_v17 }
 0x4b6   :  { %3659 = vst [vmem:[#allocation10 + $0x160] sm:$0xff] %v3595_v42  ;;  %v3031_v6 = vadd.f32 %v3030_v24, %v2941_v33 }
 0x4b7   :  { %v3468_v13 = vmul.f32 1.6666667e-05, %v3207_v46  ;;  %v2678_v46 = vld [vmem:[#allocation3 + $0xd8] sm:$0xff] }
 0x4b8   :  { %v3469_v56 = vmul.f32 1.6666667e-05, %v3031_v6  ;;  %v3283_v6 = vld [vmem:[#allocation10 + $0x1a0] sm:$0xff]  ;;  %v3349_v44 = vunpack.c.l.bf16 %v2678_v46 }
 0x4b9   :  { %v3532_v30 = vadd.f32 %v3468_v13, %v3404_v59  ;;  %v3282_v59 = vld [vmem:[#allocation10 + $0x198] sm:$0xff] }
 0x4ba   :  { %v3533_v34 = vadd.f32 %v3469_v56, %v3405_v18  ;;  %v3348_v18 = vunpack.c.h.bf16 %v2677_v61 }
 0x4bb   :  { %v3596_v51 = vadd.f32 %v3532_v30, %v3276_v0 }
 0x4bc   :  { %v3597_v43 = vadd.f32 %v3533_v34, %v3277_v2  ;;  %v3119_v22 = vpop.f32.mrf.mxu2  ;;  %v3208_v55 = vpop.f32.mrf.mxu3  ;;  %v3412_v34 = vmul.f32 0.0016666667, %v3348_v18 }
 0x4bd   :  { %3660 = vst [vmem:[#allocation10 + $0x168] sm:$0xff] %v3596_v51  ;;  %v3209_v53 = vadd.f32 %v3208_v55, %v3119_v22  ;;  %v2944_v10 = vpop.f32.mrf.mxu0  ;;  %v3033_v41 = vpop.f32.mrf.mxu1  ;;  %v3413_v22 = vmul.f32 0.0016666667, %v3349_v44 }
 0x4be   :  { %3661 = vst [vmem:[#allocation10 + $0x170] sm:$0xff] %v3597_v43  ;;  %v3034_v14 = vadd.f32 %v3033_v41, %v2944_v10 }
 0x4bf   :  { %v3470_v31 = vmul.f32 1.6666667e-05, %v3209_v53  ;;  %v2679_v53 = vld [vmem:[#allocation3 + $0xe0] sm:$0xff] }
 0x4c0   :  { %v3471_v27 = vmul.f32 1.6666667e-05, %v3034_v14  ;;  %v3285_v14 = vld [vmem:[#allocation10 + $0x1b0] sm:$0xff]  ;;  %v3351_v52 = vunpack.c.l.bf16 %v2679_v53 }
 0x4c1   :  { %v3534_v40 = vadd.f32 %v3470_v31, %v3406_v45  ;;  %v3284_v45 = vld [vmem:[#allocation10 + $0x1a8] sm:$0xff] }
 0x4c2   :  { %v3535_v38 = vadd.f32 %v3471_v27, %v3407_v36  ;;  %v3350_v36 = vunpack.c.h.bf16 %v2678_v46 }
 0x4c3   :  { %v3598_v20 = vadd.f32 %v3534_v40, %v3278_v62 }
 0x4c4   :  { %v3599_v49 = vadd.f32 %v3535_v38, %v3279_v16  ;;  %v3122_v11 = vpop.f32.mrf.mxu2  ;;  %v3211_v12 = vpop.f32.mrf.mxu3  ;;  %v3414_v38 = vmul.f32 0.0016666667, %v3350_v36 }
 0x4c5   :  { %3662 = vst [vmem:[#allocation10 + $0x178] sm:$0xff] %v3598_v20  ;;  %v3212_v48 = vadd.f32 %v3211_v12, %v3122_v11  ;;  %v2946_v15 = vpop.f32.mrf.mxu0  ;;  %v3035_v4 = vpop.f32.mrf.mxu1  ;;  %v3415_v11 = vmul.f32 0.0016666667, %v3351_v52 }
 0x4c6   :  { %3663 = vst [vmem:[#allocation10 + $0x180] sm:$0xff] %v3599_v49  ;;  %v3036_v28 = vadd.f32 %v3035_v4, %v2946_v15 }
 0x4c7   :  { %v3472_v54 = vmul.f32 1.6666667e-05, %v3212_v48  ;;  %v2680_v48 = vld [vmem:[#allocation3 + $0xe8] sm:$0xff] }
 0x4c8   :  { %v3473_v21 = vmul.f32 1.6666667e-05, %v3036_v28  ;;  %v3287_v28 = vld [vmem:[#allocation10 + $0x1c0] sm:$0xff]  ;;  %v3353_v61 = vunpack.c.l.bf16 %v2680_v48 }
 0x4c9   :  { %v3536_v8 = vadd.f32 %v3472_v54, %v3408_v1  ;;  %v3286_v1 = vld [vmem:[#allocation10 + $0x1b8] sm:$0xff] }
 0x4ca   :  { %v3537_v50 = vadd.f32 %v3473_v21, %v3409_v7  ;;  %v3352_v7 = vunpack.c.h.bf16 %v2679_v53 }
 0x4cb   :  { %v3600_v19 = vadd.f32 %v3536_v8, %v3280_v3 }
 0x4cc   :  { %v3601_v37 = vadd.f32 %v3537_v50, %v3281_v9  ;;  %v3124_v32 = vpop.f32.mrf.mxu2  ;;  %v3213_v39 = vpop.f32.mrf.mxu3  ;;  %v3416_v50 = vmul.f32 0.0016666667, %v3352_v7 }
 0x4cd   :  { %3664 = vst [vmem:[#allocation10 + $0x188] sm:$0xff] %v3600_v19  ;;  %v3214_v23 = vadd.f32 %v3213_v39, %v3124_v32  ;;  %v2949_v26 = vpop.f32.mrf.mxu0  ;;  %v3038_v57 = vpop.f32.mrf.mxu1  ;;  %v3417_v32 = vmul.f32 0.0016666667, %v3353_v61 }
 0x4ce   :  { %3665 = vst [vmem:[#allocation10 + $0x190] sm:$0xff] %v3601_v37  ;;  %v3039_v42 = vadd.f32 %v3038_v57, %v2949_v26 }
 0x4cf   :  { %v3474_v35 = vmul.f32 1.6666667e-05, %v3214_v23  ;;  %v2681_v23 = vld [vmem:[#allocation3 + $0xf0] sm:$0xff] }
 0x4d0   :  { %v3475_v33 = vmul.f32 1.6666667e-05, %v3039_v42  ;;  %v3289_v42 = vld [vmem:[#allocation10 + $0x1d0] sm:$0xff]  ;;  %v3355_v46 = vunpack.c.l.bf16 %v2681_v23 }
 0x4d1   :  { %v3538_v24 = vadd.f32 %v3474_v35, %v3410_v5  ;;  %v3288_v5 = vld [vmem:[#allocation10 + $0x1c8] sm:$0xff] }
 0x4d2   :  { %v3539_v13 = vadd.f32 %v3475_v33, %v3411_v47  ;;  %v3354_v47 = vunpack.c.h.bf16 %v2680_v48 }
 0x4d3   :  { %v3602_v0 = vadd.f32 %v3538_v24, %v3282_v59 }
 0x4d4   :  { %v3603_v56 = vadd.f32 %v3539_v13, %v3283_v6  ;;  %v3127_v30 = vpop.f32.mrf.mxu2  ;;  %v3216_v2 = vpop.f32.mrf.mxu3  ;;  %v3418_v13 = vmul.f32 0.0016666667, %v3354_v47 }
 0x4d5   :  { %3666 = vst [vmem:[#allocation10 + $0x198] sm:$0xff] %v3602_v0  ;;  %v3217_v60 = vadd.f32 %v3216_v2, %v3127_v30  ;;  %v2951_v63 = vpop.f32.mrf.mxu0  ;;  %v3040_v51 = vpop.f32.mrf.mxu1  ;;  %v3419_v30 = vmul.f32 0.0016666667, %v3355_v46 }
 0x4d6   :  { %3667 = vst [vmem:[#allocation10 + $0x1a0] sm:$0xff] %v3603_v56  ;;  %v3041_v43 = vadd.f32 %v3040_v51, %v2951_v63 }
 0x4d7   :  { %v3476_v55 = vmul.f32 1.6666667e-05, %v3217_v60  ;;  %v2682_v60 = vld [vmem:[#allocation3 + $0xf8] sm:$0xff] }
 0x4d8   :  { %v3477_v10 = vmul.f32 1.6666667e-05, %v3041_v43  ;;  %v3291_v43 = vld [vmem:[#allocation10 + $0x1e0] sm:$0xff]  ;;  %v3357_v53 = vunpack.c.l.bf16 %v2682_v60 }
 0x4d9   :  { %v3540_v41 = vadd.f32 %v3476_v55, %v3412_v34  ;;  %v3290_v34 = vld [vmem:[#allocation10 + $0x1d8] sm:$0xff] }
 0x4da   :  { %v3541_v31 = vadd.f32 %v3477_v10, %v3413_v22  ;;  %v3356_v22 = vunpack.c.h.bf16 %v2681_v23 }
 0x4db   :  { %v3604_v62 = vadd.f32 %v3540_v41, %v3284_v45 }
 0x4dc   :  { %v3605_v27 = vadd.f32 %v3541_v31, %v3285_v14  ;;  %v3129_v40 = vpop.f32.mrf.mxu2  ;;  %v3218_v16 = vpop.f32.mrf.mxu3  ;;  %v3420_v31 = vmul.f32 0.0016666667, %v3356_v22 }
 0x4dd   :  { %3668 = vst [vmem:[#allocation10 + $0x1a8] sm:$0xff] %v3604_v62  ;;  %v3219_v25 = vadd.f32 %v3218_v16, %v3129_v40  ;;  %v2954_v58 = vpop.f32.mrf.mxu0  ;;  %v3043_v20 = vpop.f32.mrf.mxu1  ;;  %v3421_v40 = vmul.f32 0.0016666667, %v3357_v53 }
 0x4de   :  { %3669 = vst [vmem:[#allocation10 + $0x1b0] sm:$0xff] %v3605_v27  ;;  %v3044_v49 = vadd.f32 %v3043_v20, %v2954_v58  ;;  %v3293_v20 = vld [vmem:[#allocation10 + $0x1f0] sm:$0xff] }
 0x4df   :  { %v3478_v12 = vmul.f32 1.6666667e-05, %v3219_v25  ;;  %v3292_v25 = vld [vmem:[#allocation10 + $0x1e8] sm:$0xff] }
 0x4e0   :  { %v3479_v15 = vmul.f32 1.6666667e-05, %v3044_v49  ;;  %v3358_v49 = vunpack.c.h.bf16 %v2682_v60 }
 0x4e1   :  { %v3542_v4 = vadd.f32 %v3478_v12, %v3414_v38 }
 0x4e2   :  { %v3543_v54 = vadd.f32 %v3479_v15, %v3415_v11 }
 0x4e3   :  { %v3606_v3 = vadd.f32 %v3542_v4, %v3286_v1 }
 0x4e4   :  { %v3607_v21 = vadd.f32 %v3543_v54, %v3287_v28  ;;  %v3132_v8 = vpop.f32.mrf.mxu2  ;;  %v3221_v9 = vpop.f32.mrf.mxu3  ;;  %v3422_v28 = vmul.f32 0.0016666667, %v3358_v49  ;;  %v3294_v54 = vld [vmem:[#allocation10 + $0x1f8] sm:$0xff] }
 0x4e5   :  { %3670 = vst [vmem:[#allocation10 + $0x1b8] sm:$0xff] %v3606_v3  ;;  %v3222_v29 = vadd.f32 %v3221_v9, %v3132_v8  ;;  %v2956_v17 = vpop.f32.mrf.mxu0  ;;  %v3045_v19 = vpop.f32.mrf.mxu1 }
 0x4e6   :  { %3671 = vst [vmem:[#allocation10 + $0x1c0] sm:$0xff] %v3607_v21  ;;  %v3046_v37 = vadd.f32 %v3045_v19, %v2956_v17 }
 0x4e7   :  { %v3480_v39 = vmul.f32 1.6666667e-05, %v3222_v29 }
 0x4e8   :  { %v3481_v26 = vmul.f32 1.6666667e-05, %v3046_v37 }
 0x4e9   :  { %v3544_v57 = vadd.f32 %v3480_v39, %v3416_v50 }
 0x4ea   :  { %v3545_v35 = vadd.f32 %v3481_v26, %v3417_v32 }
 0x4eb   :  { %v3608_v59 = vadd.f32 %v3544_v57, %v3288_v5 }
 0x4ec   :  { %v3609_v33 = vadd.f32 %v3545_v35, %v3289_v42  ;;  %v3134_v24 = vpop.f32.mrf.mxu2  ;;  %v3223_v6 = vpop.f32.mrf.mxu3 }
 0x4ed   :  { %3672 = vst [vmem:[#allocation10 + $0x1c8] sm:$0xff] %v3608_v59  ;;  %v3224_v18 = vadd.f32 %v3223_v6, %v3134_v24  ;;  %v2959_v44 = vpop.f32.mrf.mxu0  ;;  %v3048_v0 = vpop.f32.mrf.mxu1 }
 0x4ee   :  { %3673 = vst [vmem:[#allocation10 + $0x1d0] sm:$0xff] %v3609_v33  ;;  %v3049_v56 = vadd.f32 %v3048_v0, %v2959_v44 }
 0x4ef   :  { %v3482_v2 = vmul.f32 1.6666667e-05, %v3224_v18 }
 0x4f0   :  { %v3483_v63 = vmul.f32 1.6666667e-05, %v3049_v56 }
 0x4f1   :  { %v3546_v51 = vadd.f32 %v3482_v2, %v3418_v13 }
 0x4f2   :  { %v3547_v55 = vadd.f32 %v3483_v63, %v3419_v30 }
 0x4f3   :  { %v3610_v45 = vadd.f32 %v3546_v51, %v3290_v34 }
 0x4f4   :  { %v3611_v10 = vadd.f32 %v3547_v55, %v3291_v43  ;;  %v3137_v41 = vpop.f32.mrf.mxu2  ;;  %v3226_v14 = vpop.f32.mrf.mxu3 }
 0x4f5   :  { %3674 = vst [vmem:[#allocation10 + $0x1d8] sm:$0xff] %v3610_v45  ;;  %v3227_v36 = vadd.f32 %v3226_v14, %v3137_v41  ;;  %v2961_v52 = vpop.f32.mrf.mxu0  ;;  %v3050_v62 = vpop.f32.mrf.mxu1 }
 0x4f6   :  { %3675 = vst [vmem:[#allocation10 + $0x1e0] sm:$0xff] %v3611_v10  ;;  %v3051_v27 = vadd.f32 %v3050_v62, %v2961_v52 }
 0x4f7   :  { %v3484_v16 = vmul.f32 1.6666667e-05, %v3227_v36 }
 0x4f8   :  { %v3485_v38 = vmul.f32 1.6666667e-05, %v3051_v27 }
 0x4f9   :  { %v3548_v58 = vadd.f32 %v3484_v16, %v3420_v31 }
 0x4fa   :  { %v3549_v11 = vadd.f32 %v3485_v38, %v3421_v40 }
 0x4fb   :  { %v3612_v12 = vadd.f32 %v3548_v58, %v3292_v25 }
 0x4fc   :  { %v3613_v48 = vadd.f32 %v3549_v11, %v3293_v20  ;;  %v3139_v1 = vpop.f32.mrf.mxu2  ;;  %v3228_v15 = vpop.f32.mrf.mxu3 }
 0x4fd   :  { %3676 = vst [vmem:[#allocation10 + $0x1e8] sm:$0xff] %v3612_v12  ;;  %v3229_v4 = vadd.f32 %v3228_v15, %v3139_v1 }
 0x4fe   :  { %3677 = vst [vmem:[#allocation10 + $0x1f0] sm:$0xff] %v3613_v48 }
 0x4ff   :  { %v3486_v7 = vmul.f32 1.6666667e-05, %v3229_v4 }
 0x501   :  { %v3550_v61 = vadd.f32 %v3486_v7, %v3422_v28 }
 0x503   :  { %v3614_v3 = vadd.f32 %v3550_v61, %v3294_v54 }
 0x505   :  { %3678 = vst [vmem:[#allocation10 + $0x1f8] sm:$0xff] %v3614_v3 }
 0x506   :  { %3691 = dma.vmem_to_hbm [thread:$0]  %s3684_s8, 8192, %s3686_s11, [#allocation7], %s4534_s12, %s4534_s12, %s4535_s13  }
 0x507   :  { %4524 = dma.done.wait [#allocation7], 8192  }
 0x508   :  { %4525 = vsyncadd [#allocation7], 4294959104 }
 0x509   :  { %3696 = vsyncpa [#allocation6], 1 }
 0x50a   :  { %3697 = vsyncpa [#allocation9], 1 }
 0x50b   :  { %3698 = vsyncpa [#allocation7], 1 }
 0x50c   :  { %3699 = vsyncmov [#allocation4] }
 0x50f   :  { %s3700_s14 = vpop.sfrf %3699 }
 0x510   :  { %p4256_p0 = scmp.ne.s32.totalorder %s3700_s14, 0 }
 0x512   :  { %3704 = shalt.err (%p4256_p0)  }
 0x513   :  { %3706 = vsyncmov [#allocation4 + $0x1] }
 0x516   :  { %s3707_s4 = vpop.sfrf %3706 }
 0x517   :  { %p4257_p1 = scmp.ne.s32.totalorder %s3707_s4, 0 }
 0x519   :  { %3711 = shalt.err (%p4257_p1)  }

</bundles_post_ra>
